<compile_context>
chip_gen: v5e
topology: v5e:2x2
jax: 0.10.0
libtpu: 0.0.40
codegen_flags: <defaults>
</compile_context>

<pallas_src>
import functools

import jax
import jax.numpy as jnp
from jax import lax
from jax.experimental import pallas as pl
from jax.experimental.pallas import tpu as pltpu


# -----------------------------------------------------------------------------
# Tiling helpers
# -----------------------------------------------------------------------------
def _choose_tm(m, target=512):
    """Largest row tile <= target that divides M (whole array if M <= target)."""
    if m <= target:
        return m
    tm = target - (target % 16)
    while tm >= 16:
        if m % tm == 0:
            return tm
        tm -= 16
    return m


def _vmem_limit(tm, k, c, with_stats, out_itemsize):
    """Explicit scoped-VMEM request sized from the double-buffered tiles."""
    need = 2 * tm * k * 2            # double-buffered bf16 P tile
    need += k * c * 2 + c * 4        # resident bf16 weights + f32 bias
    need += 2 * tm * c * out_itemsize  # double-buffered output tile
    if with_stats:
        need += 2 * 2 * 8 * c * 4    # double-buffered (8, C) stats blocks
    need = int(need * 1.5) + (1 << 20)            # headroom for compiler temporaries
    return max(need, 16 * 1024 * 1024)            # never below the smallest default (v5e)


# -----------------------------------------------------------------------------
# Pallas kernels
# -----------------------------------------------------------------------------
def _conv_matmul_kernel(p_ref, w_ref, b_ref, o_ref, *stats_refs, act, with_stats):
    """out = act(P @ W + b); optionally emits per-channel partial sum / sumsq.

    P:[tm,K] bf16   W:[K,C] bf16   b:[1,C] f32   out:[tm,C]   stats: 2 x [8,C] f32
    """
    acc = jnp.dot(p_ref[...], w_ref[...], preferred_element_type=jnp.float32)
    acc = acc + b_ref[...]

    if with_stats:
        sum_ref, sq_ref = stats_refs
        c = acc.shape[-1]
        s = jnp.sum(acc, axis=0, keepdims=True)           # (1, C) per-tile sum (XLU)
        ss = jnp.sum(acc * acc, axis=0, keepdims=True)    # (1, C) per-tile sum of squares
        # 8-row blocks keep the (8, 128) tiling constraint; rows are identical.
        sum_ref[...] = jnp.broadcast_to(s, (8, c))
        sq_ref[...] = jnp.broadcast_to(ss, (8, c))

    if act == "leaky":
        acc = jnp.where(acc >= 0.0, acc, 0.2 * acc)
    elif act == "sigmoid":
        # EUP exp + approx EUP reciprocal; clamp guards the [0, 1] range.
        acc = pl.reciprocal(1.0 + jnp.exp(-acc), approx=True)
        acc = jnp.clip(acc, 0.0, 1.0)
    o_ref[...] = acc.astype(o_ref.dtype)


def _bn_leaky_kernel(y_ref, scale_ref, shift_ref, o_ref):
    """out = LeakyReLU_{0.2}(y * scale + shift)  (per-channel affine)."""
    z = y_ref[...] * scale_ref[...] + shift_ref[...]
    o_ref[...] = jnp.where(z >= 0.0, z, 0.2 * z).astype(o_ref.dtype)


# -----------------------------------------------------------------------------
# Pallas wrappers
# -----------------------------------------------------------------------------
def conv_matmul(p, w, b, *, act=None, with_stats=False,
                out_dtype=jnp.float32, tm_target=512):
    """Row-tiled patch-matrix matmul with fused bias / activation / BN partials."""
    m, k = p.shape
    _, c = w.shape
    tm = _choose_tm(m, tm_target)
    grid = (m // tm,)

    out_shape = [jax.ShapeDtypeStruct((m, c), out_dtype)]
    out_specs = [pl.BlockSpec((tm, c), lambda i: (i, 0))]
    if with_stats:
        out_shape += [jax.ShapeDtypeStruct((grid[0] * 8, c), jnp.float32)] * 2
        out_specs += [pl.BlockSpec((8, c), lambda i: (i, 0)),
                      pl.BlockSpec((8, c), lambda i: (i, 0))]
        out_shape = tuple(out_shape)
        out_specs = tuple(out_specs)
    else:
        out_shape = out_shape[0]
        out_specs = out_specs[0]

    kernel = functools.partial(_conv_matmul_kernel, act=act, with_stats=with_stats)
    return pl.pallas_call(
        kernel,
        grid=grid,
        out_shape=out_shape,
        in_specs=[
            pl.BlockSpec((tm, k), lambda i: (i, 0)),   # P row tile (double-buffered)
            pl.BlockSpec((k, c), lambda i: (0, 0)),    # weights resident in VMEM
            pl.BlockSpec((1, c), lambda i: (0, 0)),    # bias resident in VMEM
        ],
        out_specs=out_specs,
        compiler_params=pltpu.CompilerParams(
            dimension_semantics=("parallel",),
            vmem_limit_bytes=_vmem_limit(tm, k, c, with_stats,
                                         jnp.dtype(out_dtype).itemsize),
        ),
    )(p.astype(jnp.bfloat16), w, b.reshape(1, c))


def bn_leaky(y, scale, shift, *, out_dtype=jnp.bfloat16, tm_target=512):
    """Row-tiled fused BatchNorm affine + LeakyReLU(0.2) on [M, C]."""
    m, c = y.shape
    tm = _choose_tm(m, tm_target)
    vmem = max(int((2 * tm * c * 4 + 2 * tm * c * jnp.dtype(out_dtype).itemsize
                    + 2 * c * 4) * 1.5) + (1 << 20), 16 * 1024 * 1024)
    return pl.pallas_call(
        _bn_leaky_kernel,
        grid=(m // tm,),
        out_shape=jax.ShapeDtypeStruct((m, c), out_dtype),
        in_specs=[
            pl.BlockSpec((tm, c), lambda i: (i, 0)),
            pl.BlockSpec((1, c), lambda i: (0, 0)),
            pl.BlockSpec((1, c), lambda i: (0, 0)),
        ],
        out_specs=pl.BlockSpec((tm, c), lambda i: (i, 0)),
        compiler_params=pltpu.CompilerParams(
            dimension_semantics=("parallel",),
            vmem_limit_bytes=vmem,
        ),
    )(y, scale.reshape(1, c), shift.reshape(1, c))


# -----------------------------------------------------------------------------
# Plain-JAX glue: NHWC im2col, BN scale/shift from fused partials, params
# -----------------------------------------------------------------------------
def im2col_nhwc(x, k, stride, pad):
    """x: (N, H, W, C) -> (N*OH*OW, k*k*C) with (kh, kw, c) patch ordering."""
    # TODO(synk): fold im2col into the conv kernel via a (kh, kw) reduction grid
    # axis (shifted-window BlockSpecs + VMEM accumulator) to avoid materializing
    # the k*k-inflated patch matrix in HBM.
    x = jnp.pad(x, ((0, 0), (pad, pad), (pad, pad), (0, 0)))
    n, hp, wp, c = x.shape
    oh = (hp - k) // stride + 1
    ow = (wp - k) // stride + 1
    cols = []
    for i in range(k):
        for j in range(k):
            cols.append(x[:, i:i + stride * oh:stride, j:j + stride * ow:stride, :])
    patches = jnp.concatenate(cols, axis=-1)          # (N, OH, OW, k*k*C), (kh,kw,c)
    return patches.reshape(n * oh * ow, k * k * c), oh, ow


def bn_scale_shift(sums, sqsums, m_rows, gamma, beta, eps=1e-5):
    """Training-mode BN scale/shift from per-tile partial sums (tiny arrays)."""
    c = sums.shape[-1]
    s = sums.reshape(-1, 8, c)[:, 0, :].sum(axis=0)
    ss = sqsums.reshape(-1, 8, c)[:, 0, :].sum(axis=0)
    mean = s / m_rows
    var = jnp.maximum(ss / m_rows - mean * mean, 0.0)   # biased variance over (N,H,W)
    scale = gamma * lax.rsqrt(var + eps)
    shift = beta - mean * scale
    return scale, shift


def init_params(key):
    """PyTorch-default-style init; conv weights stored as (kh*kw*cin, cout) bf16."""
    def conv_init(k_, cout, cin, ksz):
        kw_, kb_ = jax.random.split(k_)
        fan_in = cin * ksz * ksz
        bound = 1.0 / float(fan_in) ** 0.5
        w = jax.random.uniform(kw_, (cout, cin, ksz, ksz), jnp.float32, -bound, bound)
        b = jax.random.uniform(kb_, (cout,), jnp.float32, -bound, bound)
        # (cout,cin,kh,kw) -> (kh,kw,cin,cout) -> (kh*kw*cin, cout); matches NHWC patches.
        w_mat = w.transpose(2, 3, 1, 0).reshape(ksz * ksz * cin, cout).astype(jnp.bfloat16)
        return w_mat, b

    k1, k2, k3, k4 = jax.random.split(key, 4)
    params = {}
    params["w1"], params["b1"] = conv_init(k1, 64, 1, 4)
    params["w2"], params["b2"] = conv_init(k2, 128, 64, 4)
    params["w3"], params["b3"] = conv_init(k3, 256, 128, 4)
    params["w4"], params["b4"] = conv_init(k4, 1, 256, 4)
    params["bn2_gamma"] = jnp.ones((128,), jnp.float32)
    params["bn2_beta"] = jnp.zeros((128,), jnp.float32)
    params["bn3_gamma"] = jnp.ones((256,), jnp.float32)
    params["bn3_beta"] = jnp.zeros((256,), jnp.float32)
    return params


def discriminator_forward(x, params):
    n = x.shape[0]
    # NCHW -> NHWC once, in bf16 (halves the boundary transpose, feeds the MXU).
    x = x.astype(jnp.bfloat16).transpose(0, 2, 3, 1)

    # Conv(1->64, k4 s2 p1) + LeakyReLU(0.2)           [fused, bf16 rows out]
    p, oh, ow = im2col_nhwc(x, 4, 2, 1)
    y = conv_matmul(p, params["w1"], params["b1"], act="leaky", out_dtype=jnp.bfloat16)
    x = y.reshape(n, oh, ow, 64)

    # Conv(64->128, k4 s2 p1) + BN(128) + LeakyReLU(0.2)   [BN stats fused in conv]
    p, oh, ow = im2col_nhwc(x, 4, 2, 1)
    y, s, ss = conv_matmul(p, params["w2"], params["b2"], with_stats=True)
    scale, shift = bn_scale_shift(s, ss, y.shape[0],
                                  params["bn2_gamma"], params["bn2_beta"])
    y = bn_leaky(y, scale, shift, out_dtype=jnp.bfloat16)
    x = y.reshape(n, oh, ow, 128)

    # Conv(128->256, k4 s2 p1) + BN(256) + LeakyReLU(0.2)
    p, oh, ow = im2col_nhwc(x, 4, 2, 1)
    y, s, ss = conv_matmul(p, params["w3"], params["b3"], with_stats=True)
    scale, shift = bn_scale_shift(s, ss, y.shape[0],
                                  params["bn3_gamma"], params["bn3_beta"])
    y = bn_leaky(y, scale, shift, out_dtype=jnp.bfloat16)
    x = y.reshape(n, oh, ow, 256)

    # Conv(256->1, k4 s1 p1) + Sigmoid                 [fused, f32 out]
    p, oh, ow = im2col_nhwc(x, 4, 1, 1)
    y = conv_matmul(p, params["w4"], params["b4"], act="sigmoid", out_dtype=jnp.float32)
    return y.reshape(n, oh, ow, 1).transpose(0, 3, 1, 2)   # back to NCHW at the boundary


# -----------------------------------------------------------------------------
if __name__ == "__main__":
    key = jax.random.PRNGKey(0)
    kx, kp = jax.random.split(key)

    # Input consistent with Conv2d(1, ...): N=2, C=1, H=W=16  -> output (2, 1, 1, 1)
    x = jax.random.normal(kx, (2, 1, 16, 16), jnp.float32)
    params = init_params(kp)

    out = jax.jit(discriminator_forward)(x, params)
    out = jax.block_until_ready(out)

    assert out.shape == (2, 1, 1, 1), out.shape
    assert bool(jnp.all((out >= 0.0) & (out <= 1.0)))
    print("KERNEL_OK")
</pallas_src>

<mosaic_0001>
module attributes {stable_mosaic.version = 11 : i64} {
  func.func @_conv_matmul_kernel(%arg0: i32, %arg1: memref<128x16xbf16, #tpu.memory_space<vmem>>, %arg2: memref<16x64xbf16, #tpu.memory_space<vmem>>, %arg3: memref<1x64xf32, #tpu.memory_space<vmem>>, %arg4: memref<128x64xbf16, #tpu.memory_space<vmem>>) attributes {dimension_semantics = [#tpu.dimension_semantics<parallel>], iteration_bounds = array<i64: 1>, scalar_prefetch = 0 : i64, scratch_operands = 0 : i64, tpu.core_type = #tpu.core_type<tc>, window_params = [{transform_indices = @transform_0, window_bounds = array<i64: 128, 16>}, {pipeline_mode = #tpu.pipeline_mode<synchronous>, transform_indices = @transform_1, window_bounds = array<i64: 16, 64>}, {pipeline_mode = #tpu.pipeline_mode<synchronous>, transform_indices = @transform_2, window_bounds = array<i64: 1, 64>}, {transform_indices = @transform_3, window_bounds = array<i64: 128, 64>}]} {
    %c0 = arith.constant 0 : index
    %c0_0 = arith.constant 0 : index
    %0 = vector.load %arg1[%c0, %c0_0] : memref<128x16xbf16, #tpu.memory_space<vmem>>, vector<128x16xbf16>
    %c0_1 = arith.constant 0 : index
    %c0_2 = arith.constant 0 : index
    %1 = vector.load %arg2[%c0_1, %c0_2] : memref<16x64xbf16, #tpu.memory_space<vmem>>, vector<16x64xbf16>
    %cst = arith.constant dense<0.000000e+00> : vector<128x64xf32>
    %2 = tpu.matmul %0, %1, %cst {dimension_numbers = #tpu.dot_dimension_numbers<[1], [0], [0], [1], [0, 0, 1, 1], [], []>} : vector<128x16xbf16>, vector<16x64xbf16>, vector<128x64xf32> -> vector<128x64xf32>
    %c0_3 = arith.constant 0 : index
    %c0_4 = arith.constant 0 : index
    %3 = vector.load %arg3[%c0_3, %c0_4] : memref<1x64xf32, #tpu.memory_space<vmem>>, vector<1x64xf32>
    %4 = vector.broadcast %3 : vector<1x64xf32> to vector<128x64xf32>
    %5 = arith.addf %2, %4 : vector<128x64xf32>
    %cst_5 = arith.constant 0.000000e+00 : f32
    %6 = vector.broadcast %cst_5 : f32 to vector<128x64xf32>
    %7 = arith.cmpf oge, %5, %6 : vector<128x64xf32>
    %cst_6 = arith.constant 2.000000e-01 : f32
    %8 = vector.broadcast %cst_6 : f32 to vector<128x64xf32>
    %9 = arith.mulf %8, %5 : vector<128x64xf32>
    %10 = arith.select %7, %5, %9 : vector<128x64xi1>, vector<128x64xf32>
    %11 = arith.truncf %10 : vector<128x64xf32> to vector<128x64xbf16>
    %c0_7 = arith.constant 0 : index
    %c0_8 = arith.constant 0 : index
    %12 = vector.load %arg4[%c0_7, %c0_8] : memref<128x64xbf16, #tpu.memory_space<vmem>>, vector<128x64xbf16>
    tpu.vector_store %arg4[%c0_7, %c0_8], %11 {strides = array<i32>} : memref<128x64xbf16, #tpu.memory_space<vmem>>, vector<128x64xbf16>,
    return
  }
  func.func @transform_0(%arg0: i32) -> (i32, i32) {
    %c0_i32 = arith.constant 0 : i32
    %c0_i32_0 = arith.constant 0 : i32
    return %arg0, %c0_i32 : i32, i32
  }
  func.func @transform_1(%arg0: i32) -> (i32, i32) {
    %c0_i32 = arith.constant 0 : i32
    %c0_i32_0 = arith.constant 0 : i32
    %c0_i32_1 = arith.constant 0 : i32
    return %c0_i32, %c0_i32_0 : i32, i32
  }
  func.func @transform_2(%arg0: i32) -> (i32, i32) {
    %c0_i32 = arith.constant 0 : i32
    %c0_i32_0 = arith.constant 0 : i32
    %c0_i32_1 = arith.constant 0 : i32
    return %c0_i32, %c0_i32_0 : i32, i32
  }
  func.func @transform_3(%arg0: i32) -> (i32, i32) {
    %c0_i32 = arith.constant 0 : i32
    %c0_i32_0 = arith.constant 0 : i32
    return %arg0, %c0_i32 : i32, i32
  }
}

module attributes {stable_mosaic.version = 11 : i64} {
  func.func @_conv_matmul_kernel(%arg0: i32, %arg1: memref<32x1024xbf16, #tpu.memory_space<vmem>>, %arg2: memref<1024x128xbf16, #tpu.memory_space<vmem>>, %arg3: memref<1x128xf32, #tpu.memory_space<vmem>>, %arg4: memref<32x128xf32, #tpu.memory_space<vmem>>, %arg5: memref<8x128xf32, #tpu.memory_space<vmem>>, %arg6: memref<8x128xf32, #tpu.memory_space<vmem>>) attributes {dimension_semantics = [#tpu.dimension_semantics<parallel>], iteration_bounds = array<i64: 1>, scalar_prefetch = 0 : i64, scratch_operands = 0 : i64, tpu.core_type = #tpu.core_type<tc>, window_params = [{transform_indices = @transform_0, window_bounds = array<i64: 32, 1024>}, {pipeline_mode = #tpu.pipeline_mode<synchronous>, transform_indices = @transform_1, window_bounds = array<i64: 1024, 128>}, {pipeline_mode = #tpu.pipeline_mode<synchronous>, transform_indices = @transform_2, window_bounds = array<i64: 1, 128>}, {transform_indices = @transform_3, window_bounds = array<i64: 32, 128>}, {transform_indices = @transform_4, window_bounds = array<i64: 8, 128>}, {transform_indices = @transform_5, window_bounds = array<i64: 8, 128>}]} {
    %c0 = arith.constant 0 : index
    %c0_0 = arith.constant 0 : index
    %0 = vector.load %arg1[%c0, %c0_0] : memref<32x1024xbf16, #tpu.memory_space<vmem>>, vector<32x1024xbf16>
    %c0_1 = arith.constant 0 : index
    %c0_2 = arith.constant 0 : index
    %1 = vector.load %arg2[%c0_1, %c0_2] : memref<1024x128xbf16, #tpu.memory_space<vmem>>, vector<1024x128xbf16>
    %cst = arith.constant dense<0.000000e+00> : vector<32x128xf32>
    %2 = tpu.matmul %0, %1, %cst {dimension_numbers = #tpu.dot_dimension_numbers<[1], [0], [0], [1], [0, 0, 1, 1], [], []>} : vector<32x1024xbf16>, vector<1024x128xbf16>, vector<32x128xf32> -> vector<32x128xf32>
    %c0_3 = arith.constant 0 : index
    %c0_4 = arith.constant 0 : index
    %3 = vector.load %arg3[%c0_3, %c0_4] : memref<1x128xf32, #tpu.memory_space<vmem>>, vector<1x128xf32>
    %4 = vector.broadcast %3 : vector<1x128xf32> to vector<32x128xf32>
    %5 = arith.addf %2, %4 : vector<32x128xf32>
    %cst_5 = arith.constant dense<0.000000e+00> : vector<128xf32>
    %6 = vector.multi_reduction <add>, %5, %cst_5 [0] : vector<32x128xf32> to vector<128xf32>
    %7 = vector.shape_cast %6 : vector<128xf32> to vector<1x128xf32>
    %8 = arith.mulf %5, %5 : vector<32x128xf32>
    %cst_6 = arith.constant dense<0.000000e+00> : vector<128xf32>
    %9 = vector.multi_reduction <add>, %8, %cst_6 [0] : vector<32x128xf32> to vector<128xf32>
    %10 = vector.shape_cast %9 : vector<128xf32> to vector<1x128xf32>
    %11 = vector.shape_cast %7 : vector<1x128xf32> to vector<1x128xf32>
    %12 = vector.broadcast %11 : vector<1x128xf32> to vector<8x128xf32>
    %c0_7 = arith.constant 0 : index
    %c0_8 = arith.constant 0 : index
    %13 = vector.load %arg5[%c0_7, %c0_8] : memref<8x128xf32, #tpu.memory_space<vmem>>, vector<8x128xf32>
    tpu.vector_store %arg5[%c0_7, %c0_8], %12 {strides = array<i32>} : memref<8x128xf32, #tpu.memory_space<vmem>>, vector<8x128xf32>,
    %14 = vector.shape_cast %10 : vector<1x128xf32> to vector<1x128xf32>
    %15 = vector.broadcast %14 : vector<1x128xf32> to vector<8x128xf32>
    %c0_9 = arith.constant 0 : index
    %c0_10 = arith.constant 0 : index
    %16 = vector.load %arg6[%c0_9, %c0_10] : memref<8x128xf32, #tpu.memory_space<vmem>>, vector<8x128xf32>
    tpu.vector_store %arg6[%c0_9, %c0_10], %15 {strides = array<i32>} : memref<8x128xf32, #tpu.memory_space<vmem>>, vector<8x128xf32>,
    %c0_11 = arith.constant 0 : index
    %c0_12 = arith.constant 0 : index
    %17 = vector.load %arg4[%c0_11, %c0_12] : memref<32x128xf32, #tpu.memory_space<vmem>>, vector<32x128xf32>
    tpu.vector_store %arg4[%c0_11, %c0_12], %5 {strides = array<i32>} : memref<32x128xf32, #tpu.memory_space<vmem>>, vector<32x128xf32>,
    return
  }
  func.func @transform_0(%arg0: i32) -> (i32, i32) {
    %c0_i32 = arith.constant 0 : i32
    %c0_i32_0 = arith.constant 0 : i32
    return %arg0, %c0_i32 : i32, i32
  }
  func.func @transform_1(%arg0: i32) -> (i32, i32) {
    %c0_i32 = arith.constant 0 : i32
    %c0_i32_0 = arith.constant 0 : i32
    %c0_i32_1 = arith.constant 0 : i32
    return %c0_i32, %c0_i32_0 : i32, i32
  }
  func.func @transform_2(%arg0: i32) -> (i32, i32) {
    %c0_i32 = arith.constant 0 : i32
    %c0_i32_0 = arith.constant 0 : i32
    %c0_i32_1 = arith.constant 0 : i32
    return %c0_i32, %c0_i32_0 : i32, i32
  }
  func.func @transform_3(%arg0: i32) -> (i32, i32) {
    %c0_i32 = arith.constant 0 : i32
    %c0_i32_0 = arith.constant 0 : i32
    return %arg0, %c0_i32 : i32, i32
  }
  func.func @transform_4(%arg0: i32) -> (i32, i32) {
    %c0_i32 = arith.constant 0 : i32
    %c0_i32_0 = arith.constant 0 : i32
    return %arg0, %c0_i32 : i32, i32
  }
  func.func @transform_5(%arg0: i32) -> (i32, i32) {
    %c0_i32 = arith.constant 0 : i32
    %c0_i32_0 = arith.constant 0 : i32
    return %arg0, %c0_i32 : i32, i32
  }
}

module attributes {stable_mosaic.version = 11 : i64} {
  func.func @_bn_leaky_kernel(%arg0: i32, %arg1: memref<32x128xf32, #tpu.memory_space<vmem>>, %arg2: memref<1x128xf32, #tpu.memory_space<vmem>>, %arg3: memref<1x128xf32, #tpu.memory_space<vmem>>, %arg4: memref<32x128xbf16, #tpu.memory_space<vmem>>) attributes {dimension_semantics = [#tpu.dimension_semantics<parallel>], iteration_bounds = array<i64: 1>, scalar_prefetch = 0 : i64, scratch_operands = 0 : i64, tpu.core_type = #tpu.core_type<tc>, window_params = [{transform_indices = @transform_0, window_bounds = array<i64: 32, 128>}, {pipeline_mode = #tpu.pipeline_mode<synchronous>, transform_indices = @transform_1, window_bounds = array<i64: 1, 128>}, {pipeline_mode = #tpu.pipeline_mode<synchronous>, transform_indices = @transform_2, window_bounds = array<i64: 1, 128>}, {transform_indices = @transform_3, window_bounds = array<i64: 32, 128>}]} {
    %c0 = arith.constant 0 : index
    %c0_0 = arith.constant 0 : index
    %0 = vector.load %arg1[%c0, %c0_0] : memref<32x128xf32, #tpu.memory_space<vmem>>, vector<32x128xf32>
    %c0_1 = arith.constant 0 : index
    %c0_2 = arith.constant 0 : index
    %1 = vector.load %arg2[%c0_1, %c0_2] : memref<1x128xf32, #tpu.memory_space<vmem>>, vector<1x128xf32>
    %2 = vector.broadcast %1 : vector<1x128xf32> to vector<32x128xf32>
    %3 = arith.mulf %0, %2 : vector<32x128xf32>
    %c0_3 = arith.constant 0 : index
    %c0_4 = arith.constant 0 : index
    %4 = vector.load %arg3[%c0_3, %c0_4] : memref<1x128xf32, #tpu.memory_space<vmem>>, vector<1x128xf32>
    %5 = vector.broadcast %4 : vector<1x128xf32> to vector<32x128xf32>
    %6 = arith.addf %3, %5 : vector<32x128xf32>
    %cst = arith.constant 0.000000e+00 : f32
    %7 = vector.broadcast %cst : f32 to vector<32x128xf32>
    %8 = arith.cmpf oge, %6, %7 : vector<32x128xf32>
    %cst_5 = arith.constant 2.000000e-01 : f32
    %9 = vector.broadcast %cst_5 : f32 to vector<32x128xf32>
    %10 = arith.mulf %9, %6 : vector<32x128xf32>
    %11 = arith.select %8, %6, %10 : vector<32x128xi1>, vector<32x128xf32>
    %12 = arith.truncf %11 : vector<32x128xf32> to vector<32x128xbf16>
    %c0_6 = arith.constant 0 : index
    %c0_7 = arith.constant 0 : index
    %13 = vector.load %arg4[%c0_6, %c0_7] : memref<32x128xbf16, #tpu.memory_space<vmem>>, vector<32x128xbf16>
    tpu.vector_store %arg4[%c0_6, %c0_7], %12 {strides = array<i32>} : memref<32x128xbf16, #tpu.memory_space<vmem>>, vector<32x128xbf16>,
    return
  }
  func.func @transform_0(%arg0: i32) -> (i32, i32) {
    %c0_i32 = arith.constant 0 : i32
    %c0_i32_0 = arith.constant 0 : i32
    return %arg0, %c0_i32 : i32, i32
  }
  func.func @transform_1(%arg0: i32) -> (i32, i32) {
    %c0_i32 = arith.constant 0 : i32
    %c0_i32_0 = arith.constant 0 : i32
    %c0_i32_1 = arith.constant 0 : i32
    return %c0_i32, %c0_i32_0 : i32, i32
  }
  func.func @transform_2(%arg0: i32) -> (i32, i32) {
    %c0_i32 = arith.constant 0 : i32
    %c0_i32_0 = arith.constant 0 : i32
    %c0_i32_1 = arith.constant 0 : i32
    return %c0_i32, %c0_i32_0 : i32, i32
  }
  func.func @transform_3(%arg0: i32) -> (i32, i32) {
    %c0_i32 = arith.constant 0 : i32
    %c0_i32_0 = arith.constant 0 : i32
    return %arg0, %c0_i32 : i32, i32
  }
}

module attributes {stable_mosaic.version = 11 : i64} {
  func.func @_bn_leaky_kernel(%arg0: i32, %arg1: memref<8x256xf32, #tpu.memory_space<vmem>>, %arg2: memref<1x256xf32, #tpu.memory_space<vmem>>, %arg3: memref<1x256xf32, #tpu.memory_space<vmem>>, %arg4: memref<8x256xbf16, #tpu.memory_space<vmem>>) attributes {dimension_semantics = [#tpu.dimension_semantics<parallel>], iteration_bounds = array<i64: 1>, scalar_prefetch = 0 : i64, scratch_operands = 0 : i64, tpu.core_type = #tpu.core_type<tc>, window_params = [{transform_indices = @transform_0, window_bounds = array<i64: 8, 256>}, {pipeline_mode = #tpu.pipeline_mode<synchronous>, transform_indices = @transform_1, window_bounds = array<i64: 1, 256>}, {pipeline_mode = #tpu.pipeline_mode<synchronous>, transform_indices = @transform_2, window_bounds = array<i64: 1, 256>}, {transform_indices = @transform_3, window_bounds = array<i64: 8, 256>}]} {
    %c0 = arith.constant 0 : index
    %c0_0 = arith.constant 0 : index
    %0 = vector.load %arg1[%c0, %c0_0] : memref<8x256xf32, #tpu.memory_space<vmem>>, vector<8x256xf32>
    %c0_1 = arith.constant 0 : index
    %c0_2 = arith.constant 0 : index
    %1 = vector.load %arg2[%c0_1, %c0_2] : memref<1x256xf32, #tpu.memory_space<vmem>>, vector<1x256xf32>
    %2 = vector.broadcast %1 : vector<1x256xf32> to vector<8x256xf32>
    %3 = arith.mulf %0, %2 : vector<8x256xf32>
    %c0_3 = arith.constant 0 : index
    %c0_4 = arith.constant 0 : index
    %4 = vector.load %arg3[%c0_3, %c0_4] : memref<1x256xf32, #tpu.memory_space<vmem>>, vector<1x256xf32>
    %5 = vector.broadcast %4 : vector<1x256xf32> to vector<8x256xf32>
    %6 = arith.addf %3, %5 : vector<8x256xf32>
    %cst = arith.constant 0.000000e+00 : f32
    %7 = vector.broadcast %cst : f32 to vector<8x256xf32>
    %8 = arith.cmpf oge, %6, %7 : vector<8x256xf32>
    %cst_5 = arith.constant 2.000000e-01 : f32
    %9 = vector.broadcast %cst_5 : f32 to vector<8x256xf32>
    %10 = arith.mulf %9, %6 : vector<8x256xf32>
    %11 = arith.select %8, %6, %10 : vector<8x256xi1>, vector<8x256xf32>
    %12 = arith.truncf %11 : vector<8x256xf32> to vector<8x256xbf16>
    %c0_6 = arith.constant 0 : index
    %c0_7 = arith.constant 0 : index
    %13 = vector.load %arg4[%c0_6, %c0_7] : memref<8x256xbf16, #tpu.memory_space<vmem>>, vector<8x256xbf16>
    tpu.vector_store %arg4[%c0_6, %c0_7], %12 {strides = array<i32>} : memref<8x256xbf16, #tpu.memory_space<vmem>>, vector<8x256xbf16>,
    return
  }
  func.func @transform_0(%arg0: i32) -> (i32, i32) {
    %c0_i32 = arith.constant 0 : i32
    %c0_i32_0 = arith.constant 0 : i32
    return %arg0, %c0_i32 : i32, i32
  }
  func.func @transform_1(%arg0: i32) -> (i32, i32) {
    %c0_i32 = arith.constant 0 : i32
    %c0_i32_0 = arith.constant 0 : i32
    %c0_i32_1 = arith.constant 0 : i32
    return %c0_i32, %c0_i32_0 : i32, i32
  }
  func.func @transform_2(%arg0: i32) -> (i32, i32) {
    %c0_i32 = arith.constant 0 : i32
    %c0_i32_0 = arith.constant 0 : i32
    %c0_i32_1 = arith.constant 0 : i32
    return %c0_i32, %c0_i32_0 : i32, i32
  }
  func.func @transform_3(%arg0: i32) -> (i32, i32) {
    %c0_i32 = arith.constant 0 : i32
    %c0_i32_0 = arith.constant 0 : i32
    return %arg0, %c0_i32 : i32, i32
  }
}

module attributes {stable_mosaic.version = 11 : i64} {
  func.func @_conv_matmul_kernel(%arg0: i32, %arg1: memref<8x2048xbf16, #tpu.memory_space<vmem>>, %arg2: memref<2048x256xbf16, #tpu.memory_space<vmem>>, %arg3: memref<1x256xf32, #tpu.memory_space<vmem>>, %arg4: memref<8x256xf32, #tpu.memory_space<vmem>>, %arg5: memref<8x256xf32, #tpu.memory_space<vmem>>, %arg6: memref<8x256xf32, #tpu.memory_space<vmem>>) attributes {dimension_semantics = [#tpu.dimension_semantics<parallel>], iteration_bounds = array<i64: 1>, scalar_prefetch = 0 : i64, scratch_operands = 0 : i64, tpu.core_type = #tpu.core_type<tc>, window_params = [{transform_indices = @transform_0, window_bounds = array<i64: 8, 2048>}, {pipeline_mode = #tpu.pipeline_mode<synchronous>, transform_indices = @transform_1, window_bounds = array<i64: 2048, 256>}, {pipeline_mode = #tpu.pipeline_mode<synchronous>, transform_indices = @transform_2, window_bounds = array<i64: 1, 256>}, {transform_indices = @transform_3, window_bounds = array<i64: 8, 256>}, {transform_indices = @transform_4, window_bounds = array<i64: 8, 256>}, {transform_indices = @transform_5, window_bounds = array<i64: 8, 256>}]} {
    %c0 = arith.constant 0 : index
    %c0_0 = arith.constant 0 : index
    %0 = vector.load %arg1[%c0, %c0_0] : memref<8x2048xbf16, #tpu.memory_space<vmem>>, vector<8x2048xbf16>
    %c0_1 = arith.constant 0 : index
    %c0_2 = arith.constant 0 : index
    %1 = vector.load %arg2[%c0_1, %c0_2] : memref<2048x256xbf16, #tpu.memory_space<vmem>>, vector<2048x256xbf16>
    %cst = arith.constant dense<0.000000e+00> : vector<8x256xf32>
    %2 = tpu.matmul %0, %1, %cst {dimension_numbers = #tpu.dot_dimension_numbers<[1], [0], [0], [1], [0, 0, 1, 1], [], []>} : vector<8x2048xbf16>, vector<2048x256xbf16>, vector<8x256xf32> -> vector<8x256xf32>
    %c0_3 = arith.constant 0 : index
    %c0_4 = arith.constant 0 : index
    %3 = vector.load %arg3[%c0_3, %c0_4] : memref<1x256xf32, #tpu.memory_space<vmem>>, vector<1x256xf32>
    %4 = vector.broadcast %3 : vector<1x256xf32> to vector<8x256xf32>
    %5 = arith.addf %2, %4 : vector<8x256xf32>
    %cst_5 = arith.constant dense<0.000000e+00> : vector<256xf32>
    %6 = vector.multi_reduction <add>, %5, %cst_5 [0] : vector<8x256xf32> to vector<256xf32>
    %7 = vector.shape_cast %6 : vector<256xf32> to vector<1x256xf32>
    %8 = arith.mulf %5, %5 : vector<8x256xf32>
    %cst_6 = arith.constant dense<0.000000e+00> : vector<256xf32>
    %9 = vector.multi_reduction <add>, %8, %cst_6 [0] : vector<8x256xf32> to vector<256xf32>
    %10 = vector.shape_cast %9 : vector<256xf32> to vector<1x256xf32>
    %11 = vector.shape_cast %7 : vector<1x256xf32> to vector<1x256xf32>
    %12 = vector.broadcast %11 : vector<1x256xf32> to vector<8x256xf32>
    %c0_7 = arith.constant 0 : index
    %c0_8 = arith.constant 0 : index
    %13 = vector.load %arg5[%c0_7, %c0_8] : memref<8x256xf32, #tpu.memory_space<vmem>>, vector<8x256xf32>
    tpu.vector_store %arg5[%c0_7, %c0_8], %12 {strides = array<i32>} : memref<8x256xf32, #tpu.memory_space<vmem>>, vector<8x256xf32>,
    %14 = vector.shape_cast %10 : vector<1x256xf32> to vector<1x256xf32>
    %15 = vector.broadcast %14 : vector<1x256xf32> to vector<8x256xf32>
    %c0_9 = arith.constant 0 : index
    %c0_10 = arith.constant 0 : index
    %16 = vector.load %arg6[%c0_9, %c0_10] : memref<8x256xf32, #tpu.memory_space<vmem>>, vector<8x256xf32>
    tpu.vector_store %arg6[%c0_9, %c0_10], %15 {strides = array<i32>} : memref<8x256xf32, #tpu.memory_space<vmem>>, vector<8x256xf32>,
    %c0_11 = arith.constant 0 : index
    %c0_12 = arith.constant 0 : index
    %17 = vector.load %arg4[%c0_11, %c0_12] : memref<8x256xf32, #tpu.memory_space<vmem>>, vector<8x256xf32>
    tpu.vector_store %arg4[%c0_11, %c0_12], %5 {strides = array<i32>} : memref<8x256xf32, #tpu.memory_space<vmem>>, vector<8x256xf32>,
    return
  }
  func.func @transform_0(%arg0: i32) -> (i32, i32) {
    %c0_i32 = arith.constant 0 : i32
    %c0_i32_0 = arith.constant 0 : i32
    return %arg0, %c0_i32 : i32, i32
  }
  func.func @transform_1(%arg0: i32) -> (i32, i32) {
    %c0_i32 = arith.constant 0 : i32
    %c0_i32_0 = arith.constant 0 : i32
    %c0_i32_1 = arith.constant 0 : i32
    return %c0_i32, %c0_i32_0 : i32, i32
  }
  func.func @transform_2(%arg0: i32) -> (i32, i32) {
    %c0_i32 = arith.constant 0 : i32
    %c0_i32_0 = arith.constant 0 : i32
    %c0_i32_1 = arith.constant 0 : i32
    return %c0_i32, %c0_i32_0 : i32, i32
  }
  func.func @transform_3(%arg0: i32) -> (i32, i32) {
    %c0_i32 = arith.constant 0 : i32
    %c0_i32_0 = arith.constant 0 : i32
    return %arg0, %c0_i32 : i32, i32
  }
  func.func @transform_4(%arg0: i32) -> (i32, i32) {
    %c0_i32 = arith.constant 0 : i32
    %c0_i32_0 = arith.constant 0 : i32
    return %arg0, %c0_i32 : i32, i32
  }
  func.func @transform_5(%arg0: i32) -> (i32, i32) {
    %c0_i32 = arith.constant 0 : i32
    %c0_i32_0 = arith.constant 0 : i32
    return %arg0, %c0_i32 : i32, i32
  }
}

module attributes {stable_mosaic.version = 11 : i64} {
  func.func @_conv_matmul_kernel(%arg0: i32, %arg1: memref<2x4096xbf16, #tpu.memory_space<vmem>>, %arg2: memref<4096x1xbf16, #tpu.memory_space<vmem>>, %arg3: memref<1x1xf32, #tpu.memory_space<vmem>>, %arg4: memref<2x1xf32, #tpu.memory_space<vmem>>) attributes {dimension_semantics = [#tpu.dimension_semantics<parallel>], iteration_bounds = array<i64: 1>, scalar_prefetch = 0 : i64, scratch_operands = 0 : i64, tpu.core_type = #tpu.core_type<tc>, window_params = [{transform_indices = @transform_0, window_bounds = array<i64: 2, 4096>}, {pipeline_mode = #tpu.pipeline_mode<synchronous>, transform_indices = @transform_1, window_bounds = array<i64: 4096, 1>}, {pipeline_mode = #tpu.pipeline_mode<synchronous>, transform_indices = @transform_2, window_bounds = array<i64: 1, 1>}, {transform_indices = @transform_3, window_bounds = array<i64: 2, 1>}]} {
    %c0 = arith.constant 0 : index
    %c0_0 = arith.constant 0 : index
    %0 = vector.load %arg1[%c0, %c0_0] : memref<2x4096xbf16, #tpu.memory_space<vmem>>, vector<2x4096xbf16>
    %c0_1 = arith.constant 0 : index
    %c0_2 = arith.constant 0 : index
    %1 = vector.load %arg2[%c0_1, %c0_2] : memref<4096x1xbf16, #tpu.memory_space<vmem>>, vector<4096x1xbf16>
    %cst = arith.constant dense<0.000000e+00> : vector<2x1xf32>
    %2 = tpu.matmul %0, %1, %cst {dimension_numbers = #tpu.dot_dimension_numbers<[1], [0], [0], [1], [0, 0, 1, 1], [], []>} : vector<2x4096xbf16>, vector<4096x1xbf16>, vector<2x1xf32> -> vector<2x1xf32>
    %c0_3 = arith.constant 0 : index
    %c0_4 = arith.constant 0 : index
    %3 = vector.load %arg3[%c0_3, %c0_4] : memref<1x1xf32, #tpu.memory_space<vmem>>, vector<1x1xf32>
    %4 = vector.broadcast %3 : vector<1x1xf32> to vector<2x1xf32>
    %5 = arith.addf %2, %4 : vector<2x1xf32>
    %cst_5 = arith.constant 0.000000e+00 : f32
    %6 = vector.broadcast %cst_5 : f32 to vector<2x1xf32>
    %7 = arith.subf %6, %5 : vector<2x1xf32>
    %8 = math.exp %7 : vector<2x1xf32>
    %cst_6 = arith.constant 1.000000e+00 : f32
    %9 = vector.broadcast %cst_6 : f32 to vector<2x1xf32>
    %10 = arith.addf %9, %8 : vector<2x1xf32>
    %11 = tpu.reciprocal %10 {approx = true} : vector<2x1xf32> -> vector<2x1xf32>
    %cst_7 = arith.constant 0.000000e+00 : f32
    %cst_8 = arith.constant 1.000000e+00 : f32
    %12 = vector.broadcast %cst_7 : f32 to vector<2x1xf32>
    %13 = arith.maximumf %12, %11 : vector<2x1xf32>
    %14 = vector.broadcast %cst_8 : f32 to vector<2x1xf32>
    %15 = arith.minimumf %14, %13 : vector<2x1xf32>
    %c0_9 = arith.constant 0 : index
    %c0_10 = arith.constant 0 : index
    %16 = vector.load %arg4[%c0_9, %c0_10] : memref<2x1xf32, #tpu.memory_space<vmem>>, vector<2x1xf32>
    tpu.vector_store %arg4[%c0_9, %c0_10], %15 {strides = array<i32>} : memref<2x1xf32, #tpu.memory_space<vmem>>, vector<2x1xf32>,
    return
  }
  func.func @transform_0(%arg0: i32) -> (i32, i32) {
    %c0_i32 = arith.constant 0 : i32
    %c0_i32_0 = arith.constant 0 : i32
    return %arg0, %c0_i32 : i32, i32
  }
  func.func @transform_1(%arg0: i32) -> (i32, i32) {
    %c0_i32 = arith.constant 0 : i32
    %c0_i32_0 = arith.constant 0 : i32
    %c0_i32_1 = arith.constant 0 : i32
    return %c0_i32, %c0_i32_0 : i32, i32
  }
  func.func @transform_2(%arg0: i32) -> (i32, i32) {
    %c0_i32 = arith.constant 0 : i32
    %c0_i32_0 = arith.constant 0 : i32
    %c0_i32_1 = arith.constant 0 : i32
    return %c0_i32, %c0_i32_0 : i32, i32
  }
  func.func @transform_3(%arg0: i32) -> (i32, i32) {
    %c0_i32 = arith.constant 0 : i32
    %c0_i32_0 = arith.constant 0 : i32
    return %arg0, %c0_i32 : i32, i32
  }
}

</mosaic_0001>

<bundles_post_ra>
// kernel: discriminator_forward.6
= control target key start
LH: loop header
LB: loop body
LE: loop exit
PB: predicated region body
PF: predicated region fallthrough
CT: control target
= control target key end

     0   :  { %8 = vsyncpa [#allocation3], 0  ;;  %s531_s0 = inlined_call_operand.vmem [shape: bf16[128,16], index: 0, kind: input, shape index: {}]   ;;  %s532_s1 = inlined_call_operand.hbm [shape: bf16[16,64], index: 1, kind: input, shape index: {}]   ;;  %s533_s2 = inlined_call_operand.hbm [shape: f32[1,64], index: 2, kind: input, shape index: {}]   ;;  %s534_s3 = inlined_call_operand.vmem [shape: bf16[128,64], index: 3, kind: output, shape index: {}]  }
   0x1   :  { %s16_s14 = sshll.u32 %s532_s1, 4  ;;  %s17_s14 = int_to_ptr.hbm [resolvable:$true] %s16_s14 }
   0x2   :  { %9 = vsyncpa [#allocation5], 0  ;;  %s387_s15 = smov [#allocation2]   ;;  %s30_s19 = sshll.u32 %s533_s2, 4  ;;  %s31_s19 = int_to_ptr.hbm [resolvable:$true] %s30_s19 }
   0x3   :  { %s18_s16 = sshll.u32 %s387_s15, 4  ;;  %s388_s20 = smov 64   ;;  %s19_s16 = int_to_ptr.vmem [resolvable:$true] %s18_s16 }
   0x4   :  { %s389_s21 = smov 4   ;;  %s390_s22 = smov [#allocation4]  }
   0x5   :  { %24 = dma.hbm_to_vmem [thread:$0]  %s17_s14, 128, %s19_s16, [#allocation3], %s388_s20, %s388_s20, %s389_s21  }
   0x6   :  { %s32_s23 = sshll.u32 %s390_s22, 4  ;;  %s33_s23 = int_to_ptr.vmem [resolvable:$true] %s32_s23 }
   0x7   :  { %35 = dma.hbm_to_vmem [thread:$0]  %s31_s19, 16, %s33_s23, [#allocation5]  }
   0x8   :  { %383 = dma.done.wait [#allocation3], 128  }
   0x9   :  { %384 = vsyncadd [#allocation3], 4294967168 }
   0xa   :  { %385 = dma.done.wait [#allocation5], 16  }
   0xb   :  { %386 = vsyncadd [#allocation5], 4294967280  ;;  %v326_v0 = vld [vmem:[#allocation2] sm:$0xff]  ;;  %v320_v2 = vld [vmem:[%s531_s0 + $0x10] sm:$0xff]  ;;  %vm113_vm0 = vcmask 130048   ;;  %vm251_vm3 = vcmask 519168  }
   0xc   :  { %v318_v1 = vld [vmem:[%s531_s0] sm:$0xff]  ;;  %145 = vmatpush.bf16.msra.mxu0 %v326_v0  ;;  %327 = vmatpush.bf16.msra.mxu1 %v326_v0  ;;  %v324_v4 = vld [vmem:[%s531_s0 + $0x30] sm:$0xff]  ;;  %v319_v5 = vld [vmem:[%s531_s0 + $0x8] sm:$0xff] }
   0xd   :  { %v322_v3 = vld [vmem:[%s531_s0 + $0x20] sm:$0xff]  ;;  %328 = vmatpush.bf16.msra.mxu2 %v326_v0  ;;  %329 = vmatpush.bf16.msra.mxu3 %v326_v0  ;;  %v321_v6 = vld [vmem:[%s531_s0 + $0x18] sm:$0xff]  ;;  %v323_v7 = vld [vmem:[%s531_s0 + $0x28] sm:$0xff] }
   0xe   :  { %v325_v8 = vld [vmem:[%s531_s0 + $0x38] sm:$0xff]  ;;  %v449_v9 = vld [vmem:[#allocation4] ss:$0 sm:$0xff] }
   0xf   :  { %310 = vmatmul.msk.bf16.vlgmr.msra.gmra.mxu0 %vm113_vm0, %v318_v1  ;;  %312 = vmatmul.msk.bf16.vlgmr.msra.gmra.mxu1 %vm113_vm0, %v320_v2 }
  0x10   :  { %314 = vmatmul.msk.bf16.vlgmr.msra.gmra.mxu2 %vm113_vm0, %v322_v3  ;;  %316 = vmatmul.msk.bf16.vlgmr.msra.gmra.mxu3 %vm113_vm0, %v324_v4 }
  0x1f   :  { %311 = vmatmul.msk.bf16.gmra.mxu0 %vm113_vm0, %v319_v5  ;;  %313 = vmatmul.msk.bf16.gmra.mxu1 %vm113_vm0, %v321_v6 }
  0x20   :  { %315 = vmatmul.msk.bf16.gmra.mxu2 %vm113_vm0, %v323_v7  ;;  %317 = vmatmul.msk.bf16.gmra.mxu3 %vm113_vm0, %v325_v8 }
  0x8c   :  { %v147_v10 = vpop.f32.mrf.mxu0  ;;  %v157_v11 = vpop.f32.mrf.mxu1 }
  0x8d   :  { %v148_v12 = vadd.f32 %v449_v9, %v147_v10  ;;  %v158_v13 = vadd.f32 %v449_v9, %v157_v11 }
  0x8f   :  { %vm187_vm1 = vcmp.ge.f32.partialorder %v148_v12, 0.0  ;;  %v203_v14 = vmul.f32 0.2, %v148_v12  ;;  %vm191_vm2 = vcmp.ge.f32.partialorder %v158_v13, 0.0  ;;  %v207_v15 = vmul.f32 0.2, %v158_v13 }
  0x91   :  { %v219_v16 = vsel %vm187_vm1, %v148_v12, %v203_v14  ;;  %v223_v17 = vsel %vm191_vm2, %v158_v13, %v207_v15 }
  0x92   :  { %v235_v18 = vpack.c.bf16 %v219_v16, %v219_v16  ;;  %v239_v19 = vpack.c.bf16 %v223_v17, %v223_v17 }
  0x93   :  { %v167_v20 = vpop.f32.mrf.mxu2  ;;  %v177_v21 = vpop.f32.mrf.mxu3 }
  0x94   :  { %252 = vst.msk [vmem:[%s534_s3] sm:$0xf] %vm251_vm3, %v235_v18  ;;  %v168_v22 = vadd.f32 %v449_v9, %v167_v20  ;;  %v178_v23 = vadd.f32 %v449_v9, %v177_v21  ;;  %v149_v24 = vpop.f32.mrf.mxu0  ;;  %v159_v25 = vpop.f32.mrf.mxu1 }
  0x95   :  { %256 = vst.msk [vmem:[%s534_s3 + $0x10] sm:$0xf] %vm251_vm3, %v239_v19  ;;  %v150_v26 = vadd.f32 %v449_v9, %v149_v24  ;;  %v160_v27 = vadd.f32 %v449_v9, %v159_v25 }
  0x96   :  { %vm195_vm4 = vcmp.ge.f32.partialorder %v168_v22, 0.0  ;;  %v211_v28 = vmul.f32 0.2, %v168_v22  ;;  %vm199_vm5 = vcmp.ge.f32.partialorder %v178_v23, 0.0  ;;  %v215_v29 = vmul.f32 0.2, %v178_v23 }
  0x97   :  { %vm188_vm6 = vcmp.ge.f32.partialorder %v150_v26, 0.0  ;;  %v204_v30 = vmul.f32 0.2, %v150_v26  ;;  %vm192_vm7 = vcmp.ge.f32.partialorder %v160_v27, 0.0  ;;  %v208_v31 = vmul.f32 0.2, %v160_v27 }
  0x98   :  { %v227_v32 = vsel %vm195_vm4, %v168_v22, %v211_v28  ;;  %v231_v33 = vsel %vm199_vm5, %v178_v23, %v215_v29 }
  0x99   :  { %v243_v34 = vpack.c.bf16 %v227_v32, %v227_v32  ;;  %v247_v35 = vpack.c.bf16 %v231_v33, %v231_v33  ;;  %v220_v36 = vsel %vm188_vm6, %v150_v26, %v204_v30  ;;  %v224_v37 = vsel %vm192_vm7, %v160_v27, %v208_v31 }
  0x9a   :  { %v236_v38 = vpack.c.bf16 %v220_v36, %v220_v36  ;;  %v240_v39 = vpack.c.bf16 %v224_v37, %v224_v37 }
  0x9b   :  { %260 = vst.msk [vmem:[%s534_s3 + $0x20] sm:$0xf] %vm251_vm3, %v243_v34  ;;  %v169_v40 = vpop.f32.mrf.mxu2  ;;  %v179_v41 = vpop.f32.mrf.mxu3 }
  0x9c   :  { %264 = vst.msk [vmem:[%s534_s3 + $0x30] sm:$0xf] %vm251_vm3, %v247_v35  ;;  %v170_v42 = vadd.f32 %v449_v9, %v169_v40  ;;  %v180_v43 = vadd.f32 %v449_v9, %v179_v41  ;;  %v152_v44 = vpop.f32.mrf.mxu0  ;;  %v162_v45 = vpop.f32.mrf.mxu1 }
  0x9d   :  { %253 = vst.msk [vmem:[%s534_s3 + $0x4] sm:$0xf] %vm251_vm3, %v236_v38  ;;  %v153_v46 = vadd.f32 %v449_v9, %v152_v44  ;;  %v163_v47 = vadd.f32 %v449_v9, %v162_v45 }
  0x9e   :  { %257 = vst.msk [vmem:[%s534_s3 + $0x14] sm:$0xf] %vm251_vm3, %v240_v39  ;;  %vm196_vm8 = vcmp.ge.f32.partialorder %v170_v42, 0.0  ;;  %v212_v48 = vmul.f32 0.2, %v170_v42  ;;  %vm200_vm9 = vcmp.ge.f32.partialorder %v180_v43, 0.0 }
  0x9f   :  { %v216_v49 = vmul.f32 0.2, %v180_v43  ;;  %vm189_vm10 = vcmp.ge.f32.partialorder %v153_v46, 0.0  ;;  %v205_v50 = vmul.f32 0.2, %v153_v46  ;;  %vm193_vm11 = vcmp.ge.f32.partialorder %v163_v47, 0.0 }
  0xa0   :  { %v228_v51 = vsel %vm196_vm8, %v170_v42, %v212_v48  ;;  %v209_v52 = vmul.f32 0.2, %v163_v47 }
  0xa1   :  { %v244_v53 = vpack.c.bf16 %v228_v51, %v228_v51  ;;  %v232_v54 = vsel %vm200_vm9, %v180_v43, %v216_v49  ;;  %v221_v55 = vsel %vm189_vm10, %v153_v46, %v205_v50 }
  0xa2   :  { %v248_v56 = vpack.c.bf16 %v232_v54, %v232_v54  ;;  %v237_v57 = vpack.c.bf16 %v221_v55, %v221_v55  ;;  %v225_v58 = vsel %vm193_vm11, %v163_v47, %v209_v52 }
  0xa3   :  { %261 = vst.msk [vmem:[%s534_s3 + $0x24] sm:$0xf] %vm251_vm3, %v244_v53  ;;  %v241_v59 = vpack.c.bf16 %v225_v58, %v225_v58  ;;  %v172_v60 = vpop.f32.mrf.mxu2  ;;  %v182_v61 = vpop.f32.mrf.mxu3 }
  0xa4   :  { %265 = vst.msk [vmem:[%s534_s3 + $0x34] sm:$0xf] %vm251_vm3, %v248_v56  ;;  %v173_v62 = vadd.f32 %v449_v9, %v172_v60  ;;  %v183_v63 = vadd.f32 %v449_v9, %v182_v61  ;;  %v154_v0 = vpop.f32.mrf.mxu0  ;;  %v164_v1 = vpop.f32.mrf.mxu1 }
  0xa5   :  { %254 = vst.msk [vmem:[%s534_s3 + $0x8] sm:$0xf] %vm251_vm3, %v237_v57  ;;  %v155_v2 = vadd.f32 %v449_v9, %v154_v0  ;;  %v165_v3 = vadd.f32 %v449_v9, %v164_v1 }
  0xa6   :  { %258 = vst.msk [vmem:[%s534_s3 + $0x18] sm:$0xf] %vm251_vm3, %v241_v59  ;;  %vm197_vm12 = vcmp.ge.f32.partialorder %v173_v62, 0.0  ;;  %v213_v4 = vmul.f32 0.2, %v173_v62  ;;  %vm201_vm13 = vcmp.ge.f32.partialorder %v183_v63, 0.0 }
  0xa7   :  { %v217_v5 = vmul.f32 0.2, %v183_v63  ;;  %vm190_vm14 = vcmp.ge.f32.partialorder %v155_v2, 0.0  ;;  %v206_v6 = vmul.f32 0.2, %v155_v2  ;;  %vm194_vm15 = vcmp.ge.f32.partialorder %v165_v3, 0.0 }
  0xa8   :  { %v229_v7 = vsel %vm197_vm12, %v173_v62, %v213_v4  ;;  %v210_v8 = vmul.f32 0.2, %v165_v3 }
  0xa9   :  { %v245_v10 = vpack.c.bf16 %v229_v7, %v229_v7  ;;  %v233_v11 = vsel %vm201_vm13, %v183_v63, %v217_v5  ;;  %v222_v12 = vsel %vm190_vm14, %v155_v2, %v206_v6 }
  0xaa   :  { %v249_v13 = vpack.c.bf16 %v233_v11, %v233_v11  ;;  %v238_v14 = vpack.c.bf16 %v222_v12, %v222_v12  ;;  %v226_v15 = vsel %vm194_vm15, %v165_v3, %v210_v8 }
  0xab   :  { %262 = vst.msk [vmem:[%s534_s3 + $0x28] sm:$0xf] %vm251_vm3, %v245_v10  ;;  %v242_v16 = vpack.c.bf16 %v226_v15, %v226_v15  ;;  %v174_v17 = vpop.f32.mrf.mxu2  ;;  %v184_v18 = vpop.f32.mrf.mxu3 }
  0xac   :  { %266 = vst.msk [vmem:[%s534_s3 + $0x38] sm:$0xf] %vm251_vm3, %v249_v13  ;;  %v175_v19 = vadd.f32 %v449_v9, %v174_v17  ;;  %v185_v20 = vadd.f32 %v449_v9, %v184_v18 }
  0xad   :  { %255 = vst.msk [vmem:[%s534_s3 + $0xc] sm:$0xf] %vm251_vm3, %v238_v14 }
  0xae   :  { %259 = vst.msk [vmem:[%s534_s3 + $0x1c] sm:$0xf] %vm251_vm3, %v242_v16  ;;  %vm198_vm0 = vcmp.ge.f32.partialorder %v175_v19, 0.0  ;;  %v214_v21 = vmul.f32 0.2, %v175_v19  ;;  %vm202_vm1 = vcmp.ge.f32.partialorder %v185_v20, 0.0 }
  0xaf   :  { %v218_v22 = vmul.f32 0.2, %v185_v20 }
  0xb0   :  { %v230_v23 = vsel %vm198_vm0, %v175_v19, %v214_v21 }
  0xb1   :  { %v246_v24 = vpack.c.bf16 %v230_v23, %v230_v23  ;;  %v234_v25 = vsel %vm202_vm1, %v185_v20, %v218_v22 }
  0xb2   :  { %v250_v26 = vpack.c.bf16 %v234_v25, %v234_v25 }
  0xb3   :  { %263 = vst.msk [vmem:[%s534_s3 + $0x2c] sm:$0xf] %vm251_vm3, %v246_v24 }
  0xb4   :  { %267 = vst.msk [vmem:[%s534_s3 + $0x3c] sm:$0xf] %vm251_vm3, %v250_v26 }
  0xb5   :  { %272 = vsyncpa [#allocation3], 1 }
  0xb6   :  { %273 = vsyncpa [#allocation5], 1 }

// kernel: discriminator_forward.8
= control target key start
LH: loop header
LB: loop body
LE: loop exit
PB: predicated region body
PF: predicated region fallthrough
CT: control target
= control target key end

     0   :  { %s115_s0 = inlined_call_operand.vmem [shape: f32[32,128], index: 0, kind: input, shape index: {}]   ;;  %s116_s1 = inlined_call_operand.vmem [shape: f32[1,128], index: 1, kind: input, shape index: {}]   ;;  %s117_s2 = inlined_call_operand.vmem [shape: f32[1,128], index: 2, kind: input, shape index: {}]   ;;  %s118_s3 = inlined_call_operand.vmem [shape: bf16[32,128], index: 3, kind: output, shape index: {}]  }
   0x1   :  { %v14_v0 = vld [vmem:[%s115_s0] sm:$0xff]  ;;  %v15_v1 = vld [vmem:[%s115_s0 + $0x8] sm:$0xff]  ;;  %v16_v4 = vld [vmem:[%s115_s0 + $0x10] sm:$0xff] }
   0x2   :  { %v69_v2 = vld [vmem:[%s116_s1] ss:$0 sm:$0xff]  ;;  %v17_v5 = vld [vmem:[%s115_s0 + $0x18] sm:$0xff] }
   0x3   :  { %v70_v3 = vld [vmem:[%s117_s2] ss:$0 sm:$0xff]  ;;  %v22_v6 = vmul.f32 %v69_v2, %v14_v0  ;;  %v23_v7 = vmul.f32 %v69_v2, %v15_v1  ;;  %v24_v8 = vmul.f32 %v69_v2, %v16_v4  ;;  %v25_v9 = vmul.f32 %v69_v2, %v17_v5 }
   0x5   :  { %v30_v10 = vadd.f32 %v70_v3, %v22_v6  ;;  %v31_v11 = vadd.f32 %v70_v3, %v23_v7  ;;  %v32_v12 = vadd.f32 %v70_v3, %v24_v8  ;;  %v33_v13 = vadd.f32 %v70_v3, %v25_v9 }
   0x7   :  { %vm34_vm0 = vcmp.ge.f32.partialorder %v30_v10, 0.0  ;;  %vm35_vm1 = vcmp.ge.f32.partialorder %v31_v11, 0.0  ;;  %v38_v14 = vmul.f32 0.2, %v30_v10  ;;  %v39_v15 = vmul.f32 0.2, %v31_v11 }
   0x8   :  { %vm36_vm2 = vcmp.ge.f32.partialorder %v32_v12, 0.0  ;;  %vm37_vm3 = vcmp.ge.f32.partialorder %v33_v13, 0.0  ;;  %v40_v16 = vmul.f32 0.2, %v32_v12  ;;  %v41_v17 = vmul.f32 0.2, %v33_v13 }
   0x9   :  { %v42_v18 = vsel %vm34_vm0, %v30_v10, %v38_v14  ;;  %v43_v19 = vsel %vm35_vm1, %v31_v11, %v39_v15 }
   0xa   :  { %v61_v20 = vpack.c.bf16 %v43_v19, %v42_v18  ;;  %v44_v21 = vsel %vm36_vm2, %v32_v12, %v40_v16  ;;  %v45_v22 = vsel %vm37_vm3, %v33_v13, %v41_v17 }
   0xb   :  { %v66_v23 = vpack.c.bf16 %v45_v22, %v44_v21 }
   0xc   :  { %62 = vst [vmem:[%s118_s3] sm:$0xff] %v61_v20  }
   0xd   :  { %68 = vst [vmem:[%s118_s3 + $0x8] sm:$0xff] %v66_v23  }

// kernel: discriminator_forward.7
= control target key start
LH: loop header
LB: loop body
LE: loop exit
PB: predicated region body
PF: predicated region fallthrough
CT: control target
= control target key end

     0   :  { %11 = vsyncpa [#allocation3], 0  ;;  %s1268_s21 = smov [#allocation2]   ;;  %s1269_s23 = smov 64   ;;  %s1421_s0 = inlined_call_operand.vmem [shape: bf16[32,1024], index: 0, kind: input, shape index: {}]   ;;  %s1422_s1 = inlined_call_operand.hbm [shape: bf16[1024,128], index: 1, kind: input, shape index: {}]   ;;  %s1423_s2 = inlined_call_operand.vmem [shape: f32[1,128], index: 2, kind: input, shape index: {}]   ;;  %s1424_s3 = inlined_call_operand.vmem [shape: f32[32,128], index: 3, kind: output, shape index: {0}]   ;;  %s1425_s4 = inlined_call_operand.vmem [shape: f32[8,128], index: 4, kind: output, shape index: {1}]   ;;  %s1426_s5 = inlined_call_operand.vmem [shape: f32[8,128], index: 5, kind: output, shape index: {2}]  }
   0x1   :  { %s18_s20 = sshll.u32 %s1422_s1, 4  ;;  %s20_s22 = sshll.u32 %s1268_s21, 4  ;;  %s19_s20 = int_to_ptr.hbm [resolvable:$true] %s18_s20  ;;  %s21_s22 = int_to_ptr.vmem [resolvable:$true] %s20_s22 }
   0x2   :  { %s1270_s24 = smov 4  }
   0x3   :  { %26 = dma.hbm_to_vmem [thread:$0]  %s19_s20, 8192, %s21_s22, [#allocation3], %s1269_s23, %s1269_s23, %s1270_s24  }
   0x4   :  { %1266 = dma.done.wait [#allocation3], 8192  }
   0x5   :  { %1267 = vsyncadd [#allocation3], 4294959104  ;;  %v1181_v0 = vld [vmem:[#allocation2 + $0x38] sm:$0xff]  ;;  %v1180_v4 = vld [vmem:[#allocation2 + $0x30] sm:$0xff] }
   0x6   :  { %v1189_v1 = vld [vmem:[#allocation2 + $0x78] sm:$0xff]  ;;  %645 = vmatpush.bf16.msra.mxu0 %v1181_v0  ;;  %v1188_v5 = vld [vmem:[#allocation2 + $0x70] sm:$0xff]  ;;  %v1179_v8 = vld [vmem:[#allocation2 + $0x28] sm:$0xff] }
   0x7   :  { %v1197_v2 = vld [vmem:[#allocation2 + $0xb8] sm:$0xff]  ;;  %664 = vmatpush.bf16.msra.mxu1 %v1189_v1  ;;  %v1196_v6 = vld [vmem:[#allocation2 + $0xb0] sm:$0xff]  ;;  %v1187_v9 = vld [vmem:[#allocation2 + $0x68] sm:$0xff] }
   0x8   :  { %v1205_v3 = vld [vmem:[#allocation2 + $0xf8] sm:$0xff]  ;;  %683 = vmatpush.bf16.msra.mxu2 %v1197_v2  ;;  %v1204_v7 = vld [vmem:[#allocation2 + $0xf0] sm:$0xff]  ;;  %v1195_v10 = vld [vmem:[#allocation2 + $0xa8] sm:$0xff] }
   0x9   :  { %702 = vmatpush.bf16.msra.mxu3 %v1205_v3  ;;  %v1203_v11 = vld [vmem:[#allocation2 + $0xe8] sm:$0xff]  ;;  %v1178_v12 = vld [vmem:[#allocation2 + $0x20] sm:$0xff]  ;;  %v1177_v16 = vld [vmem:[#allocation2 + $0x18] sm:$0xff] }
   0xa   :  { %646 = vmatpush.bf16.msra.mxu0 %v1180_v4  ;;  %v1186_v13 = vld [vmem:[#allocation2 + $0x60] sm:$0xff]  ;;  %v1185_v17 = vld [vmem:[#allocation2 + $0x58] sm:$0xff]  ;;  %v1176_v20 = vld [vmem:[#allocation2 + $0x10] sm:$0xff] }
   0xb   :  { %665 = vmatpush.bf16.msra.mxu1 %v1188_v5  ;;  %v1194_v14 = vld [vmem:[#allocation2 + $0xa0] sm:$0xff]  ;;  %v1193_v18 = vld [vmem:[#allocation2 + $0x98] sm:$0xff]  ;;  %v1184_v21 = vld [vmem:[#allocation2 + $0x50] sm:$0xff] }
   0xc   :  { %684 = vmatpush.bf16.msra.mxu2 %v1196_v6  ;;  %v1202_v15 = vld [vmem:[#allocation2 + $0xe0] sm:$0xff]  ;;  %v1201_v19 = vld [vmem:[#allocation2 + $0xd8] sm:$0xff]  ;;  %v1192_v22 = vld [vmem:[#allocation2 + $0x90] sm:$0xff] }
   0xd   :  { %703 = vmatpush.bf16.msra.mxu3 %v1204_v7  ;;  %v1200_v23 = vld [vmem:[#allocation2 + $0xd0] sm:$0xff]  ;;  %v1175_v24 = vld [vmem:[#allocation2 + $0x8] sm:$0xff]  ;;  %v1174_v28 = vld [vmem:[#allocation2] sm:$0xff] }
   0xe   :  { %647 = vmatpush.bf16.msra.mxu0 %v1179_v8  ;;  %v1183_v25 = vld [vmem:[#allocation2 + $0x48] sm:$0xff]  ;;  %v1182_v29 = vld [vmem:[#allocation2 + $0x40] sm:$0xff]  ;;  %v1229_v40 = vld [vmem:[#allocation2 + $0x1b8] sm:$0xff] }
   0xf   :  { %666 = vmatpush.bf16.msra.mxu1 %v1187_v9  ;;  %v1191_v26 = vld [vmem:[#allocation2 + $0x88] sm:$0xff]  ;;  %v1190_v30 = vld [vmem:[#allocation2 + $0x80] sm:$0xff]  ;;  %v1213_v41 = vld [vmem:[#allocation2 + $0x138] sm:$0xff] }
  0x10   :  { %685 = vmatpush.bf16.msra.mxu2 %v1195_v10  ;;  %v1199_v27 = vld [vmem:[#allocation2 + $0xc8] sm:$0xff]  ;;  %v1198_v31 = vld [vmem:[#allocation2 + $0xc0] sm:$0xff]  ;;  %v1221_v46 = vld [vmem:[#allocation2 + $0x178] sm:$0xff] }
  0x11   :  { %704 = vmatpush.bf16.msra.mxu3 %v1203_v11  ;;  %v840_v32 = vld [vmem:[%s1421_s0] sm:$0xf]  ;;  %v1158_v34 = vld [vmem:[%s1421_s0 + $0x4] sm:$0xf]  ;;  %v848_v36 = vld [vmem:[%s1421_s0 + $0x8] sm:$0xf] }
  0x12   :  { %648 = vmatpush.bf16.msra.mxu0 %v1178_v12  ;;  %v1162_v33 = vld [vmem:[%s1421_s0 + $0x1c] sm:$0xf0]  ;;  %v842_v35 = vld [vmem:[%s1421_s0 + $0x20] sm:$0xf0]  ;;  %v1163_v37 = vld [vmem:[%s1421_s0 + $0x24] sm:$0xf0] }
  0x13   :  { %667 = vmatpush.bf16.msra.mxu1 %v1186_v13  ;;  %v1159_v38 = vld [vmem:[%s1421_s0 + $0xc] sm:$0xf]  ;;  %v841_v42 = vor.u32 %v1162_v33, %v840_v32  ;;  %v845_v43 = vor.u32 %v1158_v34, %v842_v35  ;;  %v849_v44 = vor.u32 %v1163_v37, %v848_v36  ;;  %v1237_v47 = vld [vmem:[#allocation2 + $0x1f8] sm:$0xff]  ;;  %v1228_v48 = vld [vmem:[#allocation2 + $0x1b0] sm:$0xff] }
  0x14   :  { %686 = vmatpush.bf16.msra.mxu2 %v1194_v14  ;;  %v850_v39 = vld [vmem:[%s1421_s0 + $0x28] sm:$0xf0]  ;;  %v1212_v49 = vld [vmem:[#allocation2 + $0x130] sm:$0xff]  ;;  %v1226_v56 = vld [vmem:[#allocation2 + $0x1a0] sm:$0xff] }
  0x15   :  { %705 = vmatpush.bf16.msra.mxu3 %v1202_v15  ;;  %v853_v45 = vor.u32 %v1159_v38, %v850_v39  ;;  %v1220_v50 = vld [vmem:[#allocation2 + $0x170] sm:$0xff]  ;;  %v1227_v52 = vld [vmem:[#allocation2 + $0x1a8] sm:$0xff]  ;;  %v1210_v57 = vld [vmem:[#allocation2 + $0x120] sm:$0xff] }
  0x16   :  { %649 = vmatpush.bf16.msra.mxu0 %v1177_v16  ;;  %v1236_v51 = vld [vmem:[#allocation2 + $0x1f0] sm:$0xff]  ;;  %v1211_v53 = vld [vmem:[#allocation2 + $0x128] sm:$0xff]  ;;  %v1218_v58 = vld [vmem:[#allocation2 + $0x160] sm:$0xff] }
  0x17   :  { %668 = vmatpush.bf16.msra.mxu1 %v1185_v17  ;;  %v1219_v54 = vld [vmem:[#allocation2 + $0x168] sm:$0xff]  ;;  %v1234_v59 = vld [vmem:[#allocation2 + $0x1e0] sm:$0xff]  ;;  %v1225_v4 = vld [vmem:[#allocation2 + $0x198] sm:$0xff] }
  0x18   :  { %687 = vmatpush.bf16.msra.mxu2 %v1193_v18  ;;  %v1235_v55 = vld [vmem:[#allocation2 + $0x1e8] sm:$0xff]  ;;  %v872_v60 = vld [vmem:[%s1421_s0 + $0x40] sm:$0xf]  ;;  %v1166_v62 = vld [vmem:[%s1421_s0 + $0x44] sm:$0xf] }
  0x19   :  { %706 = vmatpush.bf16.msra.mxu3 %v1201_v19  ;;  %v1170_v61 = vld [vmem:[%s1421_s0 + $0x5c] sm:$0xf0]  ;;  %v874_v63 = vld [vmem:[%s1421_s0 + $0x60] sm:$0xf0]  ;;  %v880_v0 = vld [vmem:[%s1421_s0 + $0x48] sm:$0xf] }
  0x1a   :  { %650 = vmatpush.bf16.msra.mxu0 %v1176_v20  ;;  %v1171_v1 = vld [vmem:[%s1421_s0 + $0x64] sm:$0xf0]  ;;  %v1167_v2 = vld [vmem:[%s1421_s0 + $0x4c] sm:$0xf]  ;;  %v1209_v5 = vld [vmem:[#allocation2 + $0x118] sm:$0xff]  ;;  %v873_v6 = vor.u32 %v1170_v61, %v872_v60  ;;  %v877_v7 = vor.u32 %v1166_v62, %v874_v63 }
  0x1b   :  { %669 = vmatpush.bf16.msra.mxu1 %v1184_v21  ;;  %v882_v3 = vld [vmem:[%s1421_s0 + $0x68] sm:$0xf0]  ;;  %v881_v8 = vor.u32 %v1171_v1, %v880_v0  ;;  %v1217_v10 = vld [vmem:[#allocation2 + $0x158] sm:$0xff]  ;;  %v1224_v12 = vld [vmem:[#allocation2 + $0x190] sm:$0xff] }
  0x1c   :  { %688 = vmatpush.bf16.msra.mxu2 %v1192_v22  ;;  %v885_v9 = vor.u32 %v1167_v2, %v882_v3  ;;  %v1233_v11 = vld [vmem:[#allocation2 + $0x1d8] sm:$0xff]  ;;  %v1208_v13 = vld [vmem:[#allocation2 + $0x110] sm:$0xff]  ;;  %v1223_v16 = vld [vmem:[#allocation2 + $0x188] sm:$0xff] }
  0x1d   :  { %707 = vmatpush.bf16.msra.mxu3 %v1200_v23  ;;  %v1216_v14 = vld [vmem:[#allocation2 + $0x150] sm:$0xff]  ;;  %v1207_v17 = vld [vmem:[#allocation2 + $0x108] sm:$0xff]  ;;  %v1222_v20 = vld [vmem:[#allocation2 + $0x180] sm:$0xff] }
  0x1e   :  { %651 = vmatpush.bf16.msra.mxu0 %v1175_v24  ;;  %v1232_v15 = vld [vmem:[#allocation2 + $0x1d0] sm:$0xff]  ;;  %v1215_v18 = vld [vmem:[#allocation2 + $0x148] sm:$0xff]  ;;  %v1206_v21 = vld [vmem:[#allocation2 + $0x100] sm:$0xff] }
  0x1f   :  { %670 = vmatpush.bf16.msra.mxu1 %v1183_v25  ;;  %v1231_v19 = vld [vmem:[#allocation2 + $0x1c8] sm:$0xff]  ;;  %v1214_v22 = vld [vmem:[#allocation2 + $0x140] sm:$0xff]  ;;  %v856_v24 = vld [vmem:[%s1421_s0 + $0x10] sm:$0xf] }
  0x20   :  { %689 = vmatpush.bf16.msra.mxu2 %v1191_v26  ;;  %v1230_v23 = vld [vmem:[#allocation2 + $0x1c0] sm:$0xff]  ;;  %v1164_v25 = vld [vmem:[%s1421_s0 + $0x2c] sm:$0xf0]  ;;  %v1160_v26 = vld [vmem:[%s1421_s0 + $0x14] sm:$0xf] }
  0x21   :  { %708 = vmatpush.bf16.msra.mxu3 %v1199_v27  ;;  %v858_v27 = vld [vmem:[%s1421_s0 + $0x30] sm:$0xf0]  ;;  %v857_v32 = vor.u32 %v1164_v25, %v856_v24  ;;  %v888_v36 = vld [vmem:[%s1421_s0 + $0x50] sm:$0xf] }
  0x22   :  { %652 = vmatpush.bf16.msra.mxu0 %v1174_v28  ;;  %v864_v28 = vld [vmem:[%s1421_s0 + $0x18] sm:$0xf]  ;;  %v861_v33 = vor.u32 %v1160_v26, %v858_v27  ;;  %v1172_v37 = vld [vmem:[%s1421_s0 + $0x6c] sm:$0xf0]  ;;  %v1168_v38 = vld [vmem:[%s1421_s0 + $0x54] sm:$0xf] }
  0x23   :  { %671 = vmatpush.bf16.msra.mxu1 %v1182_v29  ;;  %v1165_v29 = vld [vmem:[%s1421_s0 + $0x34] sm:$0xf0]  ;;  %v890_v39 = vld [vmem:[%s1421_s0 + $0x70] sm:$0xf0] }
  0x24   :  { %690 = vmatpush.bf16.msra.mxu2 %v1190_v30  ;;  %v1161_v30 = vld [vmem:[%s1421_s0 + $0x1c] sm:$0xf]  ;;  %v865_v34 = vor.u32 %v1165_v29, %v864_v28 }
  0x25   :  { %709 = vmatpush.bf16.msra.mxu3 %v1198_v31  ;;  %653 = vmatmul.bf16.vlgmr.msra.gmra.mxu0 %v841_v42  ;;  %v866_v31 = vld [vmem:[%s1421_s0 + $0x38] sm:$0xf0] }
  0x26   :  { %721 = vmatpush.bf16.msrb.mxu0 %v1213_v41  ;;  %672 = vmatmul.bf16.vlgmr.msra.gmra.mxu1 %v845_v43  ;;  %v869_v35 = vor.u32 %v1161_v30, %v866_v31  ;;  %v1173_v41 = vld [vmem:[%s1421_s0 + $0x74] sm:$0xf0]  ;;  %v1169_v42 = vld [vmem:[%s1421_s0 + $0x5c] sm:$0xf] }
  0x27   :  { %691 = vmatmul.bf16.vlgmr.msra.gmra.mxu2 %v849_v44  ;;  %740 = vmatpush.bf16.msrb.mxu1 %v1221_v46  ;;  %v898_v43 = vld [vmem:[%s1421_s0 + $0x78] sm:$0xf0]  ;;  %v889_v44 = vor.u32 %v1172_v37, %v888_v36 }
  0x28   :  { %759 = vmatpush.bf16.msrb.mxu2 %v1229_v40  ;;  %710 = vmatmul.bf16.vlgmr.msra.gmra.mxu3 %v853_v45  ;;  %v896_v40 = vld [vmem:[%s1421_s0 + $0x58] sm:$0xf]  ;;  %v893_v45 = vor.u32 %v1168_v38, %v890_v39 }
  0x29   :  { %778 = vmatpush.bf16.msrb.mxu3 %v1237_v47  ;;  %v897_v46 = vor.u32 %v1173_v41, %v896_v40  ;;  %v901_v47 = vor.u32 %v1169_v42, %v898_v43 }
  0x2a   :  { %722 = vmatpush.bf16.msrb.mxu0 %v1212_v49 }
  0x2b   :  { %741 = vmatpush.bf16.msrb.mxu1 %v1220_v50 }
  0x2c   :  { %760 = vmatpush.bf16.msrb.mxu2 %v1228_v48 }
  0x2d   :  { %779 = vmatpush.bf16.msrb.mxu3 %v1236_v51 }
  0x2e   :  { %723 = vmatpush.bf16.msrb.mxu0 %v1211_v53 }
  0x2f   :  { %742 = vmatpush.bf16.msrb.mxu1 %v1219_v54 }
  0x30   :  { %761 = vmatpush.bf16.msrb.mxu2 %v1227_v52 }
  0x31   :  { %780 = vmatpush.bf16.msrb.mxu3 %v1235_v55 }
  0x32   :  { %724 = vmatpush.bf16.msrb.mxu0 %v1210_v57 }
  0x33   :  { %743 = vmatpush.bf16.msrb.mxu1 %v1218_v58 }
  0x34   :  { %762 = vmatpush.bf16.msrb.mxu2 %v1226_v56  ;;  %v1241_v56 = vld [vmem:[%s1423_s2] ss:$0 sm:$0xff] }
  0x35   :  { %781 = vmatpush.bf16.msrb.mxu3 %v1234_v59  ;;  %658 = vmatmul.bf16.gmra.mxu0 %v873_v6 }
  0x36   :  { %725 = vmatpush.bf16.msrb.mxu0 %v1209_v5  ;;  %677 = vmatmul.bf16.gmra.mxu1 %v877_v7 }
  0x37   :  { %696 = vmatmul.bf16.gmra.mxu2 %v881_v8  ;;  %744 = vmatpush.bf16.msrb.mxu1 %v1217_v10 }
  0x38   :  { %763 = vmatpush.bf16.msrb.mxu2 %v1225_v4  ;;  %715 = vmatmul.bf16.gmra.mxu3 %v885_v9 }
  0x39   :  { %782 = vmatpush.bf16.msrb.mxu3 %v1233_v11 }
  0x3a   :  { %726 = vmatpush.bf16.msrb.mxu0 %v1208_v13 }
  0x3b   :  { %745 = vmatpush.bf16.msrb.mxu1 %v1216_v14 }
  0x3c   :  { %764 = vmatpush.bf16.msrb.mxu2 %v1224_v12 }
  0x3d   :  { %783 = vmatpush.bf16.msrb.mxu3 %v1232_v15 }
  0x3e   :  { %727 = vmatpush.bf16.msrb.mxu0 %v1207_v17 }
  0x3f   :  { %746 = vmatpush.bf16.msrb.mxu1 %v1215_v18 }
  0x40   :  { %765 = vmatpush.bf16.msrb.mxu2 %v1223_v16 }
  0x41   :  { %784 = vmatpush.bf16.msrb.mxu3 %v1231_v19 }
  0x42   :  { %728 = vmatpush.bf16.msrb.mxu0 %v1206_v21 }
  0x43   :  { %747 = vmatpush.bf16.msrb.mxu1 %v1214_v22 }
  0x44   :  { %766 = vmatpush.bf16.msrb.mxu2 %v1222_v20 }
  0x45   :  { %785 = vmatpush.bf16.msrb.mxu3 %v1230_v23  ;;  %729 = vmatmul.bf16.vlgmr.msrb.gmra.mxu0 %v857_v32 }
  0x46   :  { %748 = vmatmul.bf16.vlgmr.msrb.gmra.mxu1 %v861_v33 }
  0x47   :  { %767 = vmatmul.bf16.vlgmr.msrb.gmra.mxu2 %v865_v34 }
  0x48   :  { %786 = vmatmul.bf16.vlgmr.msrb.gmra.mxu3 %v869_v35 }
  0x55   :  { %734 = vmatmul.bf16.gmra.mxu0 %v889_v44 }
  0x56   :  { %753 = vmatmul.bf16.gmra.mxu1 %v893_v45 }
  0x57   :  { %772 = vmatmul.bf16.gmra.mxu2 %v897_v46 }
  0x58   :  { %791 = vmatmul.bf16.gmra.mxu3 %v901_v47 }
  0xa2   :  { %v654_v48 = vpop.f32.mrf.mxu0 }
  0xa3   :  { %v673_v49 = vpop.f32.mrf.mxu1  ;;  %v655_v59 = vadd.f32 %v1241_v56, %v654_v48 }
  0xa5   :  { %v674_v62 = vadd.f32 %v673_v49, %v655_v59 }
  0xaa   :  { %v692_v50 = vpop.f32.mrf.mxu2  ;;  %v656_v52 = vpop.f32.mrf.mxu0 }
  0xab   :  { %v711_v51 = vpop.f32.mrf.mxu3  ;;  %v675_v53 = vpop.f32.mrf.mxu1  ;;  %v693_v1 = vadd.f32 %v692_v50, %v674_v62  ;;  %v657_v2 = vadd.f32 %v1241_v56, %v656_v52 }
  0xad   :  { %v712_v5 = vadd.f32 %v711_v51, %v693_v1  ;;  %v676_v8 = vadd.f32 %v675_v53, %v657_v2 }
  0xb2   :  { %v694_v54 = vpop.f32.mrf.mxu2  ;;  %v659_v57 = vpop.f32.mrf.mxu0 }
  0xb3   :  { %v713_v55 = vpop.f32.mrf.mxu3  ;;  %v678_v58 = vpop.f32.mrf.mxu1  ;;  %v695_v10 = vadd.f32 %v694_v54, %v676_v8  ;;  %v660_v11 = vadd.f32 %v1241_v56, %v659_v57 }
  0xb5   :  { %v714_v14 = vadd.f32 %v713_v55, %v695_v10  ;;  %v679_v15 = vadd.f32 %v678_v58, %v660_v11 }
  0xba   :  { %v697_v60 = vpop.f32.mrf.mxu2  ;;  %v661_v63 = vpop.f32.mrf.mxu0 }
  0xbb   :  { %v716_v61 = vpop.f32.mrf.mxu3  ;;  %v680_v0 = vpop.f32.mrf.mxu1  ;;  %v698_v22 = vadd.f32 %v697_v60, %v679_v15  ;;  %v662_v23 = vadd.f32 %v1241_v56, %v661_v63 }
  0xbd   :  { %v717_v26 = vadd.f32 %v716_v61, %v698_v22  ;;  %v681_v30 = vadd.f32 %v680_v0, %v662_v23 }
  0xc2   :  { %v699_v3 = vpop.f32.mrf.mxu2  ;;  %v730_v6 = vpop.f32.mrf.mxu0 }
  0xc3   :  { %v718_v4 = vpop.f32.mrf.mxu3  ;;  %v749_v7 = vpop.f32.mrf.mxu1  ;;  %v731_v9 = vadd.f32 %v730_v6, %v712_v5  ;;  %v700_v34 = vadd.f32 %v699_v3, %v681_v30 }
  0xc5   :  { %v750_v12 = vadd.f32 %v749_v7, %v731_v9  ;;  %v719_v37 = vadd.f32 %v718_v4, %v700_v34 }
  0xca   :  { %v768_v13 = vpop.f32.mrf.mxu2  ;;  %v732_v18 = vpop.f32.mrf.mxu0 }
  0xcb   :  { %v769_v16 = vadd.f32 %v768_v13, %v750_v12  ;;  %v787_v17 = vpop.f32.mrf.mxu3  ;;  %v751_v19 = vpop.f32.mrf.mxu1  ;;  %v733_v21 = vadd.f32 %v732_v18, %v714_v14 }
  0xcd   :  { %v788_v20 = vadd.f32 %v787_v17, %v769_v16  ;;  %v752_v24 = vadd.f32 %v751_v19, %v733_v21 }
  0xcf   :  { %821 = vst [vmem:[%s1424_s3] sm:$0xff] %v788_v20  ;;  %v806_v47 = vmul.f32 %v788_v20, %v788_v20 }
  0xd2   :  { %v770_v25 = vpop.f32.mrf.mxu2  ;;  %v735_v29 = vpop.f32.mrf.mxu0 }
  0xd3   :  { %v771_v27 = vadd.f32 %v770_v25, %v752_v24  ;;  %v789_v28 = vpop.f32.mrf.mxu3  ;;  %v736_v32 = vadd.f32 %v735_v29, %v717_v26  ;;  %v754_v33 = vpop.f32.mrf.mxu1 }
  0xd5   :  { %v790_v31 = vadd.f32 %v789_v28, %v771_v27  ;;  %v755_v35 = vadd.f32 %v754_v33, %v736_v32 }
  0xd7   :  { %822 = vst [vmem:[%s1424_s3 + $0x8] sm:$0xff] %v790_v31  ;;  %v807_v44 = vmul.f32 %v790_v31, %v790_v31  ;;  %v797_v48 = vadd.f32 %v790_v31, %v788_v20 }
  0xd9   :  { %v810_v52 = vadd.f32 %v807_v44, %v806_v47 }
  0xda   :  { %v773_v36 = vpop.f32.mrf.mxu2  ;;  %v737_v40 = vpop.f32.mrf.mxu0 }
  0xdb   :  { %v774_v38 = vadd.f32 %v773_v36, %v755_v35  ;;  %v792_v39 = vpop.f32.mrf.mxu3  ;;  %v738_v42 = vadd.f32 %v737_v40, %v719_v37  ;;  %v756_v43 = vpop.f32.mrf.mxu1 }
  0xdd   :  { %v793_v41 = vadd.f32 %v792_v39, %v774_v38  ;;  %v757_v45 = vadd.f32 %v756_v43, %v738_v42 }
  0xdf   :  { %823 = vst [vmem:[%s1424_s3 + $0x10] sm:$0xff] %v793_v41  ;;  %v808_v49 = vmul.f32 %v793_v41, %v793_v41  ;;  %v798_v53 = vadd.f32 %v797_v48, %v793_v41 }
  0xe1   :  { %v811_v55 = vadd.f32 %v810_v52, %v808_v49 }
  0xe2   :  { %v775_v46 = vpop.f32.mrf.mxu2 }
  0xe3   :  { %v776_v50 = vadd.f32 %v775_v46, %v757_v45  ;;  %v794_v51 = vpop.f32.mrf.mxu3 }
  0xe5   :  { %v795_v54 = vadd.f32 %v794_v51, %v776_v50 }
  0xe7   :  { %v799_v56 = vadd.f32 %v798_v53, %v795_v54  ;;  %v809_v57 = vmul.f32 %v795_v54, %v795_v54  ;;  %824 = vst [vmem:[%s1424_s3 + $0x18] sm:$0xff] %v795_v54 }
  0xe9   :  { %v800_v58 = vrot.slane %v799_v56, 4  ;;  %v812_v59 = vadd.f32 %v811_v55, %v809_v57 }
  0xeb   :  { %v801_v60 = vadd.f32 %v800_v58, %v799_v56  ;;  %v813_v61 = vrot.slane %v812_v59, 4 }
  0xed   :  { %v802_v62 = vrot.slane %v801_v60, 2  ;;  %v814_v63 = vadd.f32 %v813_v61, %v812_v59 }
  0xef   :  { %v803_v0 = vadd.f32 %v802_v62, %v801_v60  ;;  %v815_v1 = vrot.slane %v814_v63, 2 }
  0xf1   :  { %v804_v2 = vrot.slane %v803_v0, 1  ;;  %v816_v3 = vadd.f32 %v815_v1, %v814_v63 }
  0xf3   :  { %v805_v4 = vadd.f32 %v804_v2, %v803_v0  ;;  %v817_v5 = vrot.slane %v816_v3, 1 }
  0xf5   :  { %v818_v6 = vadd.f32 %v817_v5, %v816_v3  ;;  %819 = vst [vmem:[%s1425_s4] sm:$0xff] %v805_v4 }
  0xf7   :  { %820 = vst [vmem:[%s1426_s5] sm:$0xff] %v818_v6 }
  0xf8   :  { %837 = vsyncpa [#allocation3], 1 }

// kernel: discriminator_forward.10
= control target key start
LH: loop header
LB: loop body
LE: loop exit
PB: predicated region body
PF: predicated region fallthrough
CT: control target
= control target key end

     0   :  { %s79_s0 = inlined_call_operand.vmem [shape: f32[8,256], index: 0, kind: input, shape index: {}]   ;;  %s80_s1 = inlined_call_operand.vmem [shape: f32[1,256], index: 1, kind: input, shape index: {}]   ;;  %s81_s2 = inlined_call_operand.vmem [shape: f32[1,256], index: 2, kind: input, shape index: {}]   ;;  %s82_s3 = inlined_call_operand.vmem [shape: bf16[8,256], index: 3, kind: output, shape index: {}]  }
   0x1   :  { %v14_v0 = vld [vmem:[%s79_s0] sm:$0xff]  ;;  %v15_v1 = vld [vmem:[%s79_s0 + $0x8] sm:$0xff] }
   0x2   :  { %v16_v2 = vld [vmem:[%s80_s1] sm:$0x3] }
   0x3   :  { %v18_v3 = vperm.slane %v16_v2, 0  ;;  %v19_v4 = vperm.slane %v16_v2, 1  ;;  %v24_v5 = vld [vmem:[%s81_s2] sm:$0x3] }
   0x4   :  { %v26_v6 = vperm.slane %v24_v5, 0  ;;  %v27_v7 = vperm.slane %v24_v5, 1 }
   0x5   :  { %v22_v8 = vmul.f32 %v18_v3, %v14_v0  ;;  %v23_v9 = vmul.f32 %v19_v4, %v15_v1 }
   0x7   :  { %v30_v10 = vadd.f32 %v26_v6, %v22_v8  ;;  %v31_v11 = vadd.f32 %v27_v7, %v23_v9 }
   0x9   :  { %vm32_vm0 = vcmp.ge.f32.partialorder %v30_v10, 0.0  ;;  %vm33_vm1 = vcmp.ge.f32.partialorder %v31_v11, 0.0  ;;  %v34_v12 = vmul.f32 0.2, %v30_v10  ;;  %v35_v13 = vmul.f32 0.2, %v31_v11 }
   0xb   :  { %v36_v14 = vsel %vm32_vm0, %v30_v10, %v34_v12  ;;  %v37_v15 = vsel %vm33_vm1, %v31_v11, %v35_v13 }
   0xc   :  { %v38_v16 = vpack.c.bf16 %v37_v15, %v36_v14 }
   0xe   :  { %39 = vst [vmem:[%s82_s3] sm:$0xff] %v38_v16 }

// kernel: discriminator_forward.9
= control target key start
LH: loop header
LB: loop body
LE: loop exit
PB: predicated region body
PF: predicated region fallthrough
CT: control target
= control target key end

     0   :  { %s5075_s1 = inlined_call_operand.vmem [shape: bf16[2048,256], index: 1, kind: input, shape index: {}]   ;;  %s5076_s0 = inlined_call_operand.vmem [shape: bf16[8,2048], index: 0, kind: input, shape index: {}]   ;;  %s5077_s2 = inlined_call_operand.vmem [shape: f32[1,256], index: 2, kind: input, shape index: {}]   ;;  %s5078_s3 = inlined_call_operand.vmem [shape: f32[8,256], index: 3, kind: output, shape index: {0}]   ;;  %s5079_s4 = inlined_call_operand.vmem [shape: f32[8,256], index: 4, kind: output, shape index: {1}]   ;;  %s5080_s5 = inlined_call_operand.vmem [shape: f32[8,256], index: 5, kind: output, shape index: {2}]  }
   0x1   :  { %v2141_v0 = vld [vmem:[%s5075_s1 + $0x70] sm:$0xf]  ;;  %v3122_v1 = vld [vmem:[%s5075_s1 + $0x74] sm:$0xf0]  ;;  %v2133_v11 = vld [vmem:[%s5075_s1 + $0x60] sm:$0xf] }
   0x2   :  { %v2205_v2 = vld [vmem:[%s5075_s1 + $0xf0] sm:$0xf]  ;;  %v2142_v3 = vor.u32 %v3122_v1, %v2141_v0  ;;  %v3138_v4 = vld [vmem:[%s5075_s1 + $0xf4] sm:$0xf0]  ;;  %v3120_v13 = vld [vmem:[%s5075_s1 + $0x64] sm:$0xf0] }
   0x3   :  { %v2269_v5 = vld [vmem:[%s5075_s1 + $0x170] sm:$0xf]  ;;  %v3154_v6 = vld [vmem:[%s5075_s1 + $0x174] sm:$0xf0]  ;;  %v2206_v7 = vor.u32 %v3138_v4, %v2205_v2  ;;  %v2197_v14 = vld [vmem:[%s5075_s1 + $0xe0] sm:$0xf]  ;;  %v2134_v16 = vor.u32 %v3120_v13, %v2133_v11 }
   0x4   :  { %v2270_v8 = vor.u32 %v3154_v6, %v2269_v5  ;;  %v2333_v9 = vld [vmem:[%s5075_s1 + $0x1f0] sm:$0xf]  ;;  %v3170_v10 = vld [vmem:[%s5075_s1 + $0x1f4] sm:$0xf0]  ;;  %1623 = vmatpush.bf16.msra.mxu0 %v2142_v3  ;;  %v3136_v15 = vld [vmem:[%s5075_s1 + $0xe4] sm:$0xf0] }
   0x5   :  { %v2334_v12 = vor.u32 %v3170_v10, %v2333_v9  ;;  %1636 = vmatpush.bf16.msra.mxu1 %v2206_v7  ;;  %v2198_v17 = vor.u32 %v3136_v15, %v2197_v14  ;;  %v2261_v18 = vld [vmem:[%s5075_s1 + $0x160] sm:$0xf]  ;;  %v3152_v19 = vld [vmem:[%s5075_s1 + $0x164] sm:$0xf0]  ;;  %v2125_v23 = vld [vmem:[%s5075_s1 + $0x50] sm:$0xf] }
   0x6   :  { %1649 = vmatpush.bf16.msra.mxu2 %v2270_v8  ;;  %v2325_v20 = vld [vmem:[%s5075_s1 + $0x1e0] sm:$0xf]  ;;  %v2262_v21 = vor.u32 %v3152_v19, %v2261_v18  ;;  %v3168_v22 = vld [vmem:[%s5075_s1 + $0x1e4] sm:$0xf0]  ;;  %v3118_v24 = vld [vmem:[%s5075_s1 + $0x54] sm:$0xf0] }
   0x7   :  { %1662 = vmatpush.bf16.msra.mxu3 %v2334_v12  ;;  %v2326_v25 = vor.u32 %v3168_v22, %v2325_v20  ;;  %v2189_v26 = vld [vmem:[%s5075_s1 + $0xd0] sm:$0xf]  ;;  %v3134_v27 = vld [vmem:[%s5075_s1 + $0xd4] sm:$0xf0]  ;;  %v2126_v29 = vor.u32 %v3118_v24, %v2125_v23  ;;  %v2117_v35 = vld [vmem:[%s5075_s1 + $0x40] sm:$0xf] }
   0x8   :  { %v2253_v28 = vld [vmem:[%s5075_s1 + $0x150] sm:$0xf]  ;;  %1624 = vmatpush.bf16.msra.mxu0 %v2134_v16  ;;  %v3150_v30 = vld [vmem:[%s5075_s1 + $0x154] sm:$0xf0]  ;;  %v2190_v33 = vor.u32 %v3134_v27, %v2189_v26  ;;  %v3116_v36 = vld [vmem:[%s5075_s1 + $0x44] sm:$0xf0] }
   0x9   :  { %v2317_v31 = vld [vmem:[%s5075_s1 + $0x1d0] sm:$0xf]  ;;  %v3166_v32 = vld [vmem:[%s5075_s1 + $0x1d4] sm:$0xf0]  ;;  %1637 = vmatpush.bf16.msra.mxu1 %v2198_v17  ;;  %v2254_v34 = vor.u32 %v3150_v30, %v2253_v28  ;;  %v2181_v37 = vld [vmem:[%s5075_s1 + $0xc0] sm:$0xf]  ;;  %v2118_v44 = vor.u32 %v3116_v36, %v2117_v35 }
   0xa   :  { %1650 = vmatpush.bf16.msra.mxu2 %v2262_v21  ;;  %v2318_v38 = vor.u32 %v3166_v32, %v2317_v31  ;;  %v3132_v39 = vld [vmem:[%s5075_s1 + $0xc4] sm:$0xf0]  ;;  %v2245_v40 = vld [vmem:[%s5075_s1 + $0x140] sm:$0xf]  ;;  %v2109_v47 = vld [vmem:[%s5075_s1 + $0x30] sm:$0xf] }
   0xb   :  { %1663 = vmatpush.bf16.msra.mxu3 %v2326_v25  ;;  %v3148_v41 = vld [vmem:[%s5075_s1 + $0x144] sm:$0xf0]  ;;  %v2309_v42 = vld [vmem:[%s5075_s1 + $0x1c0] sm:$0xf]  ;;  %v2182_v45 = vor.u32 %v3132_v39, %v2181_v37  ;;  %v3114_v48 = vld [vmem:[%s5075_s1 + $0x34] sm:$0xf0] }
   0xc   :  { %v3164_v43 = vld [vmem:[%s5075_s1 + $0x1c4] sm:$0xf0]  ;;  %1625 = vmatpush.bf16.msra.mxu0 %v2126_v29  ;;  %v2246_v46 = vor.u32 %v3148_v41, %v2245_v40  ;;  %v2173_v49 = vld [vmem:[%s5075_s1 + $0xb0] sm:$0xf]  ;;  %v3130_v51 = vld [vmem:[%s5075_s1 + $0xb4] sm:$0xf0]  ;;  %v2110_v56 = vor.u32 %v3114_v48, %v2109_v47 }
   0xd   :  { %1638 = vmatpush.bf16.msra.mxu1 %v2190_v33  ;;  %v2310_v50 = vor.u32 %v3164_v43, %v2309_v42  ;;  %v2237_v52 = vld [vmem:[%s5075_s1 + $0x130] sm:$0xf]  ;;  %v3146_v53 = vld [vmem:[%s5075_s1 + $0x134] sm:$0xf0]  ;;  %v2174_v57 = vor.u32 %v3130_v51, %v2173_v49  ;;  %v2101_v59 = vld [vmem:[%s5075_s1 + $0x20] sm:$0xf] }
   0xe   :  { %1651 = vmatpush.bf16.msra.mxu2 %v2254_v34  ;;  %v2301_v54 = vld [vmem:[%s5075_s1 + $0x1b0] sm:$0xf]  ;;  %v3162_v55 = vld [vmem:[%s5075_s1 + $0x1b4] sm:$0xf0]  ;;  %v2238_v58 = vor.u32 %v3146_v53, %v2237_v52  ;;  %v3112_v60 = vld [vmem:[%s5075_s1 + $0x24] sm:$0xf0] }
   0xf   :  { %1664 = vmatpush.bf16.msra.mxu3 %v2318_v38  ;;  %v2165_v61 = vld [vmem:[%s5075_s1 + $0xa0] sm:$0xf]  ;;  %v2302_v62 = vor.u32 %v3162_v55, %v2301_v54  ;;  %v3128_v63 = vld [vmem:[%s5075_s1 + $0xa4] sm:$0xf0]  ;;  %v2102_v4 = vor.u32 %v3112_v60, %v2101_v59  ;;  %v2093_v7 = vld [vmem:[%s5075_s1 + $0x10] sm:$0xf] }
  0x10   :  { %1626 = vmatpush.bf16.msra.mxu0 %v2118_v44  ;;  %v2229_v0 = vld [vmem:[%s5075_s1 + $0x120] sm:$0xf]  ;;  %v3144_v1 = vld [vmem:[%s5075_s1 + $0x124] sm:$0xf0]  ;;  %v2166_v5 = vor.u32 %v3128_v63, %v2165_v61  ;;  %v3110_v8 = vld [vmem:[%s5075_s1 + $0x14] sm:$0xf0] }
  0x11   :  { %1639 = vmatpush.bf16.msra.mxu1 %v2182_v45  ;;  %v2293_v2 = vld [vmem:[%s5075_s1 + $0x1a0] sm:$0xf]  ;;  %v3160_v3 = vld [vmem:[%s5075_s1 + $0x1a4] sm:$0xf0]  ;;  %v2230_v6 = vor.u32 %v3144_v1, %v2229_v0  ;;  %v2157_v9 = vld [vmem:[%s5075_s1 + $0x90] sm:$0xf]  ;;  %v2094_v16 = vor.u32 %v3110_v8, %v2093_v7 }
  0x12   :  { %1652 = vmatpush.bf16.msra.mxu2 %v2246_v46  ;;  %v2294_v10 = vor.u32 %v3160_v3, %v2293_v2  ;;  %v3126_v11 = vld [vmem:[%s5075_s1 + $0x94] sm:$0xf0]  ;;  %v2221_v12 = vld [vmem:[%s5075_s1 + $0x110] sm:$0xf]  ;;  %v2085_v17 = vld [vmem:[%s5075_s1] sm:$0xf] }
  0x13   :  { %1665 = vmatpush.bf16.msra.mxu3 %v2310_v50  ;;  %v3142_v13 = vld [vmem:[%s5075_s1 + $0x114] sm:$0xf0]  ;;  %v2285_v14 = vld [vmem:[%s5075_s1 + $0x190] sm:$0xf]  ;;  %v3108_v18 = vld [vmem:[%s5075_s1 + $0x4] sm:$0xf0]  ;;  %v2158_v19 = vor.u32 %v3126_v11, %v2157_v9 }
  0x14   :  { %1627 = vmatpush.bf16.msra.mxu0 %v2110_v56  ;;  %v3158_v15 = vld [vmem:[%s5075_s1 + $0x194] sm:$0xf0]  ;;  %v2222_v20 = vor.u32 %v3142_v13, %v2221_v12  ;;  %v2149_v21 = vld [vmem:[%s5075_s1 + $0x80] sm:$0xf]  ;;  %v3124_v22 = vld [vmem:[%s5075_s1 + $0x84] sm:$0xf0]  ;;  %v2086_v31 = vor.u32 %v3108_v18, %v2085_v17 }
  0x15   :  { %1640 = vmatpush.bf16.msra.mxu1 %v2174_v57  ;;  %v2213_v23 = vld [vmem:[%s5075_s1 + $0x100] sm:$0xf]  ;;  %v2286_v24 = vor.u32 %v3158_v15, %v2285_v14  ;;  %v3140_v25 = vld [vmem:[%s5075_s1 + $0x104] sm:$0xf0]  ;;  %v2397_v28 = vld [vmem:[%s5075_s1 + $0x270] sm:$0xf]  ;;  %v2150_v35 = vor.u32 %v3124_v22, %v2149_v21 }
  0x16   :  { %1653 = vmatpush.bf16.msra.mxu2 %v2238_v58  ;;  %v2277_v26 = vld [vmem:[%s5075_s1 + $0x180] sm:$0xf]  ;;  %v3156_v27 = vld [vmem:[%s5075_s1 + $0x184] sm:$0xf0]  ;;  %v3186_v29 = vld [vmem:[%s5075_s1 + $0x274] sm:$0xf0]  ;;  %v2214_v36 = vor.u32 %v3140_v25, %v2213_v23 }
  0x17   :  { %1666 = vmatpush.bf16.msra.mxu3 %v2302_v62  ;;  %v2461_v30 = vld [vmem:[%s5075_s1 + $0x2f0] sm:$0xf]  ;;  %v3202_v32 = vld [vmem:[%s5075_s1 + $0x2f4] sm:$0xf0]  ;;  %v2278_v39 = vor.u32 %v3156_v27, %v2277_v26  ;;  %v2398_v40 = vor.u32 %v3186_v29, %v2397_v28  ;;  %v2389_v43 = vld [vmem:[%s5075_s1 + $0x260] sm:$0xf] }
  0x18   :  { %1628 = vmatpush.bf16.msra.mxu0 %v2102_v4  ;;  %v2525_v33 = vld [vmem:[%s5075_s1 + $0x370] sm:$0xf]  ;;  %v3218_v34 = vld [vmem:[%s5075_s1 + $0x374] sm:$0xf0]  ;;  %v2462_v41 = vor.u32 %v3202_v32, %v2461_v30  ;;  %v3184_v44 = vld [vmem:[%s5075_s1 + $0x264] sm:$0xf0] }
  0x19   :  { %1641 = vmatpush.bf16.msra.mxu1 %v2166_v5  ;;  %v2589_v37 = vld [vmem:[%s5075_s1 + $0x3f0] sm:$0xf]  ;;  %v3234_v38 = vld [vmem:[%s5075_s1 + $0x3f4] sm:$0xf0]  ;;  %v2526_v42 = vor.u32 %v3218_v34, %v2525_v33  ;;  %v2453_v45 = vld [vmem:[%s5075_s1 + $0x2e0] sm:$0xf]  ;;  %v2390_v52 = vor.u32 %v3184_v44, %v2389_v43 }
  0x1a   :  { %1654 = vmatpush.bf16.msra.mxu2 %v2230_v6  ;;  %v2590_v46 = vor.u32 %v3234_v38, %v2589_v37  ;;  %v3200_v47 = vld [vmem:[%s5075_s1 + $0x2e4] sm:$0xf0]  ;;  %v2517_v48 = vld [vmem:[%s5075_s1 + $0x360] sm:$0xf]  ;;  %v2381_v53 = vld [vmem:[%s5075_s1 + $0x250] sm:$0xf] }
  0x1b   :  { %1667 = vmatpush.bf16.msra.mxu3 %v2294_v10  ;;  %v3216_v49 = vld [vmem:[%s5075_s1 + $0x364] sm:$0xf0]  ;;  %v2581_v50 = vld [vmem:[%s5075_s1 + $0x3e0] sm:$0xf]  ;;  %v2454_v54 = vor.u32 %v3200_v47, %v2453_v45  ;;  %v3182_v56 = vld [vmem:[%s5075_s1 + $0x254] sm:$0xf0] }
  0x1c   :  { %1629 = vmatpush.bf16.msra.mxu0 %v2094_v16  ;;  %v3232_v51 = vld [vmem:[%s5075_s1 + $0x3e4] sm:$0xf0]  ;;  %v2518_v55 = vor.u32 %v3216_v49, %v2517_v48  ;;  %v2445_v57 = vld [vmem:[%s5075_s1 + $0x2d0] sm:$0xf]  ;;  %v3198_v58 = vld [vmem:[%s5075_s1 + $0x2d4] sm:$0xf0]  ;;  %v2382_v0 = vor.u32 %v3182_v56, %v2381_v53 }
  0x1d   :  { %1642 = vmatpush.bf16.msra.mxu1 %v2158_v19  ;;  %v2582_v59 = vor.u32 %v3232_v51, %v2581_v50  ;;  %v2509_v60 = vld [vmem:[%s5075_s1 + $0x350] sm:$0xf]  ;;  %v3214_v61 = vld [vmem:[%s5075_s1 + $0x354] sm:$0xf0]  ;;  %v2446_v1 = vor.u32 %v3198_v58, %v2445_v57  ;;  %v18_v2 = vld [vmem:[%s5076_s0 + $0x8] sm:$0xff] }
  0x1e   :  { %1655 = vmatpush.bf16.msra.mxu2 %v2222_v20  ;;  %v2573_v62 = vld [vmem:[%s5075_s1 + $0x3d0] sm:$0xf]  ;;  %v3230_v63 = vld [vmem:[%s5075_s1 + $0x3d4] sm:$0xf0]  ;;  %v17_v3 = vld [vmem:[%s5076_s0] sm:$0xff]  ;;  %v2510_v4 = vor.u32 %v3214_v61, %v2509_v60  ;;  %v297_v8 = vunpack.c.l.b16 %v18_v2  ;;  %v298_v10 = vunpack.c.h.b16 %v18_v2 }
  0x1f   :  { %1668 = vmatpush.bf16.msra.mxu3 %v2286_v24  ;;  %v2373_v5 = vld [vmem:[%s5075_s1 + $0x240] sm:$0xf]  ;;  %v3180_v6 = vld [vmem:[%s5075_s1 + $0x244] sm:$0xf0]  ;;  %v295_v9 = vunpack.c.l.b16 %v17_v3  ;;  %v2574_v11 = vor.u32 %v3230_v63, %v2573_v62  ;;  %v296_v15 = vunpack.c.h.b16 %v17_v3  ;;  %v2365_v25 = vld [vmem:[%s5075_s1 + $0x230] sm:$0xf] }
  0x20   :  { %1630 = vmatpush.bf16.msra.mxu0 %v2086_v31  ;;  %v2437_v7 = vld [vmem:[%s5075_s1 + $0x2c0] sm:$0xf]  ;;  %v3196_v12 = vld [vmem:[%s5075_s1 + $0x2c4] sm:$0xf0]  ;;  %v3687_v18 = vpack.c.b16 %v297_v8, %v297_v8  ;;  %v3691_v20 = vpack.c.b16 %v298_v10, %v298_v10  ;;  %v2374_v21 = vor.u32 %v3180_v6, %v2373_v5  ;;  %v3178_v26 = vld [vmem:[%s5075_s1 + $0x234] sm:$0xf0] }
  0x21   :  { %1643 = vmatpush.bf16.msra.mxu1 %v2150_v35  ;;  %v2501_v13 = vld [vmem:[%s5075_s1 + $0x340] sm:$0xf]  ;;  %v3212_v14 = vld [vmem:[%s5075_s1 + $0x344] sm:$0xf0]  ;;  %v3689_v19 = vpack.c.b16 %v295_v9, %v295_v9  ;;  %v3693_v22 = vpack.c.b16 %v296_v15, %v296_v15  ;;  %v2438_v23 = vor.u32 %v3196_v12, %v2437_v7  ;;  %v2429_v27 = vld [vmem:[%s5075_s1 + $0x2b0] sm:$0xf]  ;;  %v2366_v34 = vor.u32 %v3178_v26, %v2365_v25 }
  0x22   :  { %1656 = vmatpush.bf16.msra.mxu2 %v2214_v36  ;;  %v2565_v16 = vld [vmem:[%s5075_s1 + $0x3c0] sm:$0xf]  ;;  %v3228_v17 = vld [vmem:[%s5075_s1 + $0x3c4] sm:$0xf0]  ;;  %v2502_v24 = vor.u32 %v3212_v14, %v2501_v13  ;;  %v3194_v29 = vld [vmem:[%s5075_s1 + $0x2b4] sm:$0xf0] }
  0x23   :  { %1669 = vmatpush.bf16.msra.mxu3 %v2278_v39  ;;  %v2566_v28 = vor.u32 %v3228_v17, %v2565_v16  ;;  %v2493_v30 = vld [vmem:[%s5075_s1 + $0x330] sm:$0xf]  ;;  %v3210_v31 = vld [vmem:[%s5075_s1 + $0x334] sm:$0xf0]  ;;  %1631 = vmatmul.bf16.vlgmr.msra.gmra.mxu0 %v3689_v19  ;;  %v2430_v35 = vor.u32 %v3194_v29, %v2429_v27  ;;  %v2357_v37 = vld [vmem:[%s5075_s1 + $0x220] sm:$0xf] }
  0x24   :  { %1675 = vmatpush.bf16.msrb.mxu0 %v2398_v40  ;;  %v2557_v32 = vld [vmem:[%s5075_s1 + $0x3b0] sm:$0xf]  ;;  %v3226_v33 = vld [vmem:[%s5075_s1 + $0x3b4] sm:$0xf0]  ;;  %1644 = vmatmul.bf16.vlgmr.msra.gmra.mxu1 %v3693_v22  ;;  %v2494_v36 = vor.u32 %v3210_v31, %v2493_v30  ;;  %v3176_v38 = vld [vmem:[%s5075_s1 + $0x224] sm:$0xf0] }
  0x25   :  { %1688 = vmatpush.bf16.msrb.mxu1 %v2462_v41  ;;  %1657 = vmatmul.bf16.vlgmr.msra.gmra.mxu2 %v3687_v18  ;;  %v2421_v39 = vld [vmem:[%s5075_s1 + $0x2a0] sm:$0xf]  ;;  %v2558_v40 = vor.u32 %v3226_v33, %v2557_v32  ;;  %v3192_v41 = vld [vmem:[%s5075_s1 + $0x2a4] sm:$0xf0]  ;;  %v2349_v49 = vld [vmem:[%s5075_s1 + $0x210] sm:$0xf] }
  0x26   :  { %1701 = vmatpush.bf16.msrb.mxu2 %v2526_v42  ;;  %1670 = vmatmul.bf16.vlgmr.msra.gmra.mxu3 %v3691_v20  ;;  %v2485_v42 = vld [vmem:[%s5075_s1 + $0x320] sm:$0xf]  ;;  %v3208_v43 = vld [vmem:[%s5075_s1 + $0x324] sm:$0xf0]  ;;  %v2422_v47 = vor.u32 %v3192_v41, %v2421_v39  ;;  %v3174_v50 = vld [vmem:[%s5075_s1 + $0x214] sm:$0xf0] }
  0x27   :  { %1714 = vmatpush.bf16.msrb.mxu3 %v2590_v46  ;;  %v2549_v44 = vld [vmem:[%s5075_s1 + $0x3a0] sm:$0xf]  ;;  %v3224_v45 = vld [vmem:[%s5075_s1 + $0x3a4] sm:$0xf0]  ;;  %v2358_v46 = vor.u32 %v3176_v38, %v2357_v37  ;;  %v2486_v48 = vor.u32 %v3208_v43, %v2485_v42  ;;  %v2413_v51 = vld [vmem:[%s5075_s1 + $0x290] sm:$0xf] }
  0x28   :  { %1676 = vmatpush.bf16.msrb.mxu0 %v2390_v52  ;;  %v2550_v52 = vor.u32 %v3224_v45, %v2549_v44  ;;  %v3190_v53 = vld [vmem:[%s5075_s1 + $0x294] sm:$0xf0]  ;;  %v2541_v56 = vld [vmem:[%s5075_s1 + $0x390] sm:$0xf]  ;;  %v2341_v58 = vld [vmem:[%s5075_s1 + $0x200] sm:$0xf] }
  0x29   :  { %1689 = vmatpush.bf16.msrb.mxu1 %v2454_v54  ;;  %v2477_v54 = vld [vmem:[%s5075_s1 + $0x310] sm:$0xf]  ;;  %v3222_v57 = vld [vmem:[%s5075_s1 + $0x394] sm:$0xf0]  ;;  %v3172_v60 = vld [vmem:[%s5075_s1 + $0x204] sm:$0xf0]  ;;  %v2414_v63 = vor.u32 %v3190_v53, %v2413_v51 }
  0x2a   :  { %1702 = vmatpush.bf16.msrb.mxu2 %v2518_v55  ;;  %v3206_v55 = vld [vmem:[%s5075_s1 + $0x314] sm:$0xf0]  ;;  %v2405_v61 = vld [vmem:[%s5075_s1 + $0x280] sm:$0xf]  ;;  %v3188_v62 = vld [vmem:[%s5075_s1 + $0x284] sm:$0xf0] }
  0x2b   :  { %1715 = vmatpush.bf16.msrb.mxu3 %v2582_v59  ;;  %v2350_v59 = vor.u32 %v3174_v50, %v2349_v49  ;;  %v3204_v2 = vld [vmem:[%s5075_s1 + $0x304] sm:$0xf0]  ;;  %v20_v3 = vld [vmem:[%s5076_s0 + $0x18] sm:$0xff]  ;;  %v2533_v5 = vld [vmem:[%s5075_s1 + $0x380] sm:$0xf]  ;;  %v2406_v16 = vor.u32 %v3188_v62, %v2405_v61 }
  0x2c   :  { %1677 = vmatpush.bf16.msrb.mxu0 %v2382_v0  ;;  %v2478_v0 = vor.u32 %v3206_v55, %v2477_v54  ;;  %v3220_v6 = vld [vmem:[%s5075_s1 + $0x384] sm:$0xf0]  ;;  %v19_v7 = vld [vmem:[%s5076_s0 + $0x10] sm:$0xff]  ;;  %v3250_v9 = vld [vmem:[%s5075_s1 + $0x474] sm:$0xf0]  ;;  %v301_v15 = vunpack.c.l.b16 %v20_v3  ;;  %v302_v25 = vunpack.c.h.b16 %v20_v3 }
  0x2d   :  { %1690 = vmatpush.bf16.msrb.mxu1 %v2446_v1  ;;  %v2469_v1 = vld [vmem:[%s5075_s1 + $0x300] sm:$0xf]  ;;  %v2653_v8 = vld [vmem:[%s5075_s1 + $0x470] sm:$0xf]  ;;  %v3266_v12 = vld [vmem:[%s5075_s1 + $0x4f4] sm:$0xf0]  ;;  %v2534_v26 = vor.u32 %v3220_v6, %v2533_v5 }
  0x2e   :  { %1703 = vmatpush.bf16.msrb.mxu2 %v2510_v4  ;;  %v2542_v4 = vor.u32 %v3222_v57, %v2541_v56  ;;  %v2717_v10 = vld [vmem:[%s5075_s1 + $0x4f0] sm:$0xf]  ;;  %v3282_v14 = vld [vmem:[%s5075_s1 + $0x574] sm:$0xf0]  ;;  %v2470_v17 = vor.u32 %v3204_v2, %v2469_v1  ;;  %v2654_v27 = vor.u32 %v3250_v9, %v2653_v8  ;;  %v2645_v31 = vld [vmem:[%s5075_s1 + $0x460] sm:$0xf]  ;;  %v3843_v38 = vpack.c.b16 %v301_v15, %v301_v15 }
  0x2f   :  { %1716 = vmatpush.bf16.msrb.mxu3 %v2574_v11  ;;  %v2342_v11 = vor.u32 %v3172_v60, %v2341_v58  ;;  %v2781_v13 = vld [vmem:[%s5075_s1 + $0x570] sm:$0xf]  ;;  %v2718_v29 = vor.u32 %v3266_v12, %v2717_v10  ;;  %v3248_v32 = vld [vmem:[%s5075_s1 + $0x464] sm:$0xf0]  ;;  %v2709_v33 = vld [vmem:[%s5075_s1 + $0x4e0] sm:$0xf]  ;;  %v3853_v42 = vpack.c.b16 %v302_v25, %v302_v25 }
  0x30   :  { %1678 = vmatpush.bf16.msrb.mxu0 %v2374_v21  ;;  %v2845_v21 = vld [vmem:[%s5075_s1 + $0x5f0] sm:$0xf]  ;;  %v2782_v30 = vor.u32 %v3282_v14, %v2781_v13  ;;  %v3280_v37 = vld [vmem:[%s5075_s1 + $0x564] sm:$0xf0]  ;;  %v2837_v39 = vld [vmem:[%s5075_s1 + $0x5e0] sm:$0xf]  ;;  %v2646_v43 = vor.u32 %v3248_v32, %v2645_v31 }
  0x31   :  { %1691 = vmatpush.bf16.msrb.mxu1 %v2438_v23  ;;  %v3298_v23 = vld [vmem:[%s5075_s1 + $0x5f4] sm:$0xf0]  ;;  %v2701_v49 = vld [vmem:[%s5075_s1 + $0x4d0] sm:$0xf]  ;;  %v3244_v60 = vld [vmem:[%s5075_s1 + $0x444] sm:$0xf0] }
  0x32   :  { %1704 = vmatpush.bf16.msrb.mxu2 %v2502_v24  ;;  %v299_v24 = vunpack.c.l.b16 %v19_v7  ;;  %v3262_v51 = vld [vmem:[%s5075_s1 + $0x4d4] sm:$0xf0]  ;;  %v2829_v54 = vld [vmem:[%s5075_s1 + $0x5d0] sm:$0xf]  ;;  %v2693_v61 = vld [vmem:[%s5075_s1 + $0x4c0] sm:$0xf] }
  0x33   :  { %1717 = vmatpush.bf16.msrb.mxu3 %v2566_v28  ;;  %v300_v28 = vunpack.c.h.b16 %v19_v7  ;;  %v3278_v53 = vld [vmem:[%s5075_s1 + $0x554] sm:$0xf0]  ;;  %v2702_v57 = vor.u32 %v3262_v51, %v2701_v49  ;;  %v3276_v1 = vld [vmem:[%s5075_s1 + $0x544] sm:$0xf0]  ;;  %v2821_v2 = vld [vmem:[%s5075_s1 + $0x5c0] sm:$0xf] }
  0x34   :  { %1679 = vmatpush.bf16.msrb.mxu0 %v2366_v34  ;;  %v2846_v34 = vor.u32 %v3298_v23, %v2845_v21  ;;  %v3851_v41 = vpack.c.b16 %v299_v24, %v299_v24  ;;  %v3294_v55 = vld [vmem:[%s5075_s1 + $0x5d4] sm:$0xf0]  ;;  %v3292_v3 = vld [vmem:[%s5075_s1 + $0x5c4] sm:$0xf0]  ;;  %v2621_v7 = vld [vmem:[%s5075_s1 + $0x430] sm:$0xf] }
  0x35   :  { %1692 = vmatpush.bf16.msrb.mxu1 %v2430_v35  ;;  %v3264_v35 = vld [vmem:[%s5075_s1 + $0x4e4] sm:$0xf0]  ;;  %v3855_v44 = vpack.c.b16 %v300_v28, %v300_v28  ;;  %v2830_v62 = vor.u32 %v3294_v55, %v2829_v54  ;;  %v3242_v8 = vld [vmem:[%s5075_s1 + $0x434] sm:$0xf0]  ;;  %v2685_v9 = vld [vmem:[%s5075_s1 + $0x4b0] sm:$0xf]  ;;  %v2822_v10 = vor.u32 %v3292_v3, %v2821_v2 }
  0x36   :  { %1705 = vmatpush.bf16.msrb.mxu2 %v2494_v36  ;;  %v2773_v36 = vld [vmem:[%s5075_s1 + $0x560] sm:$0xf]  ;;  %v2710_v45 = vor.u32 %v3264_v35, %v2709_v33  ;;  %v2749_v12 = vld [vmem:[%s5075_s1 + $0x530] sm:$0xf]  ;;  %v3274_v13 = vld [vmem:[%s5075_s1 + $0x534] sm:$0xf0] }
  0x37   :  { %1718 = vmatpush.bf16.msrb.mxu3 %v2558_v40  ;;  %v3296_v40 = vld [vmem:[%s5075_s1 + $0x5e4] sm:$0xf0]  ;;  %v2813_v14 = vld [vmem:[%s5075_s1 + $0x5b0] sm:$0xf]  ;;  %v3290_v15 = vld [vmem:[%s5075_s1 + $0x5b4] sm:$0xf0]  ;;  %v2750_v21 = vor.u32 %v3274_v13, %v2749_v12 }
  0x38   :  { %1680 = vmatpush.bf16.msrb.mxu0 %v2358_v46  ;;  %v2774_v46 = vor.u32 %v3280_v37, %v2773_v36  ;;  %v2838_v50 = vor.u32 %v3296_v40, %v2837_v39  ;;  %v2613_v23 = vld [vmem:[%s5075_s1 + $0x420] sm:$0xf]  ;;  %v3240_v24 = vld [vmem:[%s5075_s1 + $0x424] sm:$0xf0]  ;;  %v2605_v35 = vld [vmem:[%s5075_s1 + $0x410] sm:$0xf] }
  0x39   :  { %1693 = vmatpush.bf16.msrb.mxu1 %v2422_v47  ;;  %v2637_v47 = vld [vmem:[%s5075_s1 + $0x450] sm:$0xf]  ;;  %v2677_v25 = vld [vmem:[%s5075_s1 + $0x4a0] sm:$0xf]  ;;  %v3288_v31 = vld [vmem:[%s5075_s1 + $0x5a4] sm:$0xf0]  ;;  %v2614_v32 = vor.u32 %v3240_v24, %v2613_v23 }
  0x3a   :  { %1706 = vmatpush.bf16.msrb.mxu2 %v2486_v48  ;;  %v3246_v48 = vld [vmem:[%s5075_s1 + $0x454] sm:$0xf0]  ;;  %v2741_v28 = vld [vmem:[%s5075_s1 + $0x520] sm:$0xf]  ;;  %v2669_v37 = vld [vmem:[%s5075_s1 + $0x490] sm:$0xf] }
  0x3b   :  { %1719 = vmatpush.bf16.msrb.mxu3 %v2550_v52  ;;  %v2765_v52 = vld [vmem:[%s5075_s1 + $0x550] sm:$0xf]  ;;  %v2638_v56 = vor.u32 %v3246_v48, %v2637_v47  ;;  %v3238_v36 = vld [vmem:[%s5075_s1 + $0x414] sm:$0xf0]  ;;  %v2597_v48 = vld [vmem:[%s5075_s1 + $0x400] sm:$0xf] }
  0x3c   :  { %1681 = vmatpush.bf16.msrb.mxu0 %v2350_v59  ;;  %v2766_v58 = vor.u32 %v3278_v53, %v2765_v52  ;;  %v2629_v59 = vld [vmem:[%s5075_s1 + $0x440] sm:$0xf]  ;;  %v3254_v40 = vld [vmem:[%s5075_s1 + $0x494] sm:$0xf0]  ;;  %v2606_v49 = vor.u32 %v3238_v36, %v2605_v35  ;;  %v3252_v52 = vld [vmem:[%s5075_s1 + $0x484] sm:$0xf0] }
  0x3d   :  { %1694 = vmatpush.bf16.msrb.mxu1 %v2414_v63  ;;  %v3260_v63 = vld [vmem:[%s5075_s1 + $0x4c4] sm:$0xf0]  ;;  %v3286_v47 = vld [vmem:[%s5075_s1 + $0x594] sm:$0xf0]  ;;  %v2661_v51 = vld [vmem:[%s5075_s1 + $0x480] sm:$0xf]  ;;  %v2670_v53 = vor.u32 %v3254_v40, %v2669_v37 }
  0x3e   :  { %1707 = vmatpush.bf16.msrb.mxu2 %v2478_v0  ;;  %v2757_v0 = vld [vmem:[%s5075_s1 + $0x540] sm:$0xf]  ;;  %v2694_v5 = vor.u32 %v3260_v63, %v2693_v61  ;;  %v22_v61 = vld [vmem:[%s5076_s0 + $0x28] sm:$0xff]  ;;  %v3314_v63 = vld [vmem:[%s5075_s1 + $0x674] sm:$0xf0] }
  0x3f   :  { %1720 = vmatpush.bf16.msrb.mxu3 %v2542_v4  ;;  %v2630_v4 = vor.u32 %v3244_v60, %v2629_v59  ;;  %v2758_v6 = vor.u32 %v3276_v1, %v2757_v0  ;;  %v2725_v55 = vld [vmem:[%s5075_s1 + $0x500] sm:$0xf]  ;;  %v3284_v60 = vld [vmem:[%s5075_s1 + $0x584] sm:$0xf0]  ;;  %v2973_v0 = vld [vmem:[%s5075_s1 + $0x6f0] sm:$0xf] }
  0x40   :  { %1682 = vmatpush.bf16.msrb.mxu0 %v2342_v11  ;;  %v3258_v11 = vld [vmem:[%s5075_s1 + $0x4b4] sm:$0xf0]  ;;  %v2789_v59 = vld [vmem:[%s5075_s1 + $0x580] sm:$0xf]  ;;  %v3037_v3 = vld [vmem:[%s5075_s1 + $0x770] sm:$0xf] }
  0x41   :  { %1695 = vmatpush.bf16.msrb.mxu1 %v2406_v16  ;;  %v2622_v16 = vor.u32 %v3242_v8, %v2621_v7  ;;  %v3330_v2 = vld [vmem:[%s5075_s1 + $0x6f4] sm:$0xf0]  ;;  %v3101_v8 = vld [vmem:[%s5075_s1 + $0x7f0] sm:$0xf]  ;;  %v2790_v12 = vor.u32 %v3284_v60, %v2789_v59  ;;  %v2965_v23 = vld [vmem:[%s5075_s1 + $0x6e0] sm:$0xf] }
  0x42   :  { %1708 = vmatpush.bf16.msrb.mxu2 %v2470_v17  ;;  %v2686_v17 = vor.u32 %v3258_v11, %v2685_v9  ;;  %v3362_v9 = vld [vmem:[%s5075_s1 + $0x7f4] sm:$0xf0]  ;;  %v2893_v37 = vld [vmem:[%s5075_s1 + $0x650] sm:$0xf]  ;;  %v3340_v59 = vld [vmem:[%s5075_s1 + $0x744] sm:$0xf0] }
  0x43   :  { %1721 = vmatpush.bf16.msrb.mxu3 %v2534_v26  ;;  %1683 = vmatmul.bf16.vlgmr.msrb.gmra.mxu0 %v3851_v41  ;;  %v2814_v26 = vor.u32 %v3290_v15, %v2813_v14  ;;  %v306_v14 = vunpack.c.h.b16 %v22_v61  ;;  %v2974_v15 = vor.u32 %v3330_v2, %v2973_v0  ;;  %v3102_v24 = vor.u32 %v3362_v9, %v3101_v8  ;;  %v2957_v40 = vld [vmem:[%s5075_s1 + $0x6d0] sm:$0xf]  ;;  %v3077_v60 = vld [vmem:[%s5075_s1 + $0x7c0] sm:$0xf]  ;;  %v3306_v2 = vld [vmem:[%s5075_s1 + $0x634] sm:$0xf0] }
  0x44   :  { %1727 = vmatpush.bf16.msra.mxu0 %v2654_v27  ;;  %1696 = vmatmul.bf16.vlgmr.msrb.gmra.mxu1 %v3855_v44  ;;  %v3256_v27 = vld [vmem:[%s5075_s1 + $0x4a4] sm:$0xf0]  ;;  %v3069_v8 = vld [vmem:[%s5075_s1 + $0x7b0] sm:$0xf]  ;;  %v3354_v9 = vld [vmem:[%s5075_s1 + $0x7b4] sm:$0xf0] }
  0x45   :  { %1740 = vmatpush.bf16.msra.mxu1 %v2718_v29  ;;  %1709 = vmatmul.bf16.vlgmr.msrb.gmra.mxu2 %v3843_v38  ;;  %v3272_v29 = vld [vmem:[%s5075_s1 + $0x524] sm:$0xf0]  ;;  %v2678_v33 = vor.u32 %v3256_v27, %v2677_v25  ;;  %v3029_v27 = vld [vmem:[%s5075_s1 + $0x760] sm:$0xf] }
  0x46   :  { %1753 = vmatpush.bf16.msra.mxu2 %v2782_v30  ;;  %1722 = vmatmul.bf16.vlgmr.msrb.gmra.mxu3 %v3853_v42  ;;  %v2805_v30 = vld [vmem:[%s5075_s1 + $0x5a0] sm:$0xf] }
  0x47   :  { %1766 = vmatpush.bf16.msra.mxu3 %v2846_v34  ;;  %v2742_v34 = vor.u32 %v3272_v29, %v2741_v28  ;;  %v2806_v39 = vor.u32 %v3288_v31, %v2805_v30  ;;  %v3344_v28 = vld [vmem:[%s5075_s1 + $0x764] sm:$0xf0]  ;;  %v3093_v31 = vld [vmem:[%s5075_s1 + $0x7e0] sm:$0xf] }
  0x48   :  { %1728 = vmatpush.bf16.msra.mxu0 %v2646_v43  ;;  %v2733_v43 = vld [vmem:[%s5075_s1 + $0x510] sm:$0xf]  ;;  %v3030_v36 = vor.u32 %v3344_v28, %v3029_v27 }
  0x49   :  { %1741 = vmatpush.bf16.msra.mxu1 %v2710_v45  ;;  %v3270_v45 = vld [vmem:[%s5075_s1 + $0x514] sm:$0xf0] }
  0x4a   :  { %1754 = vmatpush.bf16.msra.mxu2 %v2774_v46  ;;  %v2797_v46 = vld [vmem:[%s5075_s1 + $0x590] sm:$0xf]  ;;  %v2734_v54 = vor.u32 %v3270_v45, %v2733_v43  ;;  %v3326_v45 = vld [vmem:[%s5075_s1 + $0x6d4] sm:$0xf0] }
  0x4b   :  { %1767 = vmatpush.bf16.msra.mxu3 %v2838_v50  ;;  %v3236_v50 = vld [vmem:[%s5075_s1 + $0x404] sm:$0xf0] }
  0x4c   :  { %1729 = vmatpush.bf16.msra.mxu0 %v2638_v56  ;;  %v3268_v56 = vld [vmem:[%s5075_s1 + $0x504] sm:$0xf0]  ;;  %v2598_v1 = vor.u32 %v3236_v50, %v2597_v48  ;;  %v3085_v48 = vld [vmem:[%s5075_s1 + $0x7d0] sm:$0xf] }
  0x4d   :  { %1742 = vmatpush.bf16.msra.mxu1 %v2702_v57  ;;  %v21_v57 = vld [vmem:[%s5076_s0 + $0x20] sm:$0xff]  ;;  %v2726_v7 = vor.u32 %v3268_v56, %v2725_v55 }
  0x4e   :  { %1755 = vmatpush.bf16.msra.mxu2 %v2766_v58  ;;  %v2798_v58 = vor.u32 %v3286_v47, %v2797_v46  ;;  %v304_v11 = vunpack.c.h.b16 %v21_v57  ;;  %v3021_v46 = vld [vmem:[%s5075_s1 + $0x750] sm:$0xf]  ;;  %v3342_v47 = vld [vmem:[%s5075_s1 + $0x754] sm:$0xf0]  ;;  %v2949_v55 = vld [vmem:[%s5075_s1 + $0x6c0] sm:$0xf] }
  0x4f   :  { %1768 = vmatpush.bf16.msra.mxu3 %v2830_v62  ;;  %v2909_v62 = vld [vmem:[%s5075_s1 + $0x670] sm:$0xf] }
  0x50   :  { %1730 = vmatpush.bf16.msra.mxu0 %v2630_v4  ;;  %v3346_v4 = vld [vmem:[%s5075_s1 + $0x774] sm:$0xf0]  ;;  %v2910_v13 = vor.u32 %v3314_v63, %v2909_v62  ;;  %v4057_v30 = vpack.c.b16 %v304_v11, %v304_v11 }
  0x51   :  { %1743 = vmatpush.bf16.msra.mxu1 %v2694_v5  ;;  %v303_v5 = vunpack.c.l.b16 %v21_v57  ;;  %v3324_v57 = vld [vmem:[%s5075_s1 + $0x6c4] sm:$0xf0] }
  0x52   :  { %1756 = vmatpush.bf16.msra.mxu2 %v2758_v6  ;;  %v2662_v6 = vor.u32 %v3252_v52, %v2661_v51  ;;  %v2958_v51 = vor.u32 %v3326_v45, %v2957_v40  ;;  %v3022_v52 = vor.u32 %v3342_v47, %v3021_v46  ;;  %v2950_v63 = vor.u32 %v3324_v57, %v2949_v55  ;;  %v3334_v40 = vld [vmem:[%s5075_s1 + $0x714] sm:$0xf0]  ;;  %v2853_v46 = vld [vmem:[%s5075_s1 + $0x600] sm:$0xf]  ;;  %v23_v55 = vld [vmem:[%s5076_s0 + $0x30] sm:$0xff] }
  0x53   :  { %1769 = vmatpush.bf16.msra.mxu3 %v2822_v10  ;;  %v305_v10 = vunpack.c.l.b16 %v22_v61  ;;  %v4044_v25 = vpack.c.b16 %v303_v5, %v303_v5  ;;  %v3356_v61 = vld [vmem:[%s5075_s1 + $0x7c4] sm:$0xf0]  ;;  %v3322_v5 = vld [vmem:[%s5075_s1 + $0x6b4] sm:$0xf0]  ;;  %v3045_v57 = vld [vmem:[%s5075_s1 + $0x780] sm:$0xf] }
  0x54   :  { %1731 = vmatpush.bf16.msra.mxu0 %v2622_v16  ;;  %v3038_v16 = vor.u32 %v3346_v4, %v3037_v3  ;;  %v2941_v3 = vld [vmem:[%s5075_s1 + $0x6b0] sm:$0xf]  ;;  %v3078_v4 = vor.u32 %v3356_v61, %v3077_v60  ;;  %v3350_v45 = vld [vmem:[%s5075_s1 + $0x794] sm:$0xf0]  ;;  %v3121_v60 = vld [vmem:[%s5075_s1 + $0x74] sm:$0xf] }
  0x55   :  { %1744 = vmatpush.bf16.msra.mxu1 %v2686_v17  ;;  %v2901_v17 = vld [vmem:[%s5075_s1 + $0x660] sm:$0xf]  ;;  %v4055_v29 = vpack.c.b16 %v305_v10, %v305_v10  ;;  %v2942_v11 = vor.u32 %v3322_v5, %v2941_v3  ;;  %v2143_v61 = vld [vmem:[%s5075_s1 + $0x78] sm:$0xf0]  ;;  %v307_v3 = vunpack.c.l.b16 %v23_v55 }
  0x56   :  { %1757 = vmatpush.bf16.msra.mxu2 %v2750_v21  ;;  %v3312_v21 = vld [vmem:[%s5075_s1 + $0x664] sm:$0xf0] }
  0x57   :  { %1770 = vmatpush.bf16.msra.mxu3 %v2814_v26  ;;  %v3328_v26 = vld [vmem:[%s5075_s1 + $0x6e4] sm:$0xf0] }
  0x58   :  { %1732 = vmatpush.bf16.msra.mxu0 %v2614_v32  ;;  %v3360_v32 = vld [vmem:[%s5075_s1 + $0x7e4] sm:$0xf0]  ;;  %v2966_v35 = vor.u32 %v3328_v26, %v2965_v23 }
  0x59   :  { %1745 = vmatpush.bf16.msra.mxu1 %v2678_v33  ;;  %v4065_v33 = vpack.c.b16 %v306_v14, %v306_v14  ;;  %v3094_v43 = vor.u32 %v3360_v32, %v3093_v31  ;;  %v3304_v14 = vld [vmem:[%s5075_s1 + $0x624] sm:$0xf0]  ;;  %v2861_v32 = vld [vmem:[%s5075_s1 + $0x610] sm:$0xf] }
  0x5a   :  { %1758 = vmatpush.bf16.msra.mxu2 %v2742_v34  ;;  %v2902_v34 = vor.u32 %v3312_v21, %v2901_v17  ;;  %v3320_v17 = vld [vmem:[%s5075_s1 + $0x6a4] sm:$0xf0]  ;;  %v2997_v21 = vld [vmem:[%s5075_s1 + $0x720] sm:$0xf] }
  0x5b   :  { %1771 = vmatpush.bf16.msra.mxu3 %v2806_v39  ;;  %v3310_v39 = vld [vmem:[%s5075_s1 + $0x654] sm:$0xf0]  ;;  %v3336_v23 = vld [vmem:[%s5075_s1 + $0x724] sm:$0xf0] }
  0x5c   :  { %1733 = vmatpush.bf16.msra.mxu0 %v2606_v49  ;;  %v3358_v49 = vld [vmem:[%s5075_s1 + $0x7d4] sm:$0xf0]  ;;  %v2894_v50 = vor.u32 %v3310_v39, %v2893_v37  ;;  %v3352_v26 = vld [vmem:[%s5075_s1 + $0x7a4] sm:$0xf0]  ;;  %v2998_v31 = vor.u32 %v3336_v23, %v2997_v21  ;;  %v2989_v39 = vld [vmem:[%s5075_s1 + $0x710] sm:$0xf]  ;;  %v4254_v23 = vpack.c.b16 %v307_v3, %v307_v3 }
  0x5d   :  { %1746 = vmatpush.bf16.msra.mxu1 %v2670_v53  ;;  %v2885_v53 = vld [vmem:[%s5075_s1 + $0x640] sm:$0xf]  ;;  %v3086_v56 = vor.u32 %v3358_v49, %v3085_v48  ;;  %v3318_v37 = vld [vmem:[%s5075_s1 + $0x694] sm:$0xf0]  ;;  %v3300_v48 = vld [vmem:[%s5075_s1 + $0x604] sm:$0xf0] }
  0x5e   :  { %1759 = vmatpush.bf16.msra.mxu2 %v2734_v54  ;;  %v3308_v54 = vld [vmem:[%s5075_s1 + $0x644] sm:$0xf0]  ;;  %v2917_v49 = vld [vmem:[%s5075_s1 + $0x680] sm:$0xf]  ;;  %v3113_v3 = vld [vmem:[%s5075_s1 + $0x34] sm:$0xf] }
  0x5f   :  { %1772 = vmatpush.bf16.msra.mxu3 %v2798_v58  ;;  %v3013_v58 = vld [vmem:[%s5075_s1 + $0x740] sm:$0xf]  ;;  %v2886_v62 = vor.u32 %v3308_v54, %v2885_v53  ;;  %v3332_v54 = vld [vmem:[%s5075_s1 + $0x704] sm:$0xf0] }
  0x60   :  { %1734 = vmatpush.bf16.msra.mxu0 %v2598_v1  ;;  %v3014_v0 = vor.u32 %v3340_v59, %v3013_v58  ;;  %v2877_v1 = vld [vmem:[%s5075_s1 + $0x630] sm:$0xf]  ;;  %v2981_v53 = vld [vmem:[%s5075_s1 + $0x700] sm:$0xf]  ;;  %v3348_v58 = vld [vmem:[%s5075_s1 + $0x784] sm:$0xf0] }
  0x61   :  { %1747 = vmatpush.bf16.msra.mxu1 %v2662_v6  ;;  %v3005_v6 = vld [vmem:[%s5075_s1 + $0x730] sm:$0xf]  ;;  %v2878_v10 = vor.u32 %v3306_v2, %v2877_v1  ;;  %v24_v59 = vld [vmem:[%s5076_s0 + $0x38] sm:$0xff]  ;;  %v3153_v1 = vld [vmem:[%s5075_s1 + $0x174] sm:$0xf]  ;;  %v2982_v5 = vor.u32 %v3332_v54, %v2981_v53 }
  0x62   :  { %1760 = vmatpush.bf16.msra.mxu2 %v2726_v7  ;;  %v3338_v7 = vld [vmem:[%s5075_s1 + $0x734] sm:$0xf0]  ;;  %v2271_v2 = vld [vmem:[%s5075_s1 + $0x178] sm:$0xf0] }
  0x63   :  { %1773 = vmatpush.bf16.msra.mxu3 %v2790_v12  ;;  %1735 = vmatmul.bf16.vlgmr.msra.gmra.mxu0 %v4044_v25  ;;  %v3006_v12 = vor.u32 %v3338_v7, %v3005_v6  ;;  %v3169_v6 = vld [vmem:[%s5075_s1 + $0x1f4] sm:$0xf]  ;;  %v2335_v7 = vld [vmem:[%s5075_s1 + $0x1f8] sm:$0xf0] }
  0x64   :  { %1779 = vmatpush.bf16.msrb.mxu0 %v2910_v13  ;;  %1748 = vmatmul.bf16.vlgmr.msra.gmra.mxu1 %v4057_v30  ;;  %v2869_v13 = vld [vmem:[%s5075_s1 + $0x620] sm:$0xf]  ;;  %v2338_v21 = vor.u32 %v3169_v6, %v2335_v7  ;;  %v2175_v7 = vld [vmem:[%s5075_s1 + $0xb8] sm:$0xf0] }
  0x65   :  { %1792 = vmatpush.bf16.msrb.mxu1 %v2974_v15  ;;  %1761 = vmatmul.bf16.vlgmr.msra.gmra.mxu2 %v4055_v29  ;;  %v2933_v15 = vld [vmem:[%s5075_s1 + $0x6a0] sm:$0xf]  ;;  %v2870_v27 = vor.u32 %v3304_v14, %v2869_v13  ;;  %v2274_v14 = vor.u32 %v3153_v1, %v2271_v2 }
  0x66   :  { %1805 = vmatpush.bf16.msrb.mxu2 %v3038_v16  ;;  %1774 = vmatmul.bf16.vlgmr.msra.gmra.mxu3 %v4065_v33  ;;  %v3070_v16 = vor.u32 %v3354_v9, %v3069_v8  ;;  %v2934_v28 = vor.u32 %v3320_v17, %v2933_v15  ;;  %v309_v8 = vunpack.c.l.b16 %v24_v59  ;;  %v308_v9 = vunpack.c.h.b16 %v23_v55  ;;  %v3119_v15 = vld [vmem:[%s5075_s1 + $0x64] sm:$0xf] }
  0x67   :  { %1818 = vmatpush.bf16.msrb.mxu3 %v3102_v24  ;;  %v3061_v24 = vld [vmem:[%s5075_s1 + $0x7a0] sm:$0xf]  ;;  %v3135_v17 = vld [vmem:[%s5075_s1 + $0xe4] sm:$0xf] }
  0x68   :  { %1780 = vmatpush.bf16.msrb.mxu0 %v2902_v34  ;;  %v3302_v34 = vld [vmem:[%s5075_s1 + $0x614] sm:$0xf0]  ;;  %v3115_v55 = vld [vmem:[%s5075_s1 + $0x44] sm:$0xf] }
  0x69   :  { %1793 = vmatpush.bf16.msrb.mxu1 %v2966_v35  ;;  %v2925_v35 = vld [vmem:[%s5075_s1 + $0x690] sm:$0xf]  ;;  %v2862_v47 = vor.u32 %v3302_v34, %v2861_v32  ;;  %v3167_v32 = vld [vmem:[%s5075_s1 + $0x1e4] sm:$0xf]  ;;  %v2327_v34 = vld [vmem:[%s5075_s1 + $0x1e8] sm:$0xf0] }
  0x6a   :  { %1806 = vmatpush.bf16.msrb.mxu2 %v3030_v36  ;;  %v3062_v36 = vor.u32 %v3352_v26, %v3061_v24  ;;  %v2199_v24 = vld [vmem:[%s5075_s1 + $0xe8] sm:$0xf0]  ;;  %v3151_v26 = vld [vmem:[%s5075_s1 + $0x164] sm:$0xf] }
  0x6b   :  { %1819 = vmatpush.bf16.msrb.mxu3 %v3094_v43  ;;  %v3053_v43 = vld [vmem:[%s5075_s1 + $0x790] sm:$0xf] }
  0x6c   :  { %1781 = vmatpush.bf16.msrb.mxu0 %v2894_v50  ;;  %v3316_v50 = vld [vmem:[%s5075_s1 + $0x684] sm:$0xf0] }
  0x6d   :  { %1794 = vmatpush.bf16.msrb.mxu1 %v2958_v51  ;;  %v2926_v51 = vor.u32 %v3318_v37, %v2925_v35  ;;  %v2202_v37 = vor.u32 %v3135_v17, %v2199_v24  ;;  %v3127_v17 = vld [vmem:[%s5075_s1 + $0xa4] sm:$0xf]  ;;  %v2167_v24 = vld [vmem:[%s5075_s1 + $0xa8] sm:$0xf0] }
  0x6e   :  { %1807 = vmatpush.bf16.msrb.mxu2 %v3022_v52  ;;  %v2990_v52 = vor.u32 %v3334_v40, %v2989_v39  ;;  %v3117_v40 = vld [vmem:[%s5075_s1 + $0x54] sm:$0xf] }
  0x6f   :  { %1820 = vmatpush.bf16.msrb.mxu3 %v3086_v56  ;;  %v3054_v56 = vor.u32 %v3350_v45, %v3053_v43  ;;  %v2127_v43 = vld [vmem:[%s5075_s1 + $0x58] sm:$0xf0]  ;;  %v3133_v45 = vld [vmem:[%s5075_s1 + $0xd4] sm:$0xf] }
  0x70   :  { %1782 = vmatpush.bf16.msrb.mxu0 %v2886_v62  ;;  %v3137_v62 = vld [vmem:[%s5075_s1 + $0xf4] sm:$0xf] }
  0x71   :  { %1795 = vmatpush.bf16.msrb.mxu1 %v2950_v63  ;;  %v2854_v63 = vor.u32 %v3300_v48, %v2853_v46  ;;  %v2330_v46 = vor.u32 %v3167_v32, %v2327_v34  ;;  %v3149_v48 = vld [vmem:[%s5075_s1 + $0x154] sm:$0xf]  ;;  %v3159_v32 = vld [vmem:[%s5075_s1 + $0x1a4] sm:$0xf]  ;;  %v2295_v34 = vld [vmem:[%s5075_s1 + $0x1a8] sm:$0xf0] }
  0x72   :  { %1808 = vmatpush.bf16.msrb.mxu2 %v3014_v0  ;;  %v2207_v0 = vld [vmem:[%s5075_s1 + $0xf8] sm:$0xf0] }
  0x73   :  { %1821 = vmatpush.bf16.msrb.mxu3 %v3078_v4  ;;  %v2918_v4 = vor.u32 %v3316_v50, %v2917_v49  ;;  %v2210_v13 = vor.u32 %v3137_v62, %v2207_v0  ;;  %v2255_v49 = vld [vmem:[%s5075_s1 + $0x158] sm:$0xf0]  ;;  %v3165_v50 = vld [vmem:[%s5075_s1 + $0x1d4] sm:$0xf]  ;;  %v3163_v62 = vld [vmem:[%s5075_s1 + $0x1c4] sm:$0xf] }
  0x74   :  { %1783 = vmatpush.bf16.msrb.mxu0 %v2878_v10  ;;  %v3046_v10 = vor.u32 %v3348_v58, %v3045_v57  ;;  %v2258_v54 = vor.u32 %v3149_v48, %v2255_v49  ;;  %v3131_v57 = vld [vmem:[%s5075_s1 + $0xc4] sm:$0xf]  ;;  %v3141_v48 = vld [vmem:[%s5075_s1 + $0x114] sm:$0xf]  ;;  %v2223_v49 = vld [vmem:[%s5075_s1 + $0x118] sm:$0xf0] }
  0x75   :  { %1796 = vmatpush.bf16.msrb.mxu1 %v2942_v11  ;;  %v2146_v11 = vor.u32 %v3121_v60, %v2143_v61  ;;  %v3147_v60 = vld [vmem:[%s5075_s1 + $0x144] sm:$0xf]  ;;  %v2247_v61 = vld [vmem:[%s5075_s1 + $0x148] sm:$0xf0] }
  0x76   :  { %1809 = vmatpush.bf16.msrb.mxu2 %v3006_v12  ;;  %v310_v12 = vunpack.c.h.b16 %v24_v59  ;;  %v2183_v59 = vld [vmem:[%s5075_s1 + $0xc8] sm:$0xf0]  ;;  %v2250_v2 = vor.u32 %v3147_v60, %v2247_v61 }
  0x77   :  { %1822 = vmatpush.bf16.msrb.mxu3 %v3070_v16  ;;  %v2135_v16 = vld [vmem:[%s5075_s1 + $0x68] sm:$0xf0]  ;;  %v2186_v1 = vor.u32 %v3131_v57, %v2183_v59  ;;  %v3123_v57 = vld [vmem:[%s5075_s1 + $0x84] sm:$0xf] }
  0x78   :  { %1784 = vmatpush.bf16.msrb.mxu0 %v2870_v27  ;;  %v2263_v27 = vld [vmem:[%s5075_s1 + $0x168] sm:$0xf0]  ;;  %v4275_v35 = vpack.c.b16 %v310_v12, %v310_v12  ;;  %v3139_v59 = vld [vmem:[%s5075_s1 + $0x104] sm:$0xf] }
  0x79   :  { %1797 = vmatpush.bf16.msrb.mxu1 %v2934_v28  ;;  %v4265_v28 = vpack.c.b16 %v309_v8, %v309_v8  ;;  %v2266_v39 = vor.u32 %v3151_v26, %v2263_v27  ;;  %v3145_v8 = vld [vmem:[%s5075_s1 + $0x134] sm:$0xf]  ;;  %v3143_v26 = vld [vmem:[%s5075_s1 + $0x124] sm:$0xf]  ;;  %v2231_v27 = vld [vmem:[%s5075_s1 + $0x128] sm:$0xf0] }
  0x7a   :  { %1810 = vmatpush.bf16.msrb.mxu2 %v2998_v31  ;;  %v4267_v31 = vpack.c.b16 %v308_v9, %v308_v9  ;;  %v2239_v9 = vld [vmem:[%s5075_s1 + $0x138] sm:$0xf0]  ;;  %v2215_v61 = vld [vmem:[%s5075_s1 + $0x108] sm:$0xf0] }
  0x7b   :  { %1823 = vmatpush.bf16.msrb.mxu3 %v3062_v36  ;;  %v2138_v36 = vor.u32 %v3119_v15, %v2135_v16  ;;  %v3111_v15 = vld [vmem:[%s5075_s1 + $0x24] sm:$0xf]  ;;  %v2103_v16 = vld [vmem:[%s5075_s1 + $0x28] sm:$0xf0] }
  0x7c   :  { %1785 = vmatpush.bf16.msrb.mxu0 %v2862_v47  ;;  %v2191_v47 = vld [vmem:[%s5075_s1 + $0xd8] sm:$0xf0] }
  0x7d   :  { %1798 = vmatpush.bf16.msrb.mxu1 %v2926_v51  ;;  %v2319_v51 = vld [vmem:[%s5075_s1 + $0x1d8] sm:$0xf0]  ;;  %v2194_v53 = vor.u32 %v3133_v45, %v2191_v47  ;;  %v3125_v45 = vld [vmem:[%s5075_s1 + $0x94] sm:$0xf] }
  0x7e   :  { %1811 = vmatpush.bf16.msrb.mxu2 %v2990_v52  ;;  %v2130_v52 = vor.u32 %v3117_v40, %v2127_v43  ;;  %v2322_v58 = vor.u32 %v3165_v50, %v2319_v51  ;;  %v3109_v40 = vld [vmem:[%s5075_s1 + $0x14] sm:$0xf]  ;;  %v2095_v43 = vld [vmem:[%s5075_s1 + $0x18] sm:$0xf0] }
  0x7f   :  { %1824 = vmatpush.bf16.msrb.mxu3 %v3054_v56  ;;  %v2119_v56 = vld [vmem:[%s5075_s1 + $0x48] sm:$0xf0]  ;;  %v2159_v47 = vld [vmem:[%s5075_s1 + $0x98] sm:$0xf0]  ;;  %v3157_v50 = vld [vmem:[%s5075_s1 + $0x194] sm:$0xf] }
  0x80   :  { %1786 = vmatpush.bf16.msrb.mxu0 %v2854_v63  ;;  %v2311_v63 = vld [vmem:[%s5075_s1 + $0x1c8] sm:$0xf0]  ;;  %v2122_v0 = vor.u32 %v3115_v55, %v2119_v56  ;;  %v2287_v51 = vld [vmem:[%s5075_s1 + $0x198] sm:$0xf0]  ;;  %v2162_v55 = vor.u32 %v3125_v45, %v2159_v47  ;;  %v2226_v56 = vor.u32 %v3141_v48, %v2223_v49  ;;  %v3197_v45 = vld [vmem:[%s5075_s1 + $0x2d4] sm:$0xf] }
  0x81   :  { %1799 = vmatpush.bf16.msrb.mxu1 %v2918_v4  ;;  %v2111_v4 = vld [vmem:[%s5075_s1 + $0x38] sm:$0xf0]  ;;  %v2314_v6 = vor.u32 %v3163_v62, %v2311_v63  ;;  %v2290_v60 = vor.u32 %v3157_v50, %v2287_v51  ;;  %v3155_v62 = vld [vmem:[%s5075_s1 + $0x184] sm:$0xf]  ;;  %v2279_v63 = vld [vmem:[%s5075_s1 + $0x188] sm:$0xf0] }
  0x82   :  { %1812 = vmatpush.bf16.msrb.mxu2 %v2982_v5  ;;  %v3129_v5 = vld [vmem:[%s5075_s1 + $0xb4] sm:$0xf]  ;;  %v2114_v12 = vor.u32 %v3113_v3, %v2111_v4  ;;  %v2463_v4 = vld [vmem:[%s5075_s1 + $0x2f8] sm:$0xf0] }
  0x83   :  { %1825 = vmatpush.bf16.msrb.mxu3 %v3046_v10  ;;  %1787 = vmatmul.bf16.vlgmr.msrb.gmra.mxu0 %v4254_v23  ;;  %v3161_v10 = vld [vmem:[%s5075_s1 + $0x1b4] sm:$0xf]  ;;  %v2447_v47 = vld [vmem:[%s5075_s1 + $0x2d8] sm:$0xf0] }
  0x84   :  { %1831 = vmatpush.bf16.msra.mxu0 %v2146_v11  ;;  %1800 = vmatmul.bf16.vlgmr.msrb.gmra.mxu1 %v4267_v31  ;;  %v2303_v11 = vld [vmem:[%s5075_s1 + $0x1b8] sm:$0xf0]  ;;  %v3213_v48 = vld [vmem:[%s5075_s1 + $0x354] sm:$0xf] }
  0x85   :  { %1844 = vmatpush.bf16.msra.mxu1 %v2210_v13  ;;  %1813 = vmatmul.bf16.vlgmr.msrb.gmra.mxu2 %v4265_v28  ;;  %v2178_v13 = vor.u32 %v3129_v5, %v2175_v7  ;;  %v3217_v5 = vld [vmem:[%s5075_s1 + $0x374] sm:$0xf]  ;;  %v2511_v49 = vld [vmem:[%s5075_s1 + $0x358] sm:$0xf0] }
  0x86   :  { %1857 = vmatpush.bf16.msra.mxu2 %v2274_v14  ;;  %1826 = vmatmul.bf16.vlgmr.msrb.gmra.mxu3 %v4275_v35  ;;  %v2242_v14 = vor.u32 %v3145_v8, %v2239_v9  ;;  %v2218_v8 = vor.u32 %v3139_v59, %v2215_v61  ;;  %v3233_v9 = vld [vmem:[%s5075_s1 + $0x3f4] sm:$0xf]  ;;  %v2575_v51 = vld [vmem:[%s5075_s1 + $0x3d8] sm:$0xf0]  ;;  %v2567_v59 = vld [vmem:[%s5075_s1 + $0x3c8] sm:$0xf0] }
  0x87   :  { %1870 = vmatpush.bf16.msra.mxu3 %v2338_v21  ;;  %v2306_v21 = vor.u32 %v3161_v10, %v2303_v11  ;;  %v2591_v10 = vld [vmem:[%s5075_s1 + $0x3f8] sm:$0xf0]  ;;  %v2282_v11 = vor.u32 %v3155_v62, %v2279_v63  ;;  %v3229_v50 = vld [vmem:[%s5075_s1 + $0x3d4] sm:$0xf] }
  0x88   :  { %1832 = vmatpush.bf16.msra.mxu0 %v2138_v36  ;;  %v2106_v36 = vor.u32 %v3111_v15, %v2103_v16  ;;  %v3183_v15 = vld [vmem:[%s5075_s1 + $0x264] sm:$0xf]  ;;  %v2391_v16 = vld [vmem:[%s5075_s1 + $0x268] sm:$0xf0]  ;;  %v3177_v63 = vld [vmem:[%s5075_s1 + $0x234] sm:$0xf] }
  0x89   :  { %1845 = vmatpush.bf16.msra.mxu1 %v2202_v37  ;;  %v2170_v37 = vor.u32 %v3127_v17, %v2167_v24  ;;  %v3199_v17 = vld [vmem:[%s5075_s1 + $0x2e4] sm:$0xf]  ;;  %v2455_v24 = vld [vmem:[%s5075_s1 + $0x2e8] sm:$0xf0] }
  0x8a   :  { %1858 = vmatpush.bf16.msra.mxu2 %v2266_v39  ;;  %v2234_v39 = vor.u32 %v3143_v26, %v2231_v27  ;;  %v3215_v26 = vld [vmem:[%s5075_s1 + $0x364] sm:$0xf]  ;;  %v2519_v27 = vld [vmem:[%s5075_s1 + $0x368] sm:$0xf0] }
  0x8b   :  { %1871 = vmatpush.bf16.msra.mxu3 %v2330_v46  ;;  %v2298_v46 = vor.u32 %v3159_v32, %v2295_v34  ;;  %v3231_v32 = vld [vmem:[%s5075_s1 + $0x3e4] sm:$0xf]  ;;  %v2583_v34 = vld [vmem:[%s5075_s1 + $0x3e8] sm:$0xf0] }
  0x8c   :  { %1833 = vmatpush.bf16.msra.mxu0 %v2130_v52  ;;  %v2098_v52 = vor.u32 %v3109_v40, %v2095_v43  ;;  %v3181_v40 = vld [vmem:[%s5075_s1 + $0x254] sm:$0xf]  ;;  %v2383_v43 = vld [vmem:[%s5075_s1 + $0x258] sm:$0xf0] }
  0x8d   :  { %1846 = vmatpush.bf16.msra.mxu1 %v2194_v53  ;;  %v3107_v53 = vld [vmem:[%s5075_s1 + $0x4] sm:$0xf] }
  0x8e   :  { %1859 = vmatpush.bf16.msra.mxu2 %v2258_v54  ;;  %v2087_v54 = vld [vmem:[%s5075_s1 + $0x8] sm:$0xf0] }
  0x8f   :  { %1872 = vmatpush.bf16.msra.mxu3 %v2322_v58  ;;  %v2151_v58 = vld [vmem:[%s5075_s1 + $0x88] sm:$0xf0]  ;;  %v2090_v3 = vor.u32 %v3107_v53, %v2087_v54  ;;  %v2450_v53 = vor.u32 %v3197_v45, %v2447_v47  ;;  %v3179_v54 = vld [vmem:[%s5075_s1 + $0x244] sm:$0xf]  ;;  %v2415_v45 = vld [vmem:[%s5075_s1 + $0x298] sm:$0xf0] }
  0x90   :  { %1834 = vmatpush.bf16.msra.mxu0 %v2122_v0  ;;  %v3185_v0 = vld [vmem:[%s5075_s1 + $0x274] sm:$0xf]  ;;  %v2154_v7 = vor.u32 %v3123_v57, %v2151_v58  ;;  %v2503_v57 = vld [vmem:[%s5075_s1 + $0x348] sm:$0xf0]  ;;  %v3227_v58 = vld [vmem:[%s5075_s1 + $0x3c4] sm:$0xf] }
  0x91   :  { %1847 = vmatpush.bf16.msra.mxu1 %v2186_v1  ;;  %v2399_v1 = vld [vmem:[%s5075_s1 + $0x278] sm:$0xf0] }
  0x92   :  { %1860 = vmatpush.bf16.msra.mxu2 %v2250_v2  ;;  %v3201_v2 = vld [vmem:[%s5075_s1 + $0x2f4] sm:$0xf]  ;;  %v2479_v47 = vld [vmem:[%s5075_s1 + $0x318] sm:$0xf0] }
  0x93   :  { %1873 = vmatpush.bf16.msra.mxu3 %v2314_v6  ;;  %v2527_v6 = vld [vmem:[%s5075_s1 + $0x378] sm:$0xf0] }
  0x94   :  { %1835 = vmatpush.bf16.msra.mxu0 %v2114_v12  ;;  %v2402_v12 = vor.u32 %v3185_v0, %v2399_v1  ;;  %v2367_v0 = vld [vmem:[%s5075_s1 + $0x238] sm:$0xf0]  ;;  %v3193_v1 = vld [vmem:[%s5075_s1 + $0x2b4] sm:$0xf] }
  0x95   :  { %1848 = vmatpush.bf16.msra.mxu1 %v2178_v13  ;;  %v2466_v13 = vor.u32 %v3201_v2, %v2463_v4  ;;  %v2570_v2 = vor.u32 %v3227_v58, %v2567_v59  ;;  %v3209_v4 = vld [vmem:[%s5075_s1 + $0x334] sm:$0xf]  ;;  %v2535_v58 = vld [vmem:[%s5075_s1 + $0x388] sm:$0xf0] }
  0x96   :  { %1861 = vmatpush.bf16.msra.mxu2 %v2242_v14  ;;  %v2530_v14 = vor.u32 %v3217_v5, %v2527_v6  ;;  %v2495_v5 = vld [vmem:[%s5075_s1 + $0x338] sm:$0xf0]  ;;  %v3225_v6 = vld [vmem:[%s5075_s1 + $0x3b4] sm:$0xf] }
  0x97   :  { %1874 = vmatpush.bf16.msra.mxu3 %v2306_v21  ;;  %v2594_v21 = vor.u32 %v3233_v9, %v2591_v10  ;;  %v2498_v10 = vor.u32 %v3209_v4, %v2495_v5 }
  0x98   :  { %1836 = vmatpush.bf16.msra.mxu0 %v2106_v36  ;;  %v2394_v36 = vor.u32 %v3183_v15, %v2391_v16  ;;  %v2423_v15 = vld [vmem:[%s5075_s1 + $0x2a8] sm:$0xf0]  ;;  %v3207_v16 = vld [vmem:[%s5075_s1 + $0x324] sm:$0xf] }
  0x99   :  { %1849 = vmatpush.bf16.msra.mxu1 %v2170_v37  ;;  %v2458_v37 = vor.u32 %v3199_v17, %v2455_v24  ;;  %v2487_v17 = vld [vmem:[%s5075_s1 + $0x328] sm:$0xf0] }
  0x9a   :  { %1862 = vmatpush.bf16.msra.mxu2 %v2234_v39  ;;  %v2522_v39 = vor.u32 %v3215_v26, %v2519_v27  ;;  %v2551_v24 = vld [vmem:[%s5075_s1 + $0x3a8] sm:$0xf0] }
  0x9b   :  { %1875 = vmatpush.bf16.msra.mxu3 %v2298_v46  ;;  %v2586_v46 = vor.u32 %v3231_v32, %v2583_v34  ;;  %v2490_v34 = vor.u32 %v3207_v16, %v2487_v17  ;;  %v2711_v17 = vld [vmem:[%s5075_s1 + $0x4e8] sm:$0xf0] }
  0x9c   :  { %1837 = vmatpush.bf16.msra.mxu0 %v2098_v52  ;;  %v2386_v52 = vor.u32 %v3181_v40, %v2383_v43 }
  0x9d   :  { %1850 = vmatpush.bf16.msra.mxu1 %v2162_v55  ;;  %v2375_v55 = vld [vmem:[%s5075_s1 + $0x248] sm:$0xf0] }
  0x9e   :  { %1863 = vmatpush.bf16.msra.mxu2 %v2226_v56  ;;  %v3211_v56 = vld [vmem:[%s5075_s1 + $0x344] sm:$0xf] }
  0x9f   :  { %1876 = vmatpush.bf16.msra.mxu3 %v2290_v60  ;;  %v2378_v60 = vor.u32 %v3179_v54, %v2375_v55  ;;  %v2506_v62 = vor.u32 %v3211_v56, %v2503_v57  ;;  %v3187_v54 = vld [vmem:[%s5075_s1 + $0x284] sm:$0xf]  ;;  %v2407_v55 = vld [vmem:[%s5075_s1 + $0x288] sm:$0xf0] }
  0xa0   :  { %1838 = vmatpush.bf16.msra.mxu0 %v2090_v3  ;;  %v2431_v3 = vld [vmem:[%s5075_s1 + $0x2b8] sm:$0xf0]  ;;  %v4573_v27 = vpop.f32.mrf.mxu0  ;;  %v2471_v56 = vld [vmem:[%s5075_s1 + $0x308] sm:$0xf0]  ;;  %v3219_v57 = vld [vmem:[%s5075_s1 + $0x384] sm:$0xf]  ;;  %v2410_v4 = vor.u32 %v3187_v54, %v2407_v55 }
  0xa1   :  { %1851 = vmatpush.bf16.msra.mxu1 %v2154_v7  ;;  %v2559_v7 = vld [vmem:[%s5075_s1 + $0x3b8] sm:$0xf0]  ;;  %v2434_v9 = vor.u32 %v3193_v1, %v2431_v3  ;;  %v4584_v40 = vpop.f32.mrf.mxu1  ;;  %v3281_v1 = vld [vmem:[%s5075_s1 + $0x574] sm:$0xf]  ;;  %v3243_v55 = vld [vmem:[%s5075_s1 + $0x444] sm:$0xf] }
  0xa2   :  { %1864 = vmatpush.bf16.msra.mxu2 %v2218_v8  ;;  %v2370_v8 = vor.u32 %v3177_v63, %v2367_v0  ;;  %v2719_v0 = vld [vmem:[%s5075_s1 + $0x4f8] sm:$0xf0] }
  0xa3   :  { %1877 = vmatpush.bf16.msra.mxu3 %v2282_v11  ;;  %1839 = vmatmul.bf16.vlgmr.msra.gmra.mxu0 %v3689_v19  ;;  %v3195_v19 = vld [vmem:[%s5075_s1 + $0x2c4] sm:$0xf] }
  0xa4   :  { %1883 = vmatpush.bf16.msrb.mxu0 %v2402_v12  ;;  %1852 = vmatmul.bf16.vlgmr.msra.gmra.mxu1 %v3693_v22  ;;  %v2439_v22 = vld [vmem:[%s5075_s1 + $0x2c8] sm:$0xf0]  ;;  %v3175_v11 = vld [vmem:[%s5075_s1 + $0x224] sm:$0xf] }
  0xa5   :  { %1896 = vmatpush.bf16.msrb.mxu1 %v2466_v13  ;;  %1865 = vmatmul.bf16.vlgmr.msra.gmra.mxu2 %v3687_v18  ;;  %v2514_v18 = vor.u32 %v3213_v48, %v2511_v49  ;;  %v2442_v61 = vor.u32 %v3195_v19, %v2439_v22  ;;  %v2359_v12 = vld [vmem:[%s5075_s1 + $0x228] sm:$0xf0]  ;;  %v3191_v13 = vld [vmem:[%s5075_s1 + $0x2a4] sm:$0xf]  ;;  %v3221_v48 = vld [vmem:[%s5075_s1 + $0x394] sm:$0xf] }
  0xa6   :  { %1909 = vmatpush.bf16.msrb.mxu2 %v2530_v14  ;;  %1878 = vmatmul.bf16.vlgmr.msra.gmra.mxu3 %v3691_v20  ;;  %v2578_v20 = vor.u32 %v3229_v50, %v2575_v51  ;;  %v2562_v14 = vor.u32 %v3225_v6, %v2559_v7  ;;  %v2362_v26 = vor.u32 %v3175_v11, %v2359_v12  ;;  %v2543_v49 = vld [vmem:[%s5075_s1 + $0x398] sm:$0xf0]  ;;  %v3171_v51 = vld [vmem:[%s5075_s1 + $0x204] sm:$0xf]  ;;  %v3297_v6 = vld [vmem:[%s5075_s1 + $0x5f4] sm:$0xf] }
  0xa7   :  { %1922 = vmatpush.bf16.msrb.mxu3 %v2594_v21  ;;  %v3223_v21 = vld [vmem:[%s5075_s1 + $0x3a4] sm:$0xf]  ;;  %v2426_v32 = vor.u32 %v3191_v13, %v2423_v15  ;;  %v2546_v22 = vor.u32 %v3221_v48, %v2543_v49  ;;  %v2847_v7 = vld [vmem:[%s5075_s1 + $0x5f8] sm:$0xf0] }
  0xa8   :  { %1884 = vmatpush.bf16.msrb.mxu0 %v2394_v36  ;;  %v3173_v36 = vld [vmem:[%s5075_s1 + $0x214] sm:$0xf]  ;;  %v2554_v43 = vor.u32 %v3223_v21, %v2551_v24  ;;  %v3203_v19 = vld [vmem:[%s5075_s1 + $0x304] sm:$0xf]  ;;  %v1634_v3 = vpop.f32.mrf.mxu0  ;;  %v2850_v16 = vor.u32 %v3297_v6, %v2847_v7  ;;  %v2775_v24 = vld [vmem:[%s5075_s1 + $0x568] sm:$0xf0] }
  0xa9   :  { %1897 = vmatpush.bf16.msrb.mxu1 %v2458_v37  ;;  %v2351_v37 = vld [vmem:[%s5075_s1 + $0x218] sm:$0xf0]  ;;  %v4627_v59 = vpop.f32.mrf.mxu3  ;;  %v2474_v5 = vor.u32 %v3203_v19, %v2471_v56  ;;  %v3247_v13 = vld [vmem:[%s5075_s1 + $0x464] sm:$0xf]  ;;  %v2631_v19 = vld [vmem:[%s5075_s1 + $0x448] sm:$0xf0] }
  0xaa   :  { %1910 = vmatpush.bf16.msrb.mxu2 %v2522_v39  ;;  %v3189_v39 = vld [vmem:[%s5075_s1 + $0x294] sm:$0xf]  ;;  %v2354_v50 = vor.u32 %v3173_v36, %v2351_v37  ;;  %v3263_v15 = vld [vmem:[%s5075_s1 + $0x4e4] sm:$0xf]  ;;  %v2703_v49 = vld [vmem:[%s5075_s1 + $0x4d8] sm:$0xf0] }
  0xab   :  { %1923 = vmatpush.bf16.msrb.mxu3 %v2586_v46  ;;  %v3205_v46 = vld [vmem:[%s5075_s1 + $0x314] sm:$0xf]  ;;  %v3279_v21 = vld [vmem:[%s5075_s1 + $0x564] sm:$0xf]  ;;  %v2759_v56 = vld [vmem:[%s5075_s1 + $0x548] sm:$0xf0] }
  0xac   :  { %1885 = vmatpush.bf16.msrb.mxu0 %v2386_v52  ;;  %v2343_v52 = vld [vmem:[%s5075_s1 + $0x208] sm:$0xf0]  ;;  %v3273_v6 = vld [vmem:[%s5075_s1 + $0x534] sm:$0xf]  ;;  %v2751_v7 = vld [vmem:[%s5075_s1 + $0x538] sm:$0xf0] }
  0xad   :  { %1898 = vmatpush.bf16.msrb.mxu1 %v2450_v53  ;;  %v2418_v53 = vor.u32 %v3189_v39, %v2415_v45  ;;  %v2346_v63 = vor.u32 %v3171_v51, %v2343_v52  ;;  %v2714_v39 = vor.u32 %v3263_v15, %v2711_v17  ;;  %v3245_v45 = vld [vmem:[%s5075_s1 + $0x454] sm:$0xf]  ;;  %v2767_v51 = vld [vmem:[%s5075_s1 + $0x558] sm:$0xf0]  ;;  %v3255_v15 = vld [vmem:[%s5075_s1 + $0x4a4] sm:$0xf] }
  0xae   :  { %1911 = vmatpush.bf16.msrb.mxu2 %v2514_v18  ;;  %v2482_v18 = vor.u32 %v3205_v46, %v2479_v47  ;;  %v2639_v46 = vld [vmem:[%s5075_s1 + $0x458] sm:$0xf0]  ;;  %v3261_v47 = vld [vmem:[%s5075_s1 + $0x4d4] sm:$0xf] }
  0xaf   :  { %1924 = vmatpush.bf16.msrb.mxu3 %v2578_v20  ;;  %v4616_v20 = vpop.f32.mrf.mxu2  ;;  %v3293_v52 = vld [vmem:[%s5075_s1 + $0x5d4] sm:$0xf] }
  0xb0   :  { %1886 = vmatpush.bf16.msrb.mxu0 %v2378_v60  ;;  %v3249_v60 = vld [vmem:[%s5075_s1 + $0x474] sm:$0xf] }
  0xb1   :  { %1899 = vmatpush.bf16.msrb.mxu1 %v2442_v61  ;;  %v2655_v61 = vld [vmem:[%s5075_s1 + $0x478] sm:$0xf0]  ;;  %v1673_v37 = vpop.f32.mrf.mxu3 }
  0xb2   :  { %1912 = vmatpush.bf16.msrb.mxu2 %v2506_v62  ;;  %v3265_v62 = vld [vmem:[%s5075_s1 + $0x4f4] sm:$0xf]  ;;  %v4788_v37 = vld [vmem:[%s5077_s2] sm:$0x3] }
  0xb3   :  { %1925 = vmatpush.bf16.msrb.mxu3 %v2570_v2  ;;  %v2783_v2 = vld [vmem:[%s5075_s1 + $0x578] sm:$0xf0]  ;;  %v2722_v11 = vor.u32 %v3265_v62, %v2719_v0  ;;  %v3241_v0 = vld [vmem:[%s5075_s1 + $0x434] sm:$0xf] }
  0xb4   :  { %1887 = vmatpush.bf16.msrb.mxu0 %v2370_v8  ;;  %v1647_v8 = vpop.f32.mrf.mxu1  ;;  %v2786_v12 = vor.u32 %v3281_v1, %v2783_v2  ;;  %v2623_v1 = vld [vmem:[%s5075_s1 + $0x438] sm:$0xf0]  ;;  %v3257_v2 = vld [vmem:[%s5075_s1 + $0x4b4] sm:$0xf] }
  0xb5   :  { %1900 = vmatpush.bf16.msrb.mxu1 %v2434_v9  ;;  %v2538_v9 = vor.u32 %v3219_v57, %v2535_v58  ;;  %v3291_v57 = vld [vmem:[%s5075_s1 + $0x5c4] sm:$0xf]  ;;  %v2823_v58 = vld [vmem:[%s5075_s1 + $0x5c8] sm:$0xf0]  ;;  %v3289_v8 = vld [vmem:[%s5075_s1 + $0x5b4] sm:$0xf] }
  0xb6   :  { %1913 = vmatpush.bf16.msrb.mxu2 %v2498_v10  ;;  %v2658_v10 = vor.u32 %v3249_v60, %v2655_v61  ;;  %v2634_v60 = vor.u32 %v3243_v55, %v2631_v19  ;;  %v283_v55 = vperm.slane %v4788_v37, 0 }
  0xb7   :  { %1926 = vmatpush.bf16.msrb.mxu3 %v2562_v14  ;;  %v2647_v14 = vld [vmem:[%s5075_s1 + $0x468] sm:$0xf0] }
  0xb8   :  { %1888 = vmatpush.bf16.msrb.mxu0 %v2362_v26  ;;  %v3295_v26 = vld [vmem:[%s5075_s1 + $0x5e4] sm:$0xf]  ;;  %v2650_v36 = vor.u32 %v3247_v13, %v2647_v14  ;;  %v2615_v14 = vld [vmem:[%s5075_s1 + $0x428] sm:$0xf0] }
  0xb9   :  { %1901 = vmatpush.bf16.msrb.mxu1 %v2426_v32  ;;  %v2839_v32 = vld [vmem:[%s5075_s1 + $0x5e8] sm:$0xf0]  ;;  %v3239_v13 = vld [vmem:[%s5075_s1 + $0x424] sm:$0xf] }
  0xba   :  { %1914 = vmatpush.bf16.msrb.mxu2 %v2490_v34  ;;  %v1660_v34 = vpop.f32.mrf.mxu2  ;;  %v2842_v48 = vor.u32 %v3295_v26, %v2839_v32  ;;  %v2743_v26 = vld [vmem:[%s5075_s1 + $0x528] sm:$0xf0] }
  0xbb   :  { %1927 = vmatpush.bf16.msrb.mxu3 %v2554_v43  ;;  %v2778_v43 = vor.u32 %v3279_v21, %v2775_v24  ;;  %v2679_v21 = vld [vmem:[%s5075_s1 + $0x4a8] sm:$0xf0]  ;;  %v3271_v24 = vld [vmem:[%s5075_s1 + $0x524] sm:$0xf] }
  0xbc   :  { %1889 = vmatpush.bf16.msrb.mxu0 %v2354_v50  ;;  %v3277_v50 = vld [vmem:[%s5075_s1 + $0x554] sm:$0xf]  ;;  %v3287_v34 = vld [vmem:[%s5075_s1 + $0x5a4] sm:$0xf] }
  0xbd   :  { %1902 = vmatpush.bf16.msrb.mxu1 %v2418_v53  ;;  %v2642_v53 = vor.u32 %v3245_v45, %v2639_v46  ;;  %v2770_v54 = vor.u32 %v3277_v50, %v2767_v51  ;;  %v2682_v45 = vor.u32 %v3255_v15, %v2679_v21  ;;  %v2746_v46 = vor.u32 %v3271_v24, %v2743_v26 }
  0xbe   :  { %1915 = vmatpush.bf16.msrb.mxu2 %v2482_v18  ;;  %v2706_v18 = vor.u32 %v3261_v47, %v2703_v49  ;;  %v3237_v47 = vld [vmem:[%s5075_s1 + $0x414] sm:$0xf]  ;;  %v1633_v21 = vadd.f32 %v4573_v27, %v283_v55  ;;  %v2967_v27 = vld [vmem:[%s5075_s1 + $0x6e8] sm:$0xf0] }
  0xbf   :  { %1928 = vmatpush.bf16.msrb.mxu3 %v2546_v22  ;;  %v3275_v22 = vld [vmem:[%s5075_s1 + $0x544] sm:$0xf]  ;;  %v3253_v49 = vld [vmem:[%s5075_s1 + $0x494] sm:$0xf] }
  0xc0   :  { %1890 = vmatpush.bf16.msrb.mxu0 %v2346_v63  ;;  %v4729_v61 = vpop.f32.mrf.mxu0  ;;  %v2762_v63 = vor.u32 %v3275_v22, %v2759_v56  ;;  %v3251_v56 = vld [vmem:[%s5075_s1 + $0x484] sm:$0xf]  ;;  %v3341_v55 = vld [vmem:[%s5075_s1 + $0x754] sm:$0xf] }
  0xc1   :  { %1903 = vmatpush.bf16.msrb.mxu1 %v2410_v4  ;;  %v4740_v3 = vpop.f32.mrf.mxu1  ;;  %v2826_v4 = vor.u32 %v3291_v57, %v2823_v58  ;;  %v2663_v57 = vld [vmem:[%s5075_s1 + $0x488] sm:$0xf0]  ;;  %v3267_v58 = vld [vmem:[%s5075_s1 + $0x504] sm:$0xf] }
  0xc2   :  { %1916 = vmatpush.bf16.msrb.mxu2 %v2474_v5  ;;  %v2687_v5 = vld [vmem:[%s5075_s1 + $0x4b8] sm:$0xf0] }
  0xc3   :  { %1929 = vmatpush.bf16.msrb.mxu3 %v2538_v9  ;;  %1891 = vmatmul.bf16.vlgmr.msrb.gmra.mxu0 %v3851_v41  ;;  %v3259_v41 = vld [vmem:[%s5075_s1 + $0x4c4] sm:$0xf]  ;;  %v2815_v9 = vld [vmem:[%s5075_s1 + $0x5b8] sm:$0xf0] }
  0xc4   :  { %1935 = vmatpush.bf16.msra.mxu0 %v2658_v10  ;;  %1904 = vmatmul.bf16.vlgmr.msrb.gmra.mxu1 %v3855_v44  ;;  %v2695_v44 = vld [vmem:[%s5075_s1 + $0x4c8] sm:$0xf0]  ;;  %v2626_v10 = vor.u32 %v3241_v0, %v2623_v1  ;;  %v2818_v17 = vor.u32 %v3289_v8, %v2815_v9  ;;  %v3283_v0 = vld [vmem:[%s5075_s1 + $0x584] sm:$0xf]  ;;  %v2975_v8 = vld [vmem:[%s5075_s1 + $0x6f8] sm:$0xf0] }
  0xc5   :  { %1948 = vmatpush.bf16.msra.mxu1 %v2722_v11  ;;  %1917 = vmatmul.bf16.vlgmr.msrb.gmra.mxu2 %v3843_v38  ;;  %v2831_v38 = vld [vmem:[%s5075_s1 + $0x5d8] sm:$0xf0]  ;;  %v2698_v62 = vor.u32 %v3259_v41, %v2695_v44  ;;  %v2690_v11 = vor.u32 %v3257_v2, %v2687_v5  ;;  %v3235_v41 = vld [vmem:[%s5075_s1 + $0x404] sm:$0xf]  ;;  %v2791_v1 = vld [vmem:[%s5075_s1 + $0x588] sm:$0xf0] }
  0xc6   :  { %1961 = vmatpush.bf16.msra.mxu2 %v2786_v12  ;;  %1930 = vmatmul.bf16.vlgmr.msrb.gmra.mxu3 %v3853_v42  ;;  %v2834_v42 = vor.u32 %v3293_v52, %v2831_v38  ;;  %v2754_v12 = vor.u32 %v3273_v6, %v2751_v7  ;;  %v2671_v52 = vld [vmem:[%s5075_s1 + $0x498] sm:$0xf0]  ;;  %v3269_v38 = vld [vmem:[%s5075_s1 + $0x514] sm:$0xf]  ;;  %v2794_v15 = vor.u32 %v3283_v0, %v2791_v1  ;;  %v3079_v0 = vld [vmem:[%s5075_s1 + $0x7c8] sm:$0xf0] }
  0xc7   :  { %1974 = vmatpush.bf16.msra.mxu3 %v2850_v16  ;;  %v2674_v44 = vor.u32 %v3253_v49, %v2671_v52  ;;  %v2911_v5 = vld [vmem:[%s5075_s1 + $0x678] sm:$0xf0]  ;;  %v3329_v6 = vld [vmem:[%s5075_s1 + $0x6f4] sm:$0xf] }
  0xc8   :  { %1936 = vmatpush.bf16.msra.mxu0 %v2650_v36  ;;  %v4766_v16 = vpop.f32.mrf.mxu2  ;;  %v2807_v36 = vld [vmem:[%s5075_s1 + $0x5a8] sm:$0xf0]  ;;  %v3345_v9 = vld [vmem:[%s5075_s1 + $0x774] sm:$0xf]  ;;  %v2978_v24 = vor.u32 %v3329_v6, %v2975_v8  ;;  %v2879_v8 = vld [vmem:[%s5075_s1 + $0x638] sm:$0xf0] }
  0xc9   :  { %1949 = vmatpush.bf16.msra.mxu1 %v2714_v39  ;;  %v4777_v32 = vpop.f32.mrf.mxu3  ;;  %v2618_v39 = vor.u32 %v3239_v13, %v2615_v14  ;;  %v1699_v50 = vpop.f32.mrf.mxu1  ;;  %v2810_v51 = vor.u32 %v3287_v34, %v2807_v36  ;;  %v3361_v13 = vld [vmem:[%s5075_s1 + $0x7f4] sm:$0xf]  ;;  %v3103_v14 = vld [vmem:[%s5075_s1 + $0x7f8] sm:$0xf0]  ;;  %v3311_v34 = vld [vmem:[%s5075_s1 + $0x664] sm:$0xf] }
  0xca   :  { %1962 = vmatpush.bf16.msra.mxu2 %v2778_v43  ;;  %v1686_v43 = vpop.f32.mrf.mxu0  ;;  %v2903_v36 = vld [vmem:[%s5075_s1 + $0x668] sm:$0xf0]  ;;  %v1646_v50 = vadd.f32 %v4584_v40, %v1633_v21 }
  0xcb   :  { %1975 = vmatpush.bf16.msra.mxu3 %v2842_v48  ;;  %v2607_v48 = vld [vmem:[%s5075_s1 + $0x418] sm:$0xf0]  ;;  %v3106_v43 = vor.u32 %v3361_v13, %v3103_v14  ;;  %v2906_v49 = vor.u32 %v3311_v34, %v2903_v36  ;;  %v3353_v13 = vld [vmem:[%s5075_s1 + $0x7b4] sm:$0xf]  ;;  %v2871_v34 = vld [vmem:[%s5075_s1 + $0x628] sm:$0xf0] }
  0xcc   :  { %1937 = vmatpush.bf16.msra.mxu0 %v2642_v53  ;;  %v2735_v53 = vld [vmem:[%s5075_s1 + $0x518] sm:$0xf0]  ;;  %v2610_v19 = vor.u32 %v3237_v47, %v2607_v48  ;;  %v3359_v47 = vld [vmem:[%s5075_s1 + $0x7e4] sm:$0xf]  ;;  %v3095_v48 = vld [vmem:[%s5075_s1 + $0x7e8] sm:$0xf0] }
  0xcd   :  { %1950 = vmatpush.bf16.msra.mxu1 %v2706_v18  ;;  %v3285_v18 = vld [vmem:[%s5075_s1 + $0x594] sm:$0xf]  ;;  %v2738_v22 = vor.u32 %v3269_v38, %v2735_v53  ;;  %v2895_v53 = vld [vmem:[%s5075_s1 + $0x658] sm:$0xf0]  ;;  %v3098_v40 = vor.u32 %v3359_v47, %v3095_v48  ;;  %v3319_v36 = vld [vmem:[%s5075_s1 + $0x6a4] sm:$0xf] }
  0xce   :  { %1963 = vmatpush.bf16.msra.mxu2 %v2770_v54  ;;  %v2799_v54 = vld [vmem:[%s5075_s1 + $0x598] sm:$0xf0]  ;;  %v3309_v38 = vld [vmem:[%s5075_s1 + $0x654] sm:$0xf]  ;;  %v3351_v47 = vld [vmem:[%s5075_s1 + $0x7a4] sm:$0xf] }
  0xcf   :  { %1976 = vmatpush.bf16.msra.mxu3 %v2834_v42  ;;  %v2599_v42 = vld [vmem:[%s5075_s1 + $0x408] sm:$0xf0]  ;;  %v3071_v14 = vld [vmem:[%s5075_s1 + $0x7b8] sm:$0xf0] }
  0xd0   :  { %1938 = vmatpush.bf16.msra.mxu0 %v2634_v60  ;;  %v1712_v60 = vpop.f32.mrf.mxu2  ;;  %v2602_v7 = vor.u32 %v3235_v41, %v2599_v42  ;;  %v3087_v41 = vld [vmem:[%s5075_s1 + $0x7d8] sm:$0xf0]  ;;  %v2898_v42 = vor.u32 %v3309_v38, %v2895_v53  ;;  %v3063_v48 = vld [vmem:[%s5075_s1 + $0x7a8] sm:$0xf0] }
  0xd1   :  { %1951 = vmatpush.bf16.msra.mxu1 %v2698_v62  ;;  %v2802_v62 = vor.u32 %v3285_v18, %v2799_v54  ;;  %v1725_v2 = vpop.f32.mrf.mxu3  ;;  %v3325_v18 = vld [vmem:[%s5075_s1 + $0x6d4] sm:$0xf]  ;;  %v2959_v54 = vld [vmem:[%s5075_s1 + $0x6d8] sm:$0xf0]  ;;  %v3015_v60 = vld [vmem:[%s5075_s1 + $0x748] sm:$0xf0] }
  0xd2   :  { %1964 = vmatpush.bf16.msra.mxu2 %v2762_v63  ;;  %v2727_v63 = vld [vmem:[%s5075_s1 + $0x508] sm:$0xf0] }
  0xd3   :  { %1977 = vmatpush.bf16.msra.mxu3 %v2826_v4  ;;  %v3313_v4 = vld [vmem:[%s5075_s1 + $0x674] sm:$0xf] }
  0xd4   :  { %1939 = vmatpush.bf16.msra.mxu0 %v2626_v10  ;;  %v3039_v10 = vld [vmem:[%s5075_s1 + $0x778] sm:$0xf0] }
  0xd5   :  { %1952 = vmatpush.bf16.msra.mxu1 %v2690_v11  ;;  %v2666_v11 = vor.u32 %v3251_v56, %v2663_v57  ;;  %v3042_v26 = vor.u32 %v3345_v9, %v3039_v10  ;;  %v2887_v56 = vld [vmem:[%s5075_s1 + $0x648] sm:$0xf0]  ;;  %v3321_v9 = vld [vmem:[%s5075_s1 + $0x6b4] sm:$0xf] }
  0xd6   :  { %1965 = vmatpush.bf16.msra.mxu2 %v2754_v12  ;;  %v2730_v12 = vor.u32 %v3267_v58, %v2727_v63  ;;  %v3339_v58 = vld [vmem:[%s5075_s1 + $0x744] sm:$0xf] }
  0xd7   :  { %1978 = vmatpush.bf16.msra.mxu3 %v2818_v17  ;;  %v2914_v17 = vor.u32 %v3313_v4, %v2911_v5  ;;  %v3355_v63 = vld [vmem:[%s5075_s1 + $0x7c4] sm:$0xf]  ;;  %v3018_v6 = vor.u32 %v3339_v58, %v3015_v60  ;;  %v2983_v60 = vld [vmem:[%s5075_s1 + $0x708] sm:$0xf0] }
  0xd8   :  { %1940 = vmatpush.bf16.msra.mxu0 %v2618_v39  ;;  %v3327_v39 = vld [vmem:[%s5075_s1 + $0x6e4] sm:$0xf]  ;;  %v3082_v10 = vor.u32 %v3355_v63, %v3079_v0 }
  0xd9   :  { %1953 = vmatpush.bf16.msra.mxu1 %v2682_v45  ;;  %v3343_v45 = vld [vmem:[%s5075_s1 + $0x764] sm:$0xf] }
  0xda   :  { %1966 = vmatpush.bf16.msra.mxu2 %v2746_v46  ;;  %v3031_v46 = vld [vmem:[%s5075_s1 + $0x768] sm:$0xf0]  ;;  %v3331_v58 = vld [vmem:[%s5075_s1 + $0x704] sm:$0xf] }
  0xdb   :  { %1979 = vmatpush.bf16.msra.mxu3 %v2810_v51  ;;  %v2970_v51 = vor.u32 %v3327_v39, %v2967_v27  ;;  %v3034_v52 = vor.u32 %v3343_v45, %v3031_v46  ;;  %v3074_v39 = vor.u32 %v3353_v13, %v3071_v14  ;;  %v3335_v27 = vld [vmem:[%s5075_s1 + $0x724] sm:$0xf]  ;;  %v2999_v45 = vld [vmem:[%s5075_s1 + $0x728] sm:$0xf0] }
  0xdc   :  { %1941 = vmatpush.bf16.msra.mxu0 %v2610_v19  ;;  %v3023_v19 = vld [vmem:[%s5075_s1 + $0x758] sm:$0xf0]  ;;  %v3002_v53 = vor.u32 %v3335_v27, %v2999_v45  ;;  %v3347_v0 = vld [vmem:[%s5075_s1 + $0x784] sm:$0xf] }
  0xdd   :  { %1954 = vmatpush.bf16.msra.mxu1 %v2674_v44  ;;  %v1659_v44 = vadd.f32 %v4616_v20, %v1646_v50  ;;  %v2951_v20 = vld [vmem:[%s5075_s1 + $0x6c8] sm:$0xf0] }
  0xde   :  { %1967 = vmatpush.bf16.msra.mxu2 %v2738_v22  ;;  %v2962_v22 = vor.u32 %v3325_v18, %v2959_v54  ;;  %v3301_v18 = vld [vmem:[%s5075_s1 + $0x614] sm:$0xf] }
  0xdf   :  { %1980 = vmatpush.bf16.msra.mxu3 %v2802_v62  ;;  %v1672_v4 = vadd.f32 %v4627_v59, %v1659_v44  ;;  %v2943_v59 = vld [vmem:[%s5075_s1 + $0x6b8] sm:$0xf0]  ;;  %v3317_v54 = vld [vmem:[%s5075_s1 + $0x694] sm:$0xf] }
  0xe0   :  { %1942 = vmatpush.bf16.msra.mxu0 %v2602_v7  ;;  %v4936_v62 = vpop.f32.mrf.mxu0  ;;  %v3305_v7 = vld [vmem:[%s5075_s1 + $0x634] sm:$0xf]  ;;  %v2946_v21 = vor.u32 %v3321_v9, %v2943_v59 }
  0xe1   :  { %1955 = vmatpush.bf16.msra.mxu1 %v2666_v11  ;;  %v4944_v2 = vpop.f32.mrf.mxu1  ;;  %v3337_v11 = vld [vmem:[%s5075_s1 + $0x734] sm:$0xf] }
  0xe2   :  { %1968 = vmatpush.bf16.msra.mxu2 %v2730_v12  ;;  %v3007_v12 = vld [vmem:[%s5075_s1 + $0x738] sm:$0xf0] }
  0xe3   :  { %1981 = vmatpush.bf16.msra.mxu3 %v2794_v15  ;;  %1943 = vmatmul.bf16.vlgmr.msra.gmra.mxu0 %v4044_v25  ;;  %v3357_v25 = vld [vmem:[%s5075_s1 + $0x7d4] sm:$0xf]  ;;  %v2882_v15 = vor.u32 %v3305_v7, %v2879_v8  ;;  %v2986_v8 = vor.u32 %v3331_v58, %v2983_v60 }
  0xe4   :  { %1987 = vmatpush.bf16.msrb.mxu0 %v2914_v17  ;;  %1956 = vmatmul.bf16.vlgmr.msra.gmra.mxu1 %v4057_v30  ;;  %v3307_v30 = vld [vmem:[%s5075_s1 + $0x644] sm:$0xf]  ;;  %v3090_v57 = vor.u32 %v3357_v25, %v3087_v41  ;;  %v1685_v17 = vadd.f32 %v4729_v61, %v1672_v4  ;;  %v2935_v61 = vld [vmem:[%s5075_s1 + $0x6a8] sm:$0xf0]  ;;  %v2991_v25 = vld [vmem:[%s5075_s1 + $0x718] sm:$0xf0] }
  0xe5   :  { %2000 = vmatpush.bf16.msrb.mxu1 %v2978_v24  ;;  %1969 = vmatmul.bf16.vlgmr.msra.gmra.mxu2 %v4055_v29  ;;  %v3026_v29 = vor.u32 %v3341_v55, %v3023_v19  ;;  %v2890_v1 = vor.u32 %v3307_v30, %v2887_v56  ;;  %v3010_v24 = vor.u32 %v3337_v11, %v3007_v12  ;;  %v3333_v19 = vld [vmem:[%s5075_s1 + $0x714] sm:$0xf]  ;;  %v3299_v56 = vld [vmem:[%s5075_s1 + $0x604] sm:$0xf] }
  0xe6   :  { %2013 = vmatpush.bf16.msrb.mxu2 %v3042_v26  ;;  %1982 = vmatmul.bf16.vlgmr.msra.gmra.mxu3 %v4065_v33  ;;  %v3323_v33 = vld [vmem:[%s5075_s1 + $0x6c4] sm:$0xf]  ;;  %v2938_v38 = vor.u32 %v3319_v36, %v2935_v61  ;;  %v3066_v55 = vor.u32 %v3351_v47, %v3063_v48  ;;  %v3349_v41 = vld [vmem:[%s5075_s1 + $0x794] sm:$0xf]  ;;  %v2994_v30 = vor.u32 %v3333_v19, %v2991_v25 }
  0xe7   :  { %2026 = vmatpush.bf16.msrb.mxu3 %v3106_v43  ;;  %v2954_v5 = vor.u32 %v3323_v33, %v2951_v20  ;;  %v3303_v26 = vld [vmem:[%s5075_s1 + $0x624] sm:$0xf]  ;;  %v2855_v33 = vld [vmem:[%s5075_s1 + $0x608] sm:$0xf0] }
  0xe8   :  { %1988 = vmatpush.bf16.msrb.mxu0 %v2906_v49  ;;  %v4981_v43 = vpop.f32.mrf.mxu2  ;;  %v1738_v49 = vpop.f32.mrf.mxu0  ;;  %v2874_v50 = vor.u32 %v3303_v26, %v2871_v34 }
  0xe9   :  { %2001 = vmatpush.bf16.msrb.mxu1 %v2970_v51  ;;  %v1775_v46 = vpop.f32.mrf.mxu3  ;;  %v1751_v51 = vpop.f32.mrf.mxu1 }
  0xea   :  { %2014 = vmatpush.bf16.msrb.mxu2 %v3034_v52  ;;  %v1698_v52 = vadd.f32 %v4740_v3, %v1685_v17  ;;  %v2927_v3 = vld [vmem:[%s5075_s1 + $0x698] sm:$0xf0] }
  0xeb   :  { %2027 = vmatpush.bf16.msrb.mxu3 %v3098_v40  ;;  %v2863_v40 = vld [vmem:[%s5075_s1 + $0x618] sm:$0xf0] }
  0xec   :  { %1989 = vmatpush.bf16.msrb.mxu0 %v2898_v42  ;;  %v3055_v42 = vld [vmem:[%s5075_s1 + $0x798] sm:$0xf0]  ;;  %v2866_v44 = vor.u32 %v3301_v18, %v2863_v40 }
  0xed   :  { %2002 = vmatpush.bf16.msrb.mxu1 %v2962_v22  ;;  %v1711_v22 = vadd.f32 %v4766_v16, %v1698_v52  ;;  %v3058_v20 = vor.u32 %v3349_v41, %v3055_v42  ;;  %v2919_v16 = vld [vmem:[%s5075_s1 + $0x688] sm:$0xf0] }
  0xee   :  { %2015 = vmatpush.bf16.msrb.mxu2 %v3026_v29  ;;  %v2930_v29 = vor.u32 %v3317_v54, %v2927_v3 }
  0xef   :  { %2028 = vmatpush.bf16.msrb.mxu3 %v3090_v57  ;;  %v3315_v57 = vld [vmem:[%s5075_s1 + $0x684] sm:$0xf] }
  0xf0   :  { %1990 = vmatpush.bf16.msrb.mxu0 %v2890_v1  ;;  %v1764_v63 = vpop.f32.mrf.mxu2  ;;  %v3047_v1 = vld [vmem:[%s5075_s1 + $0x788] sm:$0xf0]  ;;  %v2922_v7 = vor.u32 %v3315_v57, %v2919_v16 }
  0xf1   :  { %2003 = vmatpush.bf16.msrb.mxu1 %v2954_v5  ;;  %v1777_v4 = vpop.f32.mrf.mxu3  ;;  %v2858_v5 = vor.u32 %v3299_v56, %v2855_v33  ;;  %v3050_v9 = vor.u32 %v3347_v0, %v3047_v1 }
  0xf2   :  { %2016 = vmatpush.bf16.msrb.mxu2 %v3018_v6  ;;  %v1724_v6 = vadd.f32 %v4777_v32, %v1711_v22 }
  0xf3   :  { %2029 = vmatpush.bf16.msrb.mxu3 %v3082_v10 }
  0xf4   :  { %1991 = vmatpush.bf16.msrb.mxu0 %v2882_v15  ;;  %v1737_v10 = vadd.f32 %v4936_v62, %v1724_v6 }
  0xf5   :  { %2004 = vmatpush.bf16.msrb.mxu1 %v2946_v21 }
  0xf6   :  { %2017 = vmatpush.bf16.msrb.mxu2 %v3010_v24  ;;  %v1750_v59 = vadd.f32 %v4944_v2, %v1737_v10 }
  0xf7   :  { %2030 = vmatpush.bf16.msrb.mxu3 %v3074_v39 }
  0xf8   :  { %1992 = vmatpush.bf16.msrb.mxu0 %v2874_v50  ;;  %v1763_v32 = vadd.f32 %v4981_v43, %v1750_v59  ;;  %v284_v50 = vperm.slane %v4788_v37, 1 }
  0xf9   :  { %2005 = vmatpush.bf16.msrb.mxu1 %v2938_v38 }
  0xfa   :  { %2018 = vmatpush.bf16.msrb.mxu2 %v3002_v53  ;;  %v1776_v11 = vadd.f32 %v1775_v46, %v1763_v32 }
  0xfb   :  { %2031 = vmatpush.bf16.msrb.mxu3 %v3066_v55 }
  0xfc   :  { %1993 = vmatpush.bf16.msrb.mxu0 %v2866_v44 }
  0xfd   :  { %2006 = vmatpush.bf16.msrb.mxu1 %v2930_v29 }
  0xfe   :  { %2019 = vmatpush.bf16.msrb.mxu2 %v2994_v30 }
  0xff   :  { %2032 = vmatpush.bf16.msrb.mxu3 %v3058_v20 }
 0x100   :  { %1994 = vmatpush.bf16.msrb.mxu0 %v2858_v5  ;;  %v1788_v12 = vpop.f32.mrf.mxu0 }
 0x101   :  { %2007 = vmatpush.bf16.msrb.mxu1 %v2922_v7  ;;  %v1801_v13 = vpop.f32.mrf.mxu1  ;;  %v1789_v62 = vadd.f32 %v1788_v12, %v1776_v11 }
 0x102   :  { %2020 = vmatpush.bf16.msrb.mxu2 %v2986_v8 }
 0x103   :  { %2033 = vmatpush.bf16.msrb.mxu3 %v3050_v9  ;;  %1995 = vmatmul.bf16.vlgmr.msrb.gmra.mxu0 %v4254_v23  ;;  %v1802_v14 = vadd.f32 %v1801_v13, %v1789_v62 }
 0x104   :  { %2008 = vmatmul.bf16.vlgmr.msrb.gmra.mxu1 %v4267_v31 }
 0x105   :  { %2021 = vmatmul.bf16.vlgmr.msrb.gmra.mxu2 %v4265_v28 }
 0x106   :  { %2034 = vmatmul.bf16.vlgmr.msrb.gmra.mxu3 %v4275_v35 }
 0x108   :  { %v1814_v15 = vpop.f32.mrf.mxu2  ;;  %v1790_v24 = vpop.f32.mrf.mxu0 }
 0x109   :  { %v1815_v17 = vadd.f32 %v1814_v15, %v1802_v14  ;;  %v1827_v21 = vpop.f32.mrf.mxu3  ;;  %v1803_v2 = vpop.f32.mrf.mxu1 }
 0x10b   :  { %v1828_v26 = vadd.f32 %v1827_v21, %v1815_v17 }
 0x10d   :  { %v2039_v23 = vrot.slane %v1828_v26, 4  ;;  %v2051_v34 = vmul.f32 %v1828_v26, %v1828_v26  ;;  %2069 = vst [vmem:[%s5078_s3] sm:$0xff] %v1828_v26 }
 0x10f   :  { %v2040_v28 = vadd.f32 %v2039_v23, %v1828_v26  ;;  %v2053_v31 = vrot.slane %v2051_v34, 4 }
 0x110   :  { %v1816_v35 = vpop.f32.mrf.mxu2 }
 0x111   :  { %v2041_v36 = vrot.slane %v2040_v28, 2  ;;  %v2054_v39 = vadd.f32 %v2053_v31, %v2051_v34  ;;  %v1829_v43 = vpop.f32.mrf.mxu3 }
 0x113   :  { %v2042_v61 = vadd.f32 %v2041_v36, %v2040_v28  ;;  %v2055_v27 = vrot.slane %v2054_v39, 2 }
 0x115   :  { %v2043_v45 = vrot.slane %v2042_v61, 1  ;;  %v2056_v46 = vadd.f32 %v2055_v27, %v2054_v39 }
 0x117   :  { %v2044_v47 = vadd.f32 %v2043_v45, %v2042_v61  ;;  %v2057_v48 = vrot.slane %v2056_v46, 1 }
 0x119   :  { %v2058_v49 = vadd.f32 %v2057_v48, %v2056_v46  ;;  %2065 = vst [vmem:[%s5079_s4] sm:$0xff] %v2044_v47 }
 0x11b   :  { %2067 = vst [vmem:[%s5080_s5] sm:$0xff] %v2058_v49 }
 0x120   :  { %v1840_v51 = vpop.f32.mrf.mxu0 }
 0x121   :  { %v1841_v52 = vadd.f32 %v1840_v51, %v284_v50  ;;  %v1853_v38 = vpop.f32.mrf.mxu1 }
 0x123   :  { %v1854_v53 = vadd.f32 %v1853_v38, %v1841_v52 }
 0x128   :  { %v1866_v18 = vpop.f32.mrf.mxu2  ;;  %v1842_v3 = vpop.f32.mrf.mxu0 }
 0x129   :  { %v1867_v40 = vadd.f32 %v1866_v18, %v1854_v53  ;;  %v1879_v54 = vpop.f32.mrf.mxu3  ;;  %v1855_v19 = vpop.f32.mrf.mxu1 }
 0x12b   :  { %v1880_v55 = vadd.f32 %v1879_v54, %v1867_v40 }
 0x130   :  { %v1868_v25 = vpop.f32.mrf.mxu2 }
 0x131   :  { %v1881_v41 = vpop.f32.mrf.mxu3 }
 0x140   :  { %v1892_v42 = vpop.f32.mrf.mxu0 }
 0x141   :  { %v1905_v44 = vpop.f32.mrf.mxu1  ;;  %v1893_v16 = vadd.f32 %v1892_v42, %v1880_v55 }
 0x143   :  { %v1906_v0 = vadd.f32 %v1905_v44, %v1893_v16 }
 0x148   :  { %v1918_v22 = vpop.f32.mrf.mxu2  ;;  %v1894_v30 = vpop.f32.mrf.mxu0 }
 0x149   :  { %v1931_v29 = vpop.f32.mrf.mxu3  ;;  %v1907_v56 = vpop.f32.mrf.mxu1  ;;  %v1919_v4 = vadd.f32 %v1918_v22, %v1906_v0 }
 0x14b   :  { %v1932_v7 = vadd.f32 %v1931_v29, %v1919_v4 }
 0x150   :  { %v1920_v33 = vpop.f32.mrf.mxu2 }
 0x151   :  { %v1933_v37 = vpop.f32.mrf.mxu3 }
 0x160   :  { %v1944_v57 = vpop.f32.mrf.mxu0 }
 0x161   :  { %v1957_v20 = vpop.f32.mrf.mxu1  ;;  %v1945_v8 = vadd.f32 %v1944_v57, %v1932_v7 }
 0x163   :  { %v1958_v9 = vadd.f32 %v1957_v20, %v1945_v8 }
 0x168   :  { %v1970_v58 = vpop.f32.mrf.mxu2  ;;  %v1946_v63 = vpop.f32.mrf.mxu0 }
 0x169   :  { %v1983_v60 = vpop.f32.mrf.mxu3  ;;  %v1959_v1 = vpop.f32.mrf.mxu1  ;;  %v1971_v10 = vadd.f32 %v1970_v58, %v1958_v9 }
 0x16b   :  { %v1984_v59 = vadd.f32 %v1983_v60, %v1971_v10 }
 0x170   :  { %v1972_v5 = vpop.f32.mrf.mxu2 }
 0x171   :  { %v1985_v6 = vpop.f32.mrf.mxu3 }
 0x180   :  { %v1996_v32 = vpop.f32.mrf.mxu0 }
 0x181   :  { %v2009_v11 = vpop.f32.mrf.mxu1  ;;  %v1997_v12 = vadd.f32 %v1996_v32, %v1984_v59 }
 0x183   :  { %v2010_v13 = vadd.f32 %v2009_v11, %v1997_v12 }
 0x188   :  { %v2022_v62 = vpop.f32.mrf.mxu2  ;;  %v1998_v17 = vpop.f32.mrf.mxu0 }
 0x189   :  { %v2023_v14 = vadd.f32 %v2022_v62, %v2010_v13  ;;  %v2035_v15 = vpop.f32.mrf.mxu3  ;;  %v2011_v21 = vpop.f32.mrf.mxu1 }
 0x18b   :  { %v2036_v24 = vadd.f32 %v2035_v15, %v2023_v14 }
 0x18d   :  { %v2045_v2 = vrot.slane %v2036_v24, 4  ;;  %v2052_v26 = vmul.f32 %v2036_v24, %v2036_v24  ;;  %2070 = vst [vmem:[%s5078_s3 + $0x8] sm:$0xff] %v2036_v24 }
 0x18f   :  { %v2046_v23 = vadd.f32 %v2045_v2, %v2036_v24  ;;  %v2059_v34 = vrot.slane %v2052_v26, 4 }
 0x190   :  { %v2024_v28 = vpop.f32.mrf.mxu2 }
 0x191   :  { %v2047_v31 = vrot.slane %v2046_v23, 2  ;;  %v2060_v35 = vadd.f32 %v2059_v34, %v2052_v26  ;;  %v2037_v36 = vpop.f32.mrf.mxu3 }
 0x193   :  { %v2048_v39 = vadd.f32 %v2047_v31, %v2046_v23  ;;  %v2061_v43 = vrot.slane %v2060_v35, 2 }
 0x195   :  { %v2049_v61 = vrot.slane %v2048_v39, 1  ;;  %v2062_v27 = vadd.f32 %v2061_v43, %v2060_v35 }
 0x197   :  { %v2050_v45 = vadd.f32 %v2049_v61, %v2048_v39  ;;  %v2063_v46 = vrot.slane %v2062_v27, 1 }
 0x199   :  { %v2064_v47 = vadd.f32 %v2063_v46, %v2062_v27  ;;  %2066 = vst [vmem:[%s5079_s4 + $0x8] sm:$0xff] %v2050_v45 }
 0x19b   :  { %2068 = vst [vmem:[%s5080_s5 + $0x8] sm:$0xff] %v2064_v47 }

// kernel: discriminator_forward.11
= control target key start
LH: loop header
LB: loop body
LE: loop exit
PB: predicated region body
PF: predicated region fallthrough
CT: control target
= control target key end

     0   :  { %vm2567_vm0 = vcmask 1024   ;;  %s4688_s1 = inlined_call_operand.vmem [shape: bf16[4096,1], index: 1, kind: input, shape index: {}]   ;;  %s4689_s0 = inlined_call_operand.vmem [shape: bf16[2,4096], index: 0, kind: input, shape index: {}]   ;;  %s4690_s2 = inlined_call_operand.<no memory space> [shape: f32[1,1], index: 2, kind: input, shape index: {}]   ;;  %s4691_s3 = inlined_call_operand.vmem [shape: f32[2,1], index: 3, kind: output, shape index: {}]  }
   0x1   :  { %v3604_v0 = vld [vmem:[%s4688_s1 + $0x38] sm:$0xff]  ;;  %v3603_v4 = vld [vmem:[%s4688_s1 + $0x30] sm:$0xff]  ;;  %v3602_v8 = vld [vmem:[%s4688_s1 + $0x28] sm:$0xff] }
   0x2   :  { %v3612_v1 = vld [vmem:[%s4688_s1 + $0x78] sm:$0xff]  ;;  %2144 = vmatpush.bf16.msra.mxu0 %v3604_v0  ;;  %v3611_v5 = vld [vmem:[%s4688_s1 + $0x70] sm:$0xff]  ;;  %v3610_v9 = vld [vmem:[%s4688_s1 + $0x68] sm:$0xff] }
   0x3   :  { %v3620_v2 = vld [vmem:[%s4688_s1 + $0xb8] sm:$0xff]  ;;  %2157 = vmatpush.bf16.msra.mxu1 %v3612_v1  ;;  %v3619_v6 = vld [vmem:[%s4688_s1 + $0xb0] sm:$0xff]  ;;  %v3618_v10 = vld [vmem:[%s4688_s1 + $0xa8] sm:$0xff] }
   0x4   :  { %v3628_v3 = vld [vmem:[%s4688_s1 + $0xf8] sm:$0xff]  ;;  %2170 = vmatpush.bf16.msra.mxu2 %v3620_v2  ;;  %v3627_v7 = vld [vmem:[%s4688_s1 + $0xf0] sm:$0xff]  ;;  %v3626_v11 = vld [vmem:[%s4688_s1 + $0xe8] sm:$0xff] }
   0x5   :  { %2183 = vmatpush.bf16.msra.mxu3 %v3628_v3  ;;  %v3601_v12 = vld [vmem:[%s4688_s1 + $0x20] sm:$0xff]  ;;  %v3600_v16 = vld [vmem:[%s4688_s1 + $0x18] sm:$0xff]  ;;  %v3599_v21 = vld [vmem:[%s4688_s1 + $0x10] sm:$0xff] }
   0x6   :  { %2145 = vmatpush.bf16.msra.mxu0 %v3603_v4  ;;  %v3609_v13 = vld [vmem:[%s4688_s1 + $0x60] sm:$0xff]  ;;  %v3608_v17 = vld [vmem:[%s4688_s1 + $0x58] sm:$0xff]  ;;  %v3607_v22 = vld [vmem:[%s4688_s1 + $0x50] sm:$0xff] }
   0x7   :  { %2158 = vmatpush.bf16.msra.mxu1 %v3611_v5  ;;  %v3617_v14 = vld [vmem:[%s4688_s1 + $0xa0] sm:$0xff]  ;;  %v3616_v18 = vld [vmem:[%s4688_s1 + $0x98] sm:$0xff]  ;;  %v3615_v23 = vld [vmem:[%s4688_s1 + $0x90] sm:$0xff] }
   0x8   :  { %2171 = vmatpush.bf16.msra.mxu2 %v3619_v6  ;;  %v3625_v15 = vld [vmem:[%s4688_s1 + $0xe0] sm:$0xff]  ;;  %v3624_v19 = vld [vmem:[%s4688_s1 + $0xd8] sm:$0xff]  ;;  %v3623_v24 = vld [vmem:[%s4688_s1 + $0xd0] sm:$0xff] }
   0x9   :  { %2184 = vmatpush.bf16.msra.mxu3 %v3627_v7  ;;  %v16_v20 = vld [vmem:[%s4689_s0] sm:$0xff]  ;;  %v3598_v25 = vld [vmem:[%s4688_s1 + $0x8] sm:$0xff]  ;;  %v3636_v33 = vld [vmem:[%s4688_s1 + $0x138] sm:$0xff] }
   0xa   :  { %2146 = vmatpush.bf16.msra.mxu0 %v3602_v8  ;;  %537 = vst [vmem:[#allocation1] ss:$9 sm:$0xff] %v16_v20  ;;  %v3606_v26 = vld [vmem:[%s4688_s1 + $0x48] sm:$0xff]  ;;  %v3597_v29 = vld [vmem:[%s4688_s1] sm:$0xff]  ;;  %v3644_v34 = vld [vmem:[%s4688_s1 + $0x178] sm:$0xff] }
   0xb   :  { %2159 = vmatpush.bf16.msra.mxu1 %v3610_v9  ;;  %v3614_v27 = vld [vmem:[%s4688_s1 + $0x88] sm:$0xff]  ;;  %v3605_v30 = vld [vmem:[%s4688_s1 + $0x40] sm:$0xff]  ;;  %v3652_v35 = vld [vmem:[%s4688_s1 + $0x1b8] sm:$0xff] }
   0xc   :  { %2172 = vmatpush.bf16.msra.mxu2 %v3618_v10  ;;  %v3622_v28 = vld [vmem:[%s4688_s1 + $0xc8] sm:$0xff]  ;;  %v3613_v31 = vld [vmem:[%s4688_s1 + $0x80] sm:$0xff]  ;;  %v3660_v36 = vld [vmem:[%s4688_s1 + $0x1f8] sm:$0xff] }
   0xd   :  { %2185 = vmatpush.bf16.msra.mxu3 %v3626_v11  ;;  %v3621_v32 = vld [vmem:[%s4688_s1 + $0xc0] sm:$0xff]  ;;  %v3635_v37 = vld [vmem:[%s4688_s1 + $0x130] sm:$0xff]  ;;  %v3634_v45 = vld [vmem:[%s4688_s1 + $0x128] sm:$0xff] }
   0xe   :  { %2147 = vmatpush.bf16.msra.mxu0 %v3601_v12  ;;  %v3643_v40 = vld [vmem:[%s4688_s1 + $0x170] sm:$0xff]  ;;  %v3642_v46 = vld [vmem:[%s4688_s1 + $0x168] sm:$0xff]  ;;  %v3633_v54 = vld [vmem:[%s4688_s1 + $0x120] sm:$0xff] }
   0xf   :  { %2160 = vmatpush.bf16.msra.mxu1 %v3609_v13  ;;  %v3651_v43 = vld [vmem:[%s4688_s1 + $0x1b0] sm:$0xff]  ;;  %v3650_v47 = vld [vmem:[%s4688_s1 + $0x1a8] sm:$0xff]  ;;  %v3641_v55 = vld [vmem:[%s4688_s1 + $0x160] sm:$0xff] }
  0x10   :  { %2173 = vmatpush.bf16.msra.mxu2 %v3617_v14  ;;  %v3659_v44 = vld [vmem:[%s4688_s1 + $0x1f0] sm:$0xff]  ;;  %v3658_v48 = vld [vmem:[%s4688_s1 + $0x1e8] sm:$0xff]  ;;  %v3649_v56 = vld [vmem:[%s4688_s1 + $0x1a0] sm:$0xff] }
  0x11   :  { %2186 = vmatpush.bf16.msra.mxu3 %v3625_v15  ;;  %v540_v38 = vld [vmem:[#allocation1 + $0x12] sm:$0xff]  ;;  %v538_v39 = vld [vmem:[#allocation1] sm:$0xff]  ;;  %v539_v42 = vld [vmem:[#allocation1 + $0x9] sm:$0xff] }
  0x12   :  { %2148 = vmatpush.bf16.msra.mxu0 %v3600_v16  ;;  %v541_v41 = vld [vmem:[#allocation1 + $0x1b] sm:$0xff]  ;;  %v17_v49 = vld [vmem:[%s4689_s0 + $0x8] sm:$0xff]  ;;  %v3631_v62 = vld [vmem:[%s4688_s1 + $0x110] sm:$0xff] }
  0x13   :  { %2161 = vmatpush.bf16.msra.mxu1 %v3608_v17  ;;  %v544_v50 = vld [vmem:[#allocation1 + $0x36] sm:$0xff]  ;;  %v542_v51 = vld [vmem:[#allocation1 + $0x24] sm:$0xff]  ;;  %v543_v53 = vld [vmem:[#allocation1 + $0x2d] sm:$0xff] }
  0x14   :  { %2174 = vmatpush.bf16.msra.mxu2 %v3616_v18  ;;  %v545_v52 = vld [vmem:[#allocation1 + $0x3f] sm:$0xff]  ;;  %v3639_v63 = vld [vmem:[%s4688_s1 + $0x150] sm:$0xff]  ;;  %v3630_v2 = vld [vmem:[%s4688_s1 + $0x108] sm:$0xff] }
  0x15   :  { %2187 = vmatpush.bf16.msra.mxu3 %v3624_v19  ;;  %547 = vst [vmem:[#allocation1] ss:$9 sm:$0xff] %v17_v49  ;;  %v3657_v57 = vld [vmem:[%s4688_s1 + $0x1e0] sm:$0xff]  ;;  %v3632_v58 = vld [vmem:[%s4688_s1 + $0x118] sm:$0xff]  ;;  %v3647_v0 = vld [vmem:[%s4688_s1 + $0x190] sm:$0xff] }
  0x16   :  { %2149 = vmatpush.bf16.msra.mxu0 %v3599_v21  ;;  %v3640_v59 = vld [vmem:[%s4688_s1 + $0x158] sm:$0xff]  ;;  %v3655_v1 = vld [vmem:[%s4688_s1 + $0x1d0] sm:$0xff]  ;;  %v3638_v3 = vld [vmem:[%s4688_s1 + $0x148] sm:$0xff] }
  0x17   :  { %2162 = vmatpush.bf16.msra.mxu1 %v3607_v22  ;;  %v3648_v60 = vld [vmem:[%s4688_s1 + $0x198] sm:$0xff]  ;;  %v3646_v4 = vld [vmem:[%s4688_s1 + $0x188] sm:$0xff]  ;;  %v3629_v6 = vld [vmem:[%s4688_s1 + $0x100] sm:$0xff] }
  0x18   :  { %2175 = vmatpush.bf16.msra.mxu2 %v3615_v23  ;;  %v3656_v61 = vld [vmem:[%s4688_s1 + $0x1d8] sm:$0xff]  ;;  %v3654_v5 = vld [vmem:[%s4688_s1 + $0x1c8] sm:$0xff]  ;;  %v3637_v7 = vld [vmem:[%s4688_s1 + $0x140] sm:$0xff] }
  0x19   :  { %2188 = vmatpush.bf16.msra.mxu3 %v3623_v24  ;;  %v3645_v8 = vld [vmem:[%s4688_s1 + $0x180] sm:$0xff]  ;;  %v3668_v10 = vld [vmem:[%s4688_s1 + $0x238] sm:$0xff]  ;;  %v3667_v14 = vld [vmem:[%s4688_s1 + $0x230] sm:$0xff] }
  0x1a   :  { %2150 = vmatpush.bf16.msra.mxu0 %v3598_v25  ;;  %v3653_v9 = vld [vmem:[%s4688_s1 + $0x1c0] sm:$0xff]  ;;  %v3676_v11 = vld [vmem:[%s4688_s1 + $0x278] sm:$0xff]  ;;  %v3675_v15 = vld [vmem:[%s4688_s1 + $0x270] sm:$0xff] }
  0x1b   :  { %2163 = vmatpush.bf16.msra.mxu1 %v3606_v26  ;;  %v3684_v12 = vld [vmem:[%s4688_s1 + $0x2b8] sm:$0xff]  ;;  %v3683_v16 = vld [vmem:[%s4688_s1 + $0x2b0] sm:$0xff]  ;;  %v3666_v18 = vld [vmem:[%s4688_s1 + $0x228] sm:$0xff] }
  0x1c   :  { %2176 = vmatpush.bf16.msra.mxu2 %v3614_v27  ;;  %v3692_v13 = vld [vmem:[%s4688_s1 + $0x2f8] sm:$0xff]  ;;  %v3691_v17 = vld [vmem:[%s4688_s1 + $0x2f0] sm:$0xff]  ;;  %v3674_v19 = vld [vmem:[%s4688_s1 + $0x268] sm:$0xff] }
  0x1d   :  { %2189 = vmatpush.bf16.msra.mxu3 %v3622_v28  ;;  %v3682_v20 = vld [vmem:[%s4688_s1 + $0x2a8] sm:$0xff]  ;;  %v3665_v22 = vld [vmem:[%s4688_s1 + $0x220] sm:$0xff]  ;;  %v3664_v26 = vld [vmem:[%s4688_s1 + $0x218] sm:$0xff] }
  0x1e   :  { %2151 = vmatpush.bf16.msra.mxu0 %v3597_v29  ;;  %v3690_v21 = vld [vmem:[%s4688_s1 + $0x2e8] sm:$0xff]  ;;  %v3673_v23 = vld [vmem:[%s4688_s1 + $0x260] sm:$0xff]  ;;  %v3672_v27 = vld [vmem:[%s4688_s1 + $0x258] sm:$0xff] }
  0x1f   :  { %2164 = vmatpush.bf16.msra.mxu1 %v3605_v30  ;;  %v3681_v24 = vld [vmem:[%s4688_s1 + $0x2a0] sm:$0xff]  ;;  %v3680_v28 = vld [vmem:[%s4688_s1 + $0x298] sm:$0xff]  ;;  %v3663_v30 = vld [vmem:[%s4688_s1 + $0x210] sm:$0xff] }
  0x20   :  { %2177 = vmatpush.bf16.msra.mxu2 %v3613_v31  ;;  %v3689_v25 = vld [vmem:[%s4688_s1 + $0x2e0] sm:$0xff]  ;;  %v3688_v29 = vld [vmem:[%s4688_s1 + $0x2d8] sm:$0xff]  ;;  %v3671_v31 = vld [vmem:[%s4688_s1 + $0x250] sm:$0xff] }
  0x21   :  { %2190 = vmatpush.bf16.msra.mxu3 %v3621_v32  ;;  %2152 = vmatmul.bf16.vlgmr.msra.gmra.mxu0 %v538_v39  ;;  %v3679_v32 = vld [vmem:[%s4688_s1 + $0x290] sm:$0xff]  ;;  %v3669_v39 = vld [vmem:[%s4688_s1 + $0x240] sm:$0xff] }
  0x22   :  { %2196 = vmatpush.bf16.msrb.mxu0 %v3636_v33  ;;  %2165 = vmatmul.bf16.vlgmr.msra.gmra.mxu1 %v539_v42  ;;  %v3687_v33 = vld [vmem:[%s4688_s1 + $0x2d0] sm:$0xff]  ;;  %v3700_v42 = vld [vmem:[%s4688_s1 + $0x338] sm:$0xff] }
  0x23   :  { %2209 = vmatpush.bf16.msrb.mxu1 %v3644_v34  ;;  %2178 = vmatmul.bf16.vlgmr.msra.gmra.mxu2 %v540_v38  ;;  %v3662_v34 = vld [vmem:[%s4688_s1 + $0x208] sm:$0xff]  ;;  %v3661_v38 = vld [vmem:[%s4688_s1 + $0x200] sm:$0xff] }
  0x24   :  { %2222 = vmatpush.bf16.msrb.mxu2 %v3652_v35  ;;  %2191 = vmatmul.bf16.vlgmr.msra.gmra.mxu3 %v541_v41  ;;  %v3670_v35 = vld [vmem:[%s4688_s1 + $0x248] sm:$0xff]  ;;  %v3685_v41 = vld [vmem:[%s4688_s1 + $0x2c0] sm:$0xff] }
  0x25   :  { %2235 = vmatpush.bf16.msrb.mxu3 %v3660_v36  ;;  %v3678_v36 = vld [vmem:[%s4688_s1 + $0x288] sm:$0xff] }
  0x26   :  { %2197 = vmatpush.bf16.msrb.mxu0 %v3635_v37  ;;  %v3686_v37 = vld [vmem:[%s4688_s1 + $0x2c8] sm:$0xff] }
  0x27   :  { %2210 = vmatpush.bf16.msrb.mxu1 %v3643_v40  ;;  %v3677_v40 = vld [vmem:[%s4688_s1 + $0x280] sm:$0xff]  ;;  %v549_v49 = vld [vmem:[#allocation1 + $0x9] sm:$0xff] }
  0x28   :  { %2223 = vmatpush.bf16.msrb.mxu2 %v3651_v43  ;;  %v3708_v43 = vld [vmem:[%s4688_s1 + $0x378] sm:$0xff] }
  0x29   :  { %2236 = vmatpush.bf16.msrb.mxu3 %v3659_v44  ;;  %v18_v44 = vld [vmem:[%s4689_s0 + $0x10] sm:$0xff] }
  0x2a   :  { %2198 = vmatpush.bf16.msrb.mxu0 %v3634_v45  ;;  %v3716_v45 = vld [vmem:[%s4688_s1 + $0x3b8] sm:$0xff] }
  0x2b   :  { %2211 = vmatpush.bf16.msrb.mxu1 %v3642_v46  ;;  %v3724_v46 = vld [vmem:[%s4688_s1 + $0x3f8] sm:$0xff] }
  0x2c   :  { %2224 = vmatpush.bf16.msrb.mxu2 %v3650_v47  ;;  %v548_v47 = vld [vmem:[#allocation1] sm:$0xff] }
  0x2d   :  { %2237 = vmatpush.bf16.msrb.mxu3 %v3658_v48  ;;  %v550_v48 = vld [vmem:[#allocation1 + $0x12] sm:$0xff] }
  0x2e   :  { %2199 = vmatpush.bf16.msrb.mxu0 %v3633_v54  ;;  %v3723_v54 = vld [vmem:[%s4688_s1 + $0x3f0] sm:$0xff] }
  0x2f   :  { %2212 = vmatpush.bf16.msrb.mxu1 %v3641_v55  ;;  %v4199_v55 = vld [vmem:[#allocation1 + $0x24] sm:$0xff] }
  0x30   :  { %2225 = vmatpush.bf16.msrb.mxu2 %v3649_v56  ;;  %v4201_v56 = vld [vmem:[#allocation1 + $0x36] sm:$0xff] }
  0x31   :  { %2238 = vmatpush.bf16.msrb.mxu3 %v3657_v57  ;;  %v4203_v57 = vld [vmem:[#allocation1 + $0x2d] sm:$0xff] }
  0x32   :  { %2200 = vmatpush.bf16.msrb.mxu0 %v3632_v58  ;;  %v4205_v58 = vld [vmem:[#allocation1 + $0x3f] sm:$0xff] }
  0x33   :  { %2213 = vmatpush.bf16.msrb.mxu1 %v3640_v59  ;;  %v3698_v59 = vld [vmem:[%s4688_s1 + $0x328] sm:$0xff] }
  0x34   :  { %2226 = vmatpush.bf16.msrb.mxu2 %v3648_v60  ;;  %v3706_v60 = vld [vmem:[%s4688_s1 + $0x368] sm:$0xff] }
  0x35   :  { %2239 = vmatpush.bf16.msrb.mxu3 %v3656_v61  ;;  %v3714_v61 = vld [vmem:[%s4688_s1 + $0x3a8] sm:$0xff] }
  0x36   :  { %2201 = vmatpush.bf16.msrb.mxu0 %v3631_v62  ;;  %v3722_v62 = vld [vmem:[%s4688_s1 + $0x3e8] sm:$0xff] }
  0x37   :  { %2214 = vmatpush.bf16.msrb.mxu1 %v3639_v63  ;;  %v3697_v63 = vld [vmem:[%s4688_s1 + $0x320] sm:$0xff] }
  0x38   :  { %2227 = vmatpush.bf16.msrb.mxu2 %v3647_v0  ;;  %v3705_v0 = vld [vmem:[%s4688_s1 + $0x360] sm:$0xff] }
  0x39   :  { %2240 = vmatpush.bf16.msrb.mxu3 %v3655_v1  ;;  %v3713_v1 = vld [vmem:[%s4688_s1 + $0x3a0] sm:$0xff] }
  0x3a   :  { %2202 = vmatpush.bf16.msrb.mxu0 %v3630_v2  ;;  %v3721_v2 = vld [vmem:[%s4688_s1 + $0x3e0] sm:$0xff] }
  0x3b   :  { %2215 = vmatpush.bf16.msrb.mxu1 %v3638_v3  ;;  %v3696_v3 = vld [vmem:[%s4688_s1 + $0x318] sm:$0xff] }
  0x3c   :  { %2228 = vmatpush.bf16.msrb.mxu2 %v3646_v4  ;;  %v3704_v4 = vld [vmem:[%s4688_s1 + $0x358] sm:$0xff] }
  0x3d   :  { %2241 = vmatpush.bf16.msrb.mxu3 %v3654_v5  ;;  %v3712_v5 = vld [vmem:[%s4688_s1 + $0x398] sm:$0xff] }
  0x3e   :  { %2203 = vmatpush.bf16.msrb.mxu0 %v3629_v6  ;;  %v3720_v6 = vld [vmem:[%s4688_s1 + $0x3d8] sm:$0xff] }
  0x3f   :  { %2216 = vmatpush.bf16.msrb.mxu1 %v3637_v7  ;;  %v3695_v7 = vld [vmem:[%s4688_s1 + $0x310] sm:$0xff] }
  0x40   :  { %2229 = vmatpush.bf16.msrb.mxu2 %v3645_v8  ;;  %v3703_v8 = vld [vmem:[%s4688_s1 + $0x350] sm:$0xff] }
  0x41   :  { %2242 = vmatpush.bf16.msrb.mxu3 %v3653_v9  ;;  %2204 = vmatmul.bf16.vlgmr.msrb.gmra.mxu0 %v542_v51  ;;  %v3699_v51 = vld [vmem:[%s4688_s1 + $0x330] sm:$0xff] }
  0x42   :  { %2248 = vmatpush.bf16.msra.mxu0 %v3668_v10  ;;  %2217 = vmatmul.bf16.vlgmr.msrb.gmra.mxu1 %v543_v53  ;;  %v3715_v53 = vld [vmem:[%s4688_s1 + $0x3b0] sm:$0xff] }
  0x43   :  { %2261 = vmatpush.bf16.msra.mxu1 %v3676_v11  ;;  %2230 = vmatmul.bf16.vlgmr.msrb.gmra.mxu2 %v544_v50  ;;  %v551_v50 = vld [vmem:[#allocation1 + $0x1b] sm:$0xff]  ;;  %v3711_v9 = vld [vmem:[%s4688_s1 + $0x390] sm:$0xff]  ;;  %v3694_v11 = vld [vmem:[%s4688_s1 + $0x308] sm:$0xff] }
  0x44   :  { %2274 = vmatpush.bf16.msra.mxu2 %v3684_v12  ;;  %2243 = vmatmul.bf16.vlgmr.msrb.gmra.mxu3 %v545_v52  ;;  %v3707_v52 = vld [vmem:[%s4688_s1 + $0x370] sm:$0xff]  ;;  %557 = vst [vmem:[#allocation1] ss:$9 sm:$0xff] %v18_v44  ;;  %v3702_v12 = vld [vmem:[%s4688_s1 + $0x348] sm:$0xff] }
  0x45   :  { %2287 = vmatpush.bf16.msra.mxu3 %v3692_v13  ;;  %v3719_v10 = vld [vmem:[%s4688_s1 + $0x3d0] sm:$0xff]  ;;  %v3710_v13 = vld [vmem:[%s4688_s1 + $0x388] sm:$0xff] }
  0x46   :  { %2249 = vmatpush.bf16.msra.mxu0 %v3667_v14  ;;  %v3718_v14 = vld [vmem:[%s4688_s1 + $0x3c8] sm:$0xff] }
  0x47   :  { %2262 = vmatpush.bf16.msra.mxu1 %v3675_v15  ;;  %v3693_v15 = vld [vmem:[%s4688_s1 + $0x300] sm:$0xff]  ;;  %v3734_v44 = vld [vmem:[%s4688_s1 + $0x448] sm:$0xff] }
  0x48   :  { %2275 = vmatpush.bf16.msra.mxu2 %v3683_v16  ;;  %v3701_v16 = vld [vmem:[%s4688_s1 + $0x340] sm:$0xff] }
  0x49   :  { %2288 = vmatpush.bf16.msra.mxu3 %v3691_v17  ;;  %v3709_v17 = vld [vmem:[%s4688_s1 + $0x380] sm:$0xff] }
  0x4a   :  { %2250 = vmatpush.bf16.msra.mxu0 %v3666_v18  ;;  %v3717_v18 = vld [vmem:[%s4688_s1 + $0x3c0] sm:$0xff] }
  0x4b   :  { %2263 = vmatpush.bf16.msra.mxu1 %v3674_v19  ;;  %v3732_v19 = vld [vmem:[%s4688_s1 + $0x438] sm:$0xff] }
  0x4c   :  { %2276 = vmatpush.bf16.msra.mxu2 %v3682_v20  ;;  %v3740_v20 = vld [vmem:[%s4688_s1 + $0x478] sm:$0xff] }
  0x4d   :  { %2289 = vmatpush.bf16.msra.mxu3 %v3690_v21  ;;  %v3748_v21 = vld [vmem:[%s4688_s1 + $0x4b8] sm:$0xff] }
  0x4e   :  { %2251 = vmatpush.bf16.msra.mxu0 %v3665_v22  ;;  %v3756_v22 = vld [vmem:[%s4688_s1 + $0x4f8] sm:$0xff] }
  0x4f   :  { %2264 = vmatpush.bf16.msra.mxu1 %v3673_v23  ;;  %v3731_v23 = vld [vmem:[%s4688_s1 + $0x430] sm:$0xff] }
  0x50   :  { %2277 = vmatpush.bf16.msra.mxu2 %v3681_v24  ;;  %v3739_v24 = vld [vmem:[%s4688_s1 + $0x470] sm:$0xff] }
  0x51   :  { %2290 = vmatpush.bf16.msra.mxu3 %v3689_v25  ;;  %v3747_v25 = vld [vmem:[%s4688_s1 + $0x4b0] sm:$0xff] }
  0x52   :  { %2252 = vmatpush.bf16.msra.mxu0 %v3664_v26  ;;  %v3755_v26 = vld [vmem:[%s4688_s1 + $0x4f0] sm:$0xff] }
  0x53   :  { %2265 = vmatpush.bf16.msra.mxu1 %v3672_v27  ;;  %v3730_v27 = vld [vmem:[%s4688_s1 + $0x428] sm:$0xff] }
  0x54   :  { %2278 = vmatpush.bf16.msra.mxu2 %v3680_v28  ;;  %v3738_v28 = vld [vmem:[%s4688_s1 + $0x468] sm:$0xff] }
  0x55   :  { %2291 = vmatpush.bf16.msra.mxu3 %v3688_v29  ;;  %v3746_v29 = vld [vmem:[%s4688_s1 + $0x4a8] sm:$0xff] }
  0x56   :  { %2253 = vmatpush.bf16.msra.mxu0 %v3663_v30  ;;  %v3754_v30 = vld [vmem:[%s4688_s1 + $0x4e8] sm:$0xff] }
  0x57   :  { %2266 = vmatpush.bf16.msra.mxu1 %v3671_v31  ;;  %v3729_v31 = vld [vmem:[%s4688_s1 + $0x420] sm:$0xff] }
  0x58   :  { %2279 = vmatpush.bf16.msra.mxu2 %v3679_v32  ;;  %v3737_v32 = vld [vmem:[%s4688_s1 + $0x460] sm:$0xff] }
  0x59   :  { %2292 = vmatpush.bf16.msra.mxu3 %v3687_v33  ;;  %v3745_v33 = vld [vmem:[%s4688_s1 + $0x4a0] sm:$0xff] }
  0x5a   :  { %2254 = vmatpush.bf16.msra.mxu0 %v3662_v34  ;;  %v3753_v34 = vld [vmem:[%s4688_s1 + $0x4e0] sm:$0xff] }
  0x5b   :  { %2267 = vmatpush.bf16.msra.mxu1 %v3670_v35  ;;  %v3728_v35 = vld [vmem:[%s4688_s1 + $0x418] sm:$0xff] }
  0x5c   :  { %2280 = vmatpush.bf16.msra.mxu2 %v3678_v36  ;;  %v3736_v36 = vld [vmem:[%s4688_s1 + $0x458] sm:$0xff] }
  0x5d   :  { %2293 = vmatpush.bf16.msra.mxu3 %v3686_v37  ;;  %v3744_v37 = vld [vmem:[%s4688_s1 + $0x498] sm:$0xff] }
  0x5e   :  { %2255 = vmatpush.bf16.msra.mxu0 %v3661_v38  ;;  %v3752_v38 = vld [vmem:[%s4688_s1 + $0x4d8] sm:$0xff] }
  0x5f   :  { %2268 = vmatpush.bf16.msra.mxu1 %v3669_v39  ;;  %v3727_v39 = vld [vmem:[%s4688_s1 + $0x410] sm:$0xff] }
  0x60   :  { %2281 = vmatpush.bf16.msra.mxu2 %v3677_v40  ;;  %v3735_v40 = vld [vmem:[%s4688_s1 + $0x450] sm:$0xff] }
  0x61   :  { %2294 = vmatpush.bf16.msra.mxu3 %v3685_v41  ;;  %2256 = vmatmul.bf16.vlgmr.msra.gmra.mxu0 %v548_v47  ;;  %v3743_v41 = vld [vmem:[%s4688_s1 + $0x490] sm:$0xff]  ;;  %v3725_v47 = vld [vmem:[%s4688_s1 + $0x400] sm:$0xff] }
  0x62   :  { %2300 = vmatpush.bf16.msrb.mxu0 %v3700_v42  ;;  %2269 = vmatmul.bf16.vlgmr.msra.gmra.mxu1 %v549_v49  ;;  %v3751_v42 = vld [vmem:[%s4688_s1 + $0x4d0] sm:$0xff]  ;;  %v3741_v49 = vld [vmem:[%s4688_s1 + $0x480] sm:$0xff] }
  0x63   :  { %2313 = vmatpush.bf16.msrb.mxu1 %v3708_v43  ;;  %2282 = vmatmul.bf16.vlgmr.msra.gmra.mxu2 %v550_v48  ;;  %v3726_v43 = vld [vmem:[%s4688_s1 + $0x408] sm:$0xff]  ;;  %v3733_v48 = vld [vmem:[%s4688_s1 + $0x440] sm:$0xff] }
  0x64   :  { %2326 = vmatpush.bf16.msrb.mxu2 %v3716_v45  ;;  %2295 = vmatmul.bf16.vlgmr.msra.gmra.mxu3 %v551_v50  ;;  %v3742_v45 = vld [vmem:[%s4688_s1 + $0x488] sm:$0xff]  ;;  %v3749_v50 = vld [vmem:[%s4688_s1 + $0x4c0] sm:$0xff] }
  0x65   :  { %2339 = vmatpush.bf16.msrb.mxu3 %v3724_v46  ;;  %v3750_v46 = vld [vmem:[%s4688_s1 + $0x4c8] sm:$0xff] }
  0x66   :  { %2301 = vmatpush.bf16.msrb.mxu0 %v3699_v51  ;;  %v3764_v51 = vld [vmem:[%s4688_s1 + $0x538] sm:$0xff] }
  0x67   :  { %2314 = vmatpush.bf16.msrb.mxu1 %v3707_v52  ;;  %v3772_v52 = vld [vmem:[%s4688_s1 + $0x578] sm:$0xff] }
  0x68   :  { %2327 = vmatpush.bf16.msrb.mxu2 %v3715_v53  ;;  %v19_v53 = vld [vmem:[%s4689_s0 + $0x18] sm:$0xff] }
  0x69   :  { %2340 = vmatpush.bf16.msrb.mxu3 %v3723_v54  ;;  %v3780_v54 = vld [vmem:[%s4688_s1 + $0x5b8] sm:$0xff] }
  0x6a   :  { %2302 = vmatpush.bf16.msrb.mxu0 %v3698_v59  ;;  %v561_v59 = vld [vmem:[#allocation1 + $0x1b] sm:$0xff] }
  0x6b   :  { %2315 = vmatpush.bf16.msrb.mxu1 %v3706_v60  ;;  %v3763_v60 = vld [vmem:[%s4688_s1 + $0x530] sm:$0xff] }
  0x6c   :  { %2328 = vmatpush.bf16.msrb.mxu2 %v3714_v61  ;;  %v3771_v61 = vld [vmem:[%s4688_s1 + $0x570] sm:$0xff] }
  0x6d   :  { %2341 = vmatpush.bf16.msrb.mxu3 %v3722_v62  ;;  %v3779_v62 = vld [vmem:[%s4688_s1 + $0x5b0] sm:$0xff] }
  0x6e   :  { %2303 = vmatpush.bf16.msrb.mxu0 %v3697_v63  ;;  %v3787_v63 = vld [vmem:[%s4688_s1 + $0x5f0] sm:$0xff] }
  0x6f   :  { %2316 = vmatpush.bf16.msrb.mxu1 %v3705_v0  ;;  %v4406_v0 = vld [vmem:[#allocation1 + $0x24] sm:$0xff] }
  0x70   :  { %2329 = vmatpush.bf16.msrb.mxu2 %v3713_v1  ;;  %v8_v1 = vstv %s4690_s2 }
  0x71   :  { %2342 = vmatpush.bf16.msrb.mxu3 %v3721_v2  ;;  %v4411_v2 = vld [vmem:[#allocation1 + $0x36] sm:$0xff]  ;;  %9 = vst [vmem:[#allocation2] sm:$0x1] %v8_v1 }
  0x72   :  { %2304 = vmatpush.bf16.msrb.mxu0 %v3696_v3  ;;  %v4413_v3 = vld [vmem:[#allocation1 + $0x2d] sm:$0xff]  ;;  %v3816_v1 = vld [vmem:[%s4688_s1 + $0x6d8] sm:$0xff] }
  0x73   :  { %2317 = vmatpush.bf16.msrb.mxu1 %v3704_v4  ;;  %v4415_v4 = vld [vmem:[#allocation1 + $0x3f] sm:$0xff] }
  0x74   :  { %2330 = vmatpush.bf16.msrb.mxu2 %v3712_v5  ;;  %v3762_v5 = vld [vmem:[%s4688_s1 + $0x528] sm:$0xff] }
  0x75   :  { %2343 = vmatpush.bf16.msrb.mxu3 %v3720_v6  ;;  %v3770_v6 = vld [vmem:[%s4688_s1 + $0x568] sm:$0xff] }
  0x76   :  { %2305 = vmatpush.bf16.msrb.mxu0 %v3695_v7  ;;  %v3778_v7 = vld [vmem:[%s4688_s1 + $0x5a8] sm:$0xff] }
  0x77   :  { %2318 = vmatpush.bf16.msrb.mxu1 %v3703_v8  ;;  %v3786_v8 = vld [vmem:[%s4688_s1 + $0x5e8] sm:$0xff] }
  0x78   :  { %2331 = vmatpush.bf16.msrb.mxu2 %v3711_v9  ;;  %v3761_v9 = vld [vmem:[%s4688_s1 + $0x520] sm:$0xff] }
  0x79   :  { %2344 = vmatpush.bf16.msrb.mxu3 %v3719_v10 }
  0x7a   :  { %2306 = vmatpush.bf16.msrb.mxu0 %v3694_v11  ;;  %v3769_v11 = vld [vmem:[%s4688_s1 + $0x560] sm:$0xff] }
  0x7b   :  { %2319 = vmatpush.bf16.msrb.mxu1 %v3702_v12  ;;  %v3853_v12 = vld [vmem:[#allocation2] ss:$0 sm:$0xff] }
  0x7c   :  { %2332 = vmatpush.bf16.msrb.mxu2 %v3710_v13 }
  0x7d   :  { %2345 = vmatpush.bf16.msrb.mxu3 %v3718_v14  ;;  %v3777_v14 = vld [vmem:[%s4688_s1 + $0x5a0] sm:$0xff] }
  0x7e   :  { %2307 = vmatpush.bf16.msrb.mxu0 %v3693_v15  ;;  %v3785_v15 = vld [vmem:[%s4688_s1 + $0x5e0] sm:$0xff] }
  0x7f   :  { %2320 = vmatpush.bf16.msrb.mxu1 %v3701_v16 }
  0x80   :  { %2333 = vmatpush.bf16.msrb.mxu2 %v3709_v17  ;;  %v3760_v17 = vld [vmem:[%s4688_s1 + $0x518] sm:$0xff] }
  0x81   :  { %2346 = vmatpush.bf16.msrb.mxu3 %v3717_v18  ;;  %2308 = vmatmul.bf16.vlgmr.msrb.gmra.mxu0 %v4199_v55  ;;  %v3788_v55 = vld [vmem:[%s4688_s1 + $0x5f8] sm:$0xff] }
  0x82   :  { %2352 = vmatpush.bf16.msra.mxu0 %v3732_v19  ;;  %2321 = vmatmul.bf16.vlgmr.msrb.gmra.mxu1 %v4203_v57  ;;  %v560_v57 = vld [vmem:[#allocation1 + $0x12] sm:$0xff] }
  0x83   :  { %2365 = vmatpush.bf16.msra.mxu1 %v3740_v20  ;;  %2334 = vmatmul.bf16.vlgmr.msrb.gmra.mxu2 %v4201_v56  ;;  %v558_v56 = vld [vmem:[#allocation1] sm:$0xff]  ;;  %v3768_v18 = vld [vmem:[%s4688_s1 + $0x558] sm:$0xff] }
  0x84   :  { %2378 = vmatpush.bf16.msra.mxu2 %v3748_v21  ;;  %2347 = vmatmul.bf16.vlgmr.msrb.gmra.mxu3 %v4205_v58  ;;  %v559_v58 = vld [vmem:[#allocation1 + $0x9] sm:$0xff]  ;;  %v3776_v20 = vld [vmem:[%s4688_s1 + $0x598] sm:$0xff] }
  0x85   :  { %2391 = vmatpush.bf16.msra.mxu3 %v3756_v22  ;;  %567 = vst [vmem:[#allocation1] ss:$9 sm:$0xff] %v19_v53  ;;  %v3784_v21 = vld [vmem:[%s4688_s1 + $0x5d8] sm:$0xff]  ;;  %v3818_v53 = vld [vmem:[%s4688_s1 + $0x6e8] sm:$0xff] }
  0x86   :  { %2353 = vmatpush.bf16.msra.mxu0 %v3731_v23 }
  0x87   :  { %2366 = vmatpush.bf16.msra.mxu1 %v3739_v24 }
  0x88   :  { %2379 = vmatpush.bf16.msra.mxu2 %v3747_v25 }
  0x89   :  { %2392 = vmatpush.bf16.msra.mxu3 %v3755_v26  ;;  %v3759_v26 = vld [vmem:[%s4688_s1 + $0x510] sm:$0xff] }
  0x8a   :  { %2354 = vmatpush.bf16.msra.mxu0 %v3730_v27  ;;  %v3767_v27 = vld [vmem:[%s4688_s1 + $0x550] sm:$0xff] }
  0x8b   :  { %2367 = vmatpush.bf16.msra.mxu1 %v3738_v28 }
  0x8c   :  { %2380 = vmatpush.bf16.msra.mxu2 %v3746_v29 }
  0x8d   :  { %2393 = vmatpush.bf16.msra.mxu3 %v3754_v30  ;;  %v3775_v30 = vld [vmem:[%s4688_s1 + $0x590] sm:$0xff] }
  0x8e   :  { %2355 = vmatpush.bf16.msra.mxu0 %v3729_v31  ;;  %v3783_v31 = vld [vmem:[%s4688_s1 + $0x5d0] sm:$0xff] }
  0x8f   :  { %2368 = vmatpush.bf16.msra.mxu1 %v3737_v32  ;;  %v3758_v32 = vld [vmem:[%s4688_s1 + $0x508] sm:$0xff] }
  0x90   :  { %2381 = vmatpush.bf16.msra.mxu2 %v3745_v33  ;;  %v3766_v33 = vld [vmem:[%s4688_s1 + $0x548] sm:$0xff] }
  0x91   :  { %2394 = vmatpush.bf16.msra.mxu3 %v3753_v34  ;;  %v3774_v34 = vld [vmem:[%s4688_s1 + $0x588] sm:$0xff] }
  0x92   :  { %2356 = vmatpush.bf16.msra.mxu0 %v3728_v35  ;;  %v3782_v35 = vld [vmem:[%s4688_s1 + $0x5c8] sm:$0xff] }
  0x93   :  { %2369 = vmatpush.bf16.msra.mxu1 %v3736_v36 }
  0x94   :  { %2382 = vmatpush.bf16.msra.mxu2 %v3744_v37 }
  0x95   :  { %2395 = vmatpush.bf16.msra.mxu3 %v3752_v38  ;;  %v3757_v38 = vld [vmem:[%s4688_s1 + $0x500] sm:$0xff] }
  0x96   :  { %2357 = vmatpush.bf16.msra.mxu0 %v3727_v39  ;;  %v3765_v39 = vld [vmem:[%s4688_s1 + $0x540] sm:$0xff] }
  0x97   :  { %2370 = vmatpush.bf16.msra.mxu1 %v3735_v40  ;;  %v3773_v40 = vld [vmem:[%s4688_s1 + $0x580] sm:$0xff] }
  0x98   :  { %2383 = vmatpush.bf16.msra.mxu2 %v3743_v41  ;;  %v3781_v41 = vld [vmem:[%s4688_s1 + $0x5c0] sm:$0xff] }
  0x99   :  { %2396 = vmatpush.bf16.msra.mxu3 %v3751_v42  ;;  %v3796_v42 = vld [vmem:[%s4688_s1 + $0x638] sm:$0xff] }
  0x9a   :  { %2358 = vmatpush.bf16.msra.mxu0 %v3726_v43  ;;  %v3804_v43 = vld [vmem:[%s4688_s1 + $0x678] sm:$0xff] }
  0x9b   :  { %2371 = vmatpush.bf16.msra.mxu1 %v3734_v44  ;;  %v3812_v44 = vld [vmem:[%s4688_s1 + $0x6b8] sm:$0xff] }
  0x9c   :  { %2384 = vmatpush.bf16.msra.mxu2 %v3742_v45  ;;  %v3820_v45 = vld [vmem:[%s4688_s1 + $0x6f8] sm:$0xff] }
  0x9d   :  { %2397 = vmatpush.bf16.msra.mxu3 %v3750_v46  ;;  %v3795_v46 = vld [vmem:[%s4688_s1 + $0x630] sm:$0xff] }
  0x9e   :  { %2359 = vmatpush.bf16.msra.mxu0 %v3725_v47  ;;  %v2153_v10 = vpop.f32.mrf.mxu0  ;;  %v3803_v47 = vld [vmem:[%s4688_s1 + $0x670] sm:$0xff] }
  0x9f   :  { %2372 = vmatpush.bf16.msra.mxu1 %v3733_v48  ;;  %v2166_v13 = vpop.f32.mrf.mxu1  ;;  %v2154_v16 = vadd.f32 %v3853_v12, %v2153_v10  ;;  %v3811_v48 = vld [vmem:[%s4688_s1 + $0x6b0] sm:$0xff]  ;;  %v3790_v12 = vld [vmem:[%s4688_s1 + $0x608] sm:$0xff] }
  0xa0   :  { %2385 = vmatpush.bf16.msra.mxu2 %v3741_v49  ;;  %v3819_v49 = vld [vmem:[%s4688_s1 + $0x6f0] sm:$0xff] }
  0xa1   :  { %2398 = vmatpush.bf16.msra.mxu3 %v3749_v50  ;;  %2360 = vmatmul.bf16.vlgmr.msra.gmra.mxu0 %v558_v56  ;;  %v2167_v19 = vadd.f32 %v2166_v13, %v2154_v16  ;;  %v3794_v50 = vld [vmem:[%s4688_s1 + $0x628] sm:$0xff]  ;;  %v3801_v56 = vld [vmem:[%s4688_s1 + $0x660] sm:$0xff]  ;;  %v3807_v10 = vld [vmem:[%s4688_s1 + $0x690] sm:$0xff] }
  0xa2   :  { %2404 = vmatpush.bf16.msrb.mxu0 %v3764_v51  ;;  %2373 = vmatmul.bf16.vlgmr.msra.gmra.mxu1 %v559_v58  ;;  %v3802_v51 = vld [vmem:[%s4688_s1 + $0x668] sm:$0xff] }
  0xa3   :  { %2417 = vmatpush.bf16.msrb.mxu1 %v3772_v52  ;;  %2386 = vmatmul.bf16.vlgmr.msra.gmra.mxu2 %v560_v57  ;;  %v3810_v52 = vld [vmem:[%s4688_s1 + $0x6a8] sm:$0xff] }
  0xa4   :  { %2430 = vmatpush.bf16.msrb.mxu2 %v3780_v54  ;;  %2399 = vmatmul.bf16.vlgmr.msra.gmra.mxu3 %v561_v59  ;;  %v3809_v59 = vld [vmem:[%s4688_s1 + $0x6a0] sm:$0xff]  ;;  %v3798_v13 = vld [vmem:[%s4688_s1 + $0x648] sm:$0xff] }
  0xa5   :  { %2443 = vmatpush.bf16.msrb.mxu3 %v3788_v55  ;;  %v3793_v55 = vld [vmem:[%s4688_s1 + $0x620] sm:$0xff] }
  0xa6   :  { %2405 = vmatpush.bf16.msrb.mxu0 %v3763_v60  ;;  %v2179_v22 = vpop.f32.mrf.mxu2  ;;  %v2155_v25 = vpop.f32.mrf.mxu0  ;;  %v3817_v60 = vld [vmem:[%s4688_s1 + $0x6e0] sm:$0xff] }
  0xa7   :  { %2418 = vmatpush.bf16.msrb.mxu1 %v3771_v61  ;;  %v2180_v23 = vadd.f32 %v2179_v22, %v2167_v19  ;;  %v2192_v24 = vpop.f32.mrf.mxu3  ;;  %v2168_v29 = vpop.f32.mrf.mxu1  ;;  %v3797_v19 = vld [vmem:[%s4688_s1 + $0x640] sm:$0xff]  ;;  %v3828_v22 = vld [vmem:[%s4688_s1 + $0x738] sm:$0xff] }
  0xa8   :  { %2431 = vmatpush.bf16.msrb.mxu2 %v3779_v62  ;;  %v3792_v62 = vld [vmem:[%s4688_s1 + $0x618] sm:$0xff] }
  0xa9   :  { %2444 = vmatpush.bf16.msrb.mxu3 %v3787_v63  ;;  %v2193_v28 = vadd.f32 %v2192_v24, %v2180_v23  ;;  %v3800_v63 = vld [vmem:[%s4688_s1 + $0x658] sm:$0xff] }
  0xaa   :  { %2406 = vmatpush.bf16.msrb.mxu0 %v3762_v5  ;;  %v3836_v23 = vld [vmem:[%s4688_s1 + $0x778] sm:$0xff] }
  0xab   :  { %2419 = vmatpush.bf16.msrb.mxu1 %v3770_v6  ;;  %v3791_v6 = vld [vmem:[%s4688_s1 + $0x610] sm:$0xff]  ;;  %v3844_v24 = vld [vmem:[%s4688_s1 + $0x7b8] sm:$0xff] }
  0xac   :  { %2432 = vmatpush.bf16.msrb.mxu2 %v3778_v7  ;;  %v3799_v7 = vld [vmem:[%s4688_s1 + $0x650] sm:$0xff]  ;;  %v3852_v25 = vld [vmem:[%s4688_s1 + $0x7f8] sm:$0xff] }
  0xad   :  { %2445 = vmatpush.bf16.msrb.mxu3 %v3786_v8  ;;  %v571_v29 = vld [vmem:[#allocation1 + $0x1b] sm:$0xff] }
  0xae   :  { %2407 = vmatpush.bf16.msrb.mxu0 %v3761_v9  ;;  %v2181_v36 = vpop.f32.mrf.mxu2 }
  0xaf   :  { %2420 = vmatpush.bf16.msrb.mxu1 %v3769_v11  ;;  %v2194_v37 = vpop.f32.mrf.mxu3  ;;  %v3815_v11 = vld [vmem:[%s4688_s1 + $0x6d0] sm:$0xff]  ;;  %v3842_v36 = vld [vmem:[%s4688_s1 + $0x7a8] sm:$0xff] }
  0xb0   :  { %2433 = vmatpush.bf16.msrb.mxu2 %v3777_v14  ;;  %v3806_v14 = vld [vmem:[%s4688_s1 + $0x688] sm:$0xff] }
  0xb1   :  { %2446 = vmatpush.bf16.msrb.mxu3 %v3785_v15  ;;  %v3814_v15 = vld [vmem:[%s4688_s1 + $0x6c8] sm:$0xff] }
  0xb2   :  { %2408 = vmatpush.bf16.msrb.mxu0 %v3760_v17  ;;  %v3850_v37 = vld [vmem:[%s4688_s1 + $0x7e8] sm:$0xff] }
  0xb3   :  { %2421 = vmatpush.bf16.msrb.mxu1 %v3768_v18  ;;  %v3789_v18 = vld [vmem:[%s4688_s1 + $0x600] sm:$0xff] }
  0xb4   :  { %2434 = vmatpush.bf16.msrb.mxu2 %v3776_v20  ;;  %v3805_v20 = vld [vmem:[%s4688_s1 + $0x680] sm:$0xff] }
  0xb5   :  { %2447 = vmatpush.bf16.msrb.mxu3 %v3784_v21  ;;  %v3813_v21 = vld [vmem:[%s4688_s1 + $0x6c0] sm:$0xff] }
  0xb6   :  { %2409 = vmatpush.bf16.msrb.mxu0 %v3759_v26  ;;  %v568_v26 = vld [vmem:[#allocation1] sm:$0xff] }
  0xb7   :  { %2422 = vmatpush.bf16.msrb.mxu1 %v3767_v27  ;;  %v570_v27 = vld [vmem:[#allocation1 + $0x12] sm:$0xff] }
  0xb8   :  { %2435 = vmatpush.bf16.msrb.mxu2 %v3775_v30  ;;  %v3827_v30 = vld [vmem:[%s4688_s1 + $0x730] sm:$0xff] }
  0xb9   :  { %2448 = vmatpush.bf16.msrb.mxu3 %v3783_v31  ;;  %v3835_v31 = vld [vmem:[%s4688_s1 + $0x770] sm:$0xff] }
  0xba   :  { %2410 = vmatpush.bf16.msrb.mxu0 %v3758_v32  ;;  %v3843_v32 = vld [vmem:[%s4688_s1 + $0x7b0] sm:$0xff] }
  0xbb   :  { %2423 = vmatpush.bf16.msrb.mxu1 %v3766_v33  ;;  %v3851_v33 = vld [vmem:[%s4688_s1 + $0x7f0] sm:$0xff] }
  0xbc   :  { %2436 = vmatpush.bf16.msrb.mxu2 %v3774_v34  ;;  %v3826_v34 = vld [vmem:[%s4688_s1 + $0x728] sm:$0xff] }
  0xbd   :  { %2449 = vmatpush.bf16.msrb.mxu3 %v3782_v35  ;;  %v3834_v35 = vld [vmem:[%s4688_s1 + $0x768] sm:$0xff] }
  0xbe   :  { %2411 = vmatpush.bf16.msrb.mxu0 %v3757_v38  ;;  %v2205_v54 = vpop.f32.mrf.mxu0 }
  0xbf   :  { %2424 = vmatpush.bf16.msrb.mxu1 %v3765_v39  ;;  %v2206_v57 = vadd.f32 %v2205_v54, %v2193_v28  ;;  %v2218_v58 = vpop.f32.mrf.mxu1  ;;  %v569_v28 = vld [vmem:[#allocation1 + $0x9] sm:$0xff] }
  0xc0   :  { %2437 = vmatpush.bf16.msrb.mxu2 %v3773_v40  ;;  %v3825_v40 = vld [vmem:[%s4688_s1 + $0x720] sm:$0xff] }
  0xc1   :  { %2450 = vmatpush.bf16.msrb.mxu3 %v3781_v41  ;;  %2412 = vmatmul.bf16.vlgmr.msrb.gmra.mxu0 %v4406_v0  ;;  %v2219_v61 = vadd.f32 %v2218_v58, %v2206_v57  ;;  %v3808_v0 = vld [vmem:[%s4688_s1 + $0x698] sm:$0xff]  ;;  %v3833_v41 = vld [vmem:[%s4688_s1 + $0x760] sm:$0xff]  ;;  %v3839_v58 = vld [vmem:[%s4688_s1 + $0x790] sm:$0xff] }
  0xc2   :  { %2456 = vmatpush.bf16.msra.mxu0 %v3796_v42  ;;  %2425 = vmatmul.bf16.vlgmr.msrb.gmra.mxu1 %v4413_v3 }
  0xc3   :  { %2469 = vmatpush.bf16.msra.mxu1 %v3804_v43  ;;  %2438 = vmatmul.bf16.vlgmr.msrb.gmra.mxu2 %v4411_v2  ;;  %v3841_v43 = vld [vmem:[%s4688_s1 + $0x7a0] sm:$0xff] }
  0xc4   :  { %2482 = vmatpush.bf16.msra.mxu2 %v3812_v44  ;;  %2451 = vmatmul.bf16.vlgmr.msrb.gmra.mxu3 %v4415_v4  ;;  %v3849_v44 = vld [vmem:[%s4688_s1 + $0x7e0] sm:$0xff] }
  0xc5   :  { %2495 = vmatpush.bf16.msra.mxu3 %v3820_v45 }
  0xc6   :  { %2457 = vmatpush.bf16.msra.mxu0 %v3795_v46  ;;  %v2231_v2 = vpop.f32.mrf.mxu2  ;;  %v2207_v5 = vpop.f32.mrf.mxu0  ;;  %v3824_v46 = vld [vmem:[%s4688_s1 + $0x718] sm:$0xff] }
  0xc7   :  { %2470 = vmatpush.bf16.msra.mxu1 %v3803_v47  ;;  %v2232_v3 = vadd.f32 %v2231_v2, %v2219_v61  ;;  %v2244_v4 = vpop.f32.mrf.mxu3  ;;  %v2220_v9 = vpop.f32.mrf.mxu1  ;;  %v3832_v47 = vld [vmem:[%s4688_s1 + $0x758] sm:$0xff]  ;;  %v3830_v61 = vld [vmem:[%s4688_s1 + $0x748] sm:$0xff]  ;;  %v3821_v2 = vld [vmem:[%s4688_s1 + $0x700] sm:$0xff] }
  0xc8   :  { %2483 = vmatpush.bf16.msra.mxu2 %v3811_v48  ;;  %v3840_v48 = vld [vmem:[%s4688_s1 + $0x798] sm:$0xff]  ;;  %v3845_v5 = vld [vmem:[%s4688_s1 + $0x7c0] sm:$0xff] }
  0xc9   :  { %2496 = vmatpush.bf16.msra.mxu3 %v3819_v49  ;;  %v2245_v8 = vadd.f32 %v2244_v4, %v2232_v3  ;;  %v3848_v49 = vld [vmem:[%s4688_s1 + $0x7d8] sm:$0xff]  ;;  %v3829_v3 = vld [vmem:[%s4688_s1 + $0x740] sm:$0xff] }
  0xca   :  { %2458 = vmatpush.bf16.msra.mxu0 %v3794_v50  ;;  %v3837_v4 = vld [vmem:[%s4688_s1 + $0x780] sm:$0xff] }
  0xcb   :  { %2471 = vmatpush.bf16.msra.mxu1 %v3802_v51  ;;  %v575_v9 = vld [vmem:[#allocation1 + $0x3f] sm:$0xff] }
  0xcc   :  { %2484 = vmatpush.bf16.msra.mxu2 %v3810_v52 }
  0xcd   :  { %2497 = vmatpush.bf16.msra.mxu3 %v3818_v53 }
  0xce   :  { %2459 = vmatpush.bf16.msra.mxu0 %v3793_v55  ;;  %v2233_v16 = vpop.f32.mrf.mxu2  ;;  %v3823_v55 = vld [vmem:[%s4688_s1 + $0x710] sm:$0xff] }
  0xcf   :  { %2472 = vmatpush.bf16.msra.mxu1 %v3801_v56  ;;  %v2246_v17 = vpop.f32.mrf.mxu3  ;;  %v3831_v56 = vld [vmem:[%s4688_s1 + $0x750] sm:$0xff] }
  0xd0   :  { %2485 = vmatpush.bf16.msra.mxu2 %v3809_v59  ;;  %v3847_v59 = vld [vmem:[%s4688_s1 + $0x7d0] sm:$0xff] }
  0xd1   :  { %2498 = vmatpush.bf16.msra.mxu3 %v3817_v60  ;;  %v3822_v60 = vld [vmem:[%s4688_s1 + $0x708] sm:$0xff] }
  0xd2   :  { %2460 = vmatpush.bf16.msra.mxu0 %v3792_v62  ;;  %v3838_v62 = vld [vmem:[%s4688_s1 + $0x788] sm:$0xff] }
  0xd3   :  { %2473 = vmatpush.bf16.msra.mxu1 %v3800_v63  ;;  %v3846_v63 = vld [vmem:[%s4688_s1 + $0x7c8] sm:$0xff] }
  0xd4   :  { %2486 = vmatpush.bf16.msra.mxu2 %v3808_v0 }
  0xd5   :  { %2499 = vmatpush.bf16.msra.mxu3 %v3816_v1 }
  0xd6   :  { %2461 = vmatpush.bf16.msra.mxu0 %v3791_v6  ;;  %v572_v6 = vld [vmem:[#allocation1 + $0x24] sm:$0xff] }
  0xd7   :  { %2474 = vmatpush.bf16.msra.mxu1 %v3799_v7  ;;  %v573_v7 = vld [vmem:[#allocation1 + $0x2d] sm:$0xff] }
  0xd8   :  { %2487 = vmatpush.bf16.msra.mxu2 %v3807_v10 }
  0xd9   :  { %2500 = vmatpush.bf16.msra.mxu3 %v3815_v11 }
  0xda   :  { %2462 = vmatpush.bf16.msra.mxu0 %v3790_v12 }
  0xdb   :  { %2475 = vmatpush.bf16.msra.mxu1 %v3798_v13 }
  0xdc   :  { %2488 = vmatpush.bf16.msra.mxu2 %v3806_v14 }
  0xdd   :  { %2501 = vmatpush.bf16.msra.mxu3 %v3814_v15 }
  0xde   :  { %2463 = vmatpush.bf16.msra.mxu0 %v3789_v18  ;;  %v2257_v38 = vpop.f32.mrf.mxu0 }
  0xdf   :  { %2476 = vmatpush.bf16.msra.mxu1 %v3797_v19  ;;  %v2258_v39 = vadd.f32 %v2257_v38, %v2245_v8  ;;  %v2270_v42 = vpop.f32.mrf.mxu1  ;;  %v574_v8 = vld [vmem:[#allocation1 + $0x36] sm:$0xff] }
  0xe0   :  { %2489 = vmatpush.bf16.msra.mxu2 %v3805_v20 }
  0xe1   :  { %2502 = vmatpush.bf16.msra.mxu3 %v3813_v21  ;;  %2464 = vmatmul.bf16.vlgmr.msra.gmra.mxu0 %v568_v26  ;;  %v2271_v45 = vadd.f32 %v2270_v42, %v2258_v39 }
  0xe2   :  { %2508 = vmatpush.bf16.msrb.mxu0 %v3828_v22  ;;  %2477 = vmatmul.bf16.vlgmr.msra.gmra.mxu1 %v569_v28 }
  0xe3   :  { %2521 = vmatpush.bf16.msrb.mxu1 %v3836_v23  ;;  %2490 = vmatmul.bf16.vlgmr.msra.gmra.mxu2 %v570_v27 }
  0xe4   :  { %2534 = vmatpush.bf16.msrb.mxu2 %v3844_v24  ;;  %2503 = vmatmul.bf16.vlgmr.msra.gmra.mxu3 %v571_v29 }
  0xe5   :  { %2547 = vmatpush.bf16.msrb.mxu3 %v3852_v25 }
  0xe6   :  { %2509 = vmatpush.bf16.msrb.mxu0 %v3827_v30  ;;  %v2283_v50 = vpop.f32.mrf.mxu2  ;;  %v2259_v53 = vpop.f32.mrf.mxu0 }
  0xe7   :  { %2522 = vmatpush.bf16.msrb.mxu1 %v3835_v31  ;;  %v2284_v51 = vadd.f32 %v2283_v50, %v2271_v45  ;;  %v2296_v52 = vpop.f32.mrf.mxu3  ;;  %v2272_v57 = vpop.f32.mrf.mxu1 }
  0xe8   :  { %2535 = vmatpush.bf16.msrb.mxu2 %v3843_v32 }
  0xe9   :  { %2548 = vmatpush.bf16.msrb.mxu3 %v3851_v33  ;;  %v2297_v54 = vadd.f32 %v2296_v52, %v2284_v51 }
  0xea   :  { %2510 = vmatpush.bf16.msrb.mxu0 %v3826_v34 }
  0xeb   :  { %2523 = vmatpush.bf16.msrb.mxu1 %v3834_v35 }
  0xec   :  { %2536 = vmatpush.bf16.msrb.mxu2 %v3842_v36 }
  0xed   :  { %2549 = vmatpush.bf16.msrb.mxu3 %v3850_v37 }
  0xee   :  { %2511 = vmatpush.bf16.msrb.mxu0 %v3825_v40  ;;  %v2285_v0 = vpop.f32.mrf.mxu2 }
  0xef   :  { %2524 = vmatpush.bf16.msrb.mxu1 %v3833_v41  ;;  %v2298_v1 = vpop.f32.mrf.mxu3 }
  0xf0   :  { %2537 = vmatpush.bf16.msrb.mxu2 %v3841_v43 }
  0xf1   :  { %2550 = vmatpush.bf16.msrb.mxu3 %v3849_v44 }
  0xf2   :  { %2512 = vmatpush.bf16.msrb.mxu0 %v3824_v46 }
  0xf3   :  { %2525 = vmatpush.bf16.msrb.mxu1 %v3832_v47 }
  0xf4   :  { %2538 = vmatpush.bf16.msrb.mxu2 %v3840_v48 }
  0xf5   :  { %2551 = vmatpush.bf16.msrb.mxu3 %v3848_v49 }
  0xf6   :  { %2513 = vmatpush.bf16.msrb.mxu0 %v3823_v55 }
  0xf7   :  { %2526 = vmatpush.bf16.msrb.mxu1 %v3831_v56 }
  0xf8   :  { %2539 = vmatpush.bf16.msrb.mxu2 %v3839_v58 }
  0xf9   :  { %2552 = vmatpush.bf16.msrb.mxu3 %v3847_v59 }
  0xfa   :  { %2514 = vmatpush.bf16.msrb.mxu0 %v3822_v60 }
  0xfb   :  { %2527 = vmatpush.bf16.msrb.mxu1 %v3830_v61 }
  0xfc   :  { %2540 = vmatpush.bf16.msrb.mxu2 %v3838_v62 }
  0xfd   :  { %2553 = vmatpush.bf16.msrb.mxu3 %v3846_v63 }
  0xfe   :  { %2515 = vmatpush.bf16.msrb.mxu0 %v3821_v2  ;;  %v2309_v10 = vpop.f32.mrf.mxu0 }
  0xff   :  { %2528 = vmatpush.bf16.msrb.mxu1 %v3829_v3  ;;  %v2310_v11 = vadd.f32 %v2309_v10, %v2297_v54  ;;  %v2322_v12 = vpop.f32.mrf.mxu1 }
 0x100   :  { %2541 = vmatpush.bf16.msrb.mxu2 %v3837_v4 }
 0x101   :  { %2554 = vmatpush.bf16.msrb.mxu3 %v3845_v5  ;;  %2516 = vmatmul.bf16.vlgmr.msrb.gmra.mxu0 %v572_v6  ;;  %v2323_v13 = vadd.f32 %v2322_v12, %v2310_v11 }
 0x102   :  { %2529 = vmatmul.bf16.vlgmr.msrb.gmra.mxu1 %v573_v7 }
 0x103   :  { %2542 = vmatmul.bf16.vlgmr.msrb.gmra.mxu2 %v574_v8 }
 0x104   :  { %2555 = vmatmul.bf16.vlgmr.msrb.gmra.mxu3 %v575_v9 }
 0x106   :  { %v2335_v14 = vpop.f32.mrf.mxu2  ;;  %v2311_v17 = vpop.f32.mrf.mxu0 }
 0x107   :  { %v2336_v15 = vadd.f32 %v2335_v14, %v2323_v13  ;;  %v2348_v16 = vpop.f32.mrf.mxu3  ;;  %v2324_v19 = vpop.f32.mrf.mxu1 }
 0x109   :  { %v2349_v18 = vadd.f32 %v2348_v16, %v2336_v15 }
 0x10e   :  { %v2337_v20 = vpop.f32.mrf.mxu2 }
 0x10f   :  { %v2350_v21 = vpop.f32.mrf.mxu3 }
 0x11e   :  { %v2361_v22 = vpop.f32.mrf.mxu0 }
 0x11f   :  { %v2362_v23 = vadd.f32 %v2361_v22, %v2349_v18  ;;  %v2374_v24 = vpop.f32.mrf.mxu1 }
 0x121   :  { %v2375_v25 = vadd.f32 %v2374_v24, %v2362_v23 }
 0x126   :  { %v2387_v26 = vpop.f32.mrf.mxu2  ;;  %v2363_v29 = vpop.f32.mrf.mxu0 }
 0x127   :  { %v2388_v27 = vadd.f32 %v2387_v26, %v2375_v25  ;;  %v2400_v28 = vpop.f32.mrf.mxu3  ;;  %v2376_v31 = vpop.f32.mrf.mxu1 }
 0x129   :  { %v2401_v30 = vadd.f32 %v2400_v28, %v2388_v27 }
 0x12e   :  { %v2389_v32 = vpop.f32.mrf.mxu2 }
 0x12f   :  { %v2402_v33 = vpop.f32.mrf.mxu3 }
 0x13e   :  { %v2413_v34 = vpop.f32.mrf.mxu0 }
 0x13f   :  { %v2426_v35 = vpop.f32.mrf.mxu1  ;;  %v2414_v45 = vadd.f32 %v2413_v34, %v2401_v30 }
 0x141   :  { %v2427_v49 = vadd.f32 %v2426_v35, %v2414_v45 }
 0x146   :  { %v2439_v36 = vpop.f32.mrf.mxu2  ;;  %v2415_v38 = vpop.f32.mrf.mxu0 }
 0x147   :  { %v2452_v37 = vpop.f32.mrf.mxu3  ;;  %v2428_v39 = vpop.f32.mrf.mxu1  ;;  %v2440_v50 = vadd.f32 %v2439_v36, %v2427_v49 }
 0x149   :  { %v2453_v53 = vadd.f32 %v2452_v37, %v2440_v50 }
 0x14e   :  { %v2441_v40 = vpop.f32.mrf.mxu2 }
 0x14f   :  { %v2454_v41 = vpop.f32.mrf.mxu3 }
 0x15e   :  { %v2465_v42 = vpop.f32.mrf.mxu0 }
 0x15f   :  { %v2478_v43 = vpop.f32.mrf.mxu1  ;;  %v2466_v54 = vadd.f32 %v2465_v42, %v2453_v53 }
 0x161   :  { %v2479_v55 = vadd.f32 %v2478_v43, %v2466_v54 }
 0x166   :  { %v2491_v44 = vpop.f32.mrf.mxu2  ;;  %v2467_v47 = vpop.f32.mrf.mxu0 }
 0x167   :  { %v2504_v46 = vpop.f32.mrf.mxu3  ;;  %v2480_v48 = vpop.f32.mrf.mxu1  ;;  %v2492_v56 = vadd.f32 %v2491_v44, %v2479_v55 }
 0x169   :  { %v2505_v57 = vadd.f32 %v2504_v46, %v2492_v56 }
 0x16e   :  { %v2493_v51 = vpop.f32.mrf.mxu2 }
 0x16f   :  { %v2506_v52 = vpop.f32.mrf.mxu3 }
 0x17e   :  { %v2517_v58 = vpop.f32.mrf.mxu0 }
 0x17f   :  { %v2530_v59 = vpop.f32.mrf.mxu1  ;;  %v2518_v60 = vadd.f32 %v2517_v58, %v2505_v57 }
 0x181   :  { %v2531_v61 = vadd.f32 %v2530_v59, %v2518_v60 }
 0x186   :  { %v2543_v62 = vpop.f32.mrf.mxu2  ;;  %v2519_v1 = vpop.f32.mrf.mxu0 }
 0x187   :  { %v2556_v63 = vpop.f32.mrf.mxu3  ;;  %v2544_v0 = vadd.f32 %v2543_v62, %v2531_v61  ;;  %v2532_v2 = vpop.f32.mrf.mxu1 }
 0x189   :  { %v2557_v3 = vadd.f32 %v2556_v63, %v2544_v0 }
 0x18b   :  { %v2560_v4 = vsub.f32 0.0, %v2557_v3 }
 0x18d   :  { %v2561_v5 = vmul.f32 1.442695, %v2560_v4 }
 0x18e   :  { %v2545_v6 = vpop.f32.mrf.mxu2 }
 0x18f   :  { %v2558_v7 = vpop.f32.mrf.mxu3  ;;  %3854 = vpow2.f32 %v2561_v5 }
 0x195   :  { %v3855_v8 = vpop.eup %3854 }
 0x196   :  { %v2563_v9 = vadd.f32 1.0, %v3855_v8 }
 0x198   :  { %3856 = vrcp.f32 %v2563_v9 }
 0x19e   :  { %v3857_v10 = vpop.eup %3856 }
 0x19f   :  { %v2565_v11 = vmax.f32 %v3857_v10, 0.0 }
 0x1a1   :  { %v2566_v12 = vmin.f32 %v2565_v11, 1.0 }
 0x1a3   :  { %2568 = vst.msk [vmem:[%s4691_s3] sm:$0x3] %vm2567_vm0, %v2566_v12 }

</bundles_post_ra>
